<compile_context>
chip_gen: v7x
topology: tpu7x:2x2x1
jax: 0.10.0
libtpu: 0.0.40
codegen_flags: <defaults>
</compile_context>

<pallas_src>
import math

import numpy as np
import jax
import jax.numpy as jnp
from jax.experimental import pallas as pl
from jax.experimental.pallas import tpu as pltpu

# ---------------- config ----------------
NFEATS      = 16
LATENT_SIZE = 1
LATENT_DIM  = 32                       # D
FF_SIZE     = 64
NUM_LAYERS  = 3                        # must be odd for SkipTransformerEncoder
NUM_HEADS   = 2
HEAD_DIM    = LATENT_DIM // NUM_HEADS  # 16
NUM_BLOCKS  = (NUM_LAYERS - 1) // 2    # 1
NTOK        = 2 * LATENT_SIZE          # mlp_dist=False -> 2 distribution tokens

# ---------------- packed-parameter slab layout (static row offsets) ----------
WCOL = 3 * LATENT_DIM                              # slab width = 96 lanes

LAYER_W_ROWS = 3 * LATENT_DIM + FF_SIZE            # qkv(32)+out(32)+ff1(32)+ff2(64)=160
SKIP_W_ROW   = NUM_LAYERS * LAYER_W_ROWS           # 480
EXTRA_W_ROW  = SKIP_W_ROW + NUM_BLOCKS * 2 * LATENT_DIM   # 544 (skel_w / final_w)

LAYER_V_ROWS = 8                                   # qkv_b,out_b,ff1_b,ff2_b,n1_w,n1_b,n2_w,n2_b
SKIP_B_ROW   = NUM_LAYERS * LAYER_V_ROWS           # 24
FN_ROW       = SKIP_B_ROW + NUM_BLOCKS             # 25 (fn_w), 26 (fn_b)
EXTRA_V_ROW  = FN_ROW + 2                          # 27
ENC_SKEL_B_ROW  = EXTRA_V_ROW                      # 27
ENC_TOK_ROW     = EXTRA_V_ROW + 1                  # 28..29 (global motion token)
DEC_FINAL_B_ROW = EXTRA_V_ROW                      # 27


# ---------------- shared in-kernel transformer ----------------
def _skip_encoder(x, biases, bs, T, w_ref, v_ref):
    """Post-norm SkipTransformerEncoder on a batch-stacked (bs*T, D) slab.

    x: (bs*T, D) value.  biases: list of bs (T, T) additive key-padding biases
    (hoisted / pre-broadcast once).  w_ref / v_ref: packed weight / vector slabs.
    """
    D, DH, FF = LATENT_DIM, HEAD_DIM, FF_SIZE
    scale = 1.0 / math.sqrt(DH)

    def wmat(r, nrows, ncols):
        return w_ref[r:r + nrows, 0:ncols]

    def vvec(r, ncols):
        return v_ref[r:r + 1, 0:ncols]

    def layer_norm(v, w, b):
        m = jnp.mean(v, axis=-1, keepdims=True)
        c = v - m
        var = jnp.mean(c * c, axis=-1, keepdims=True)
        return c * jax.lax.rsqrt(var + 1e-5) * w + b

    def enc_layer(v, l):
        wr = l * LAYER_W_ROWS
        vr = l * LAYER_V_ROWS
        qkv_w = wmat(wr, D, 3 * D)
        out_w = wmat(wr + D, D, D)
        ff1_w = wmat(wr + 2 * D, D, FF)
        ff2_w = wmat(wr + 3 * D, FF, D)
        qkv_b, out_b = vvec(vr + 0, 3 * D), vvec(vr + 1, D)
        ff1_b, ff2_b = vvec(vr + 2, FF), vvec(vr + 3, D)
        n1_w, n1_b = vvec(vr + 4, D), vvec(vr + 5, D)
        n2_w, n2_b = vvec(vr + 6, D), vvec(vr + 7, D)

        # ---- self attention (eval, dropout = identity) ----
        # batched QKV projection: one matmul with M = bs*T
        qkv = jnp.dot(v, qkv_w, preferred_element_type=jnp.float32) + qkv_b  # (bs*T, 96)
        attn_rows = []
        for b in range(bs):                       # per-batch (T,T) score/PV only
            r0 = b * T
            heads = []
            for h in range(NUM_HEADS):
                qh = qkv[r0:r0 + T, h * DH:(h + 1) * DH]
                kh = qkv[r0:r0 + T, D + h * DH:D + (h + 1) * DH]
                vh = qkv[r0:r0 + T, 2 * D + h * DH:2 * D + (h + 1) * DH]
                s = jnp.dot(qh, kh.T, preferred_element_type=jnp.float32) * scale + biases[b]
                s = s - jnp.max(s, axis=-1, keepdims=True)
                p = jnp.exp(s)
                p = p * pl.reciprocal(jnp.sum(p, axis=-1, keepdims=True), approx=True)
                heads.append(jnp.dot(p, vh, preferred_element_type=jnp.float32))
            attn_rows.append(jnp.concatenate(heads, axis=-1))   # (T, D) in vregs
        # single out-projection over the whole batch (M = bs*T, K = D)
        attn = jnp.dot(jnp.concatenate(attn_rows, axis=0), out_w,
                       preferred_element_type=jnp.float32) + out_b
        v = layer_norm(v + attn, n1_w, n1_b)
        # ---- feed forward (relu), batched ----
        hdn = jnp.maximum(
            jnp.dot(v, ff1_w, preferred_element_type=jnp.float32) + ff1_b, 0.0)
        v = layer_norm(
            v + jnp.dot(hdn, ff2_w, preferred_element_type=jnp.float32) + ff2_b,
            n2_w, n2_b)
        return v

    idx, saved = 0, []
    for _ in range(NUM_BLOCKS):                 # input blocks
        x = enc_layer(x, idx); idx += 1
        saved.append(x)
    x = enc_layer(x, idx); idx += 1             # middle block
    for blk in range(NUM_BLOCKS):               # output blocks with skip linears
        skip = saved.pop()
        sr = SKIP_W_ROW + blk * 2 * D
        # fused skip linear: cat([x, skip], -1) @ W(2D, D) -> one MXU push
        x = (jnp.dot(jnp.concatenate([x, skip], axis=-1), wmat(sr, 2 * D, D),
                     preferred_element_type=jnp.float32)
             + vvec(SKIP_B_ROW + blk, D))
        x = enc_layer(x, idx); idx += 1
    return layer_norm(x, vvec(FN_ROW, D), vvec(FN_ROW + 1, D))   # final LayerNorm


# ---------------- fused kernels ----------------
def encode_kernel(feat_ref, mbias_ref, pe_ref, w_ref, v_ref, o_ref):
    # feat_ref: (bs*F, nfeats)  mbias_ref: (bs, T)  pe_ref: (T, D)
    # w_ref: (560, 96)  v_ref: (30, 96)  o_ref: (bs*NTOK, D)
    D = LATENT_DIM
    T = pe_ref.shape[0]
    bs = mbias_ref.shape[0]
    F = feat_ref.shape[0] // bs
    skel_w = w_ref[EXTRA_W_ROW:EXTRA_W_ROW + NFEATS, 0:D]
    skel_b = v_ref[ENC_SKEL_B_ROW:ENC_SKEL_B_ROW + 1, 0:D]
    token  = v_ref[ENC_TOK_ROW:ENC_TOK_ROW + NTOK, 0:D]        # (NTOK, D)

    # batched skel_embedding: one matmul with M = bs*F
    emb = jnp.dot(feat_ref[...], skel_w,
                  preferred_element_type=jnp.float32) + skel_b
    pe = pe_ref[...]
    tok_pe = token + pe[0:NTOK, :]            # dist-token rows (+PE), batch-invariant
    pe_frm = pe[NTOK:T, :]
    rows = []
    for b in range(bs):                       # assemble xseq in registers
        rows.append(tok_pe)
        rows.append(emb[b * F:(b + 1) * F, :] + pe_frm)
    x = jnp.concatenate(rows, axis=0)         # (bs*T, D)

    # hoisted key-padding bias broadcast (reused across 3 layers x 2 heads)
    biases = [jnp.broadcast_to(mbias_ref[b:b + 1, :], (T, T)) for b in range(bs)]
    y = _skip_encoder(x, biases, bs, T, w_ref, v_ref)

    # only the distribution tokens; one full-slab store
    o_ref[...] = jnp.concatenate(
        [y[b * T:b * T + NTOK, :] for b in range(bs)], axis=0)


def decode_kernel(z_ref, mbias_ref, keep_ref, pe_ref, w_ref, v_ref, o_ref):
    # z_ref: (bs*zs, D)  mbias_ref: (bs, T)  keep_ref: (bs*F, 1)
    # w_ref: (576, 96)  v_ref: (28, 96)  o_ref: (bs*F, nfeats)
    D = LATENT_DIM
    T = pe_ref.shape[0]
    bs = mbias_ref.shape[0]
    zs = z_ref.shape[0] // bs
    final_w = w_ref[EXTRA_W_ROW:EXTRA_W_ROW + D, 0:NFEATS]
    final_b = v_ref[DEC_FINAL_B_ROW:DEC_FINAL_B_ROW + 1, 0:NFEATS]

    pe = pe_ref[...]
    pe_z   = pe[0:zs, :]
    pe_frm = pe[zs:T, :]                      # zero queries + PE == PE (batch-invariant)
    rows = []
    for b in range(bs):                       # assemble xseq in registers
        rows.append(z_ref[b * zs:(b + 1) * zs, :] + pe_z)
        rows.append(pe_frm)
    x = jnp.concatenate(rows, axis=0)         # (bs*T, D)

    biases = [jnp.broadcast_to(mbias_ref[b:b + 1, :], (T, T)) for b in range(bs)]
    y = _skip_encoder(x, biases, bs, T, w_ref, v_ref)

    # gather frame rows for the whole batch, then ONE final_layer matmul (M = bs*F)
    yf = jnp.concatenate([y[b * T + zs:(b + 1) * T, :] for b in range(bs)], axis=0)
    out = jnp.dot(yf, final_w, preferred_element_type=jnp.float32) + final_b
    o_ref[...] = out * keep_ref[...]          # output[~mask.T] = 0; one full store


# ---------------- parameter init (deterministic, synthetic) + packing --------
def _nrm(key, shape, scale=0.05):
    return (scale * jax.random.normal(key, shape)).astype(jnp.float32)


def init_skip_stack(key, L, D, ff):
    nb = max((L - 1) // 2, 1)
    ks = jax.random.split(key, 10)
    return {
        "qkv_w": _nrm(ks[0], (L, D, 3 * D)), "qkv_b": _nrm(ks[1], (L, 1, 3 * D)),
        "out_w": _nrm(ks[2], (L, D, D)),     "out_b": _nrm(ks[3], (L, 1, D)),
        "ff1_w": _nrm(ks[4], (L, D, ff)),    "ff1_b": _nrm(ks[5], (L, 1, ff)),
        "ff2_w": _nrm(ks[6], (L, ff, D)),    "ff2_b": _nrm(ks[7], (L, 1, D)),
        "n1_w": jnp.ones((L, 1, D), jnp.float32), "n1_b": jnp.zeros((L, 1, D), jnp.float32),
        "n2_w": jnp.ones((L, 1, D), jnp.float32), "n2_b": jnp.zeros((L, 1, D), jnp.float32),
        "skip_w": _nrm(ks[8], (nb, 2 * D, D)), "skip_b": _nrm(ks[9], (nb, 1, D)),
        "fn_w": jnp.ones((1, D), jnp.float32), "fn_b": jnp.zeros((1, D), jnp.float32),
    }


def _pad_cols(a):
    return jnp.pad(a, ((0, 0), (0, WCOL - a.shape[-1])))


def pack_stack(sp, extra_w=(), extra_v=()):
    """Pack one SkipTransformerEncoder stack into (W slab, bias/LN slab)."""
    w_rows, v_rows = [], []
    for l in range(NUM_LAYERS):
        w_rows += [_pad_cols(sp["qkv_w"][l]), _pad_cols(sp["out_w"][l]),
                   _pad_cols(sp["ff1_w"][l]), _pad_cols(sp["ff2_w"][l])]
    for b in range(NUM_BLOCKS):
        w_rows.append(_pad_cols(sp["skip_w"][b]))
    for w in extra_w:
        w_rows.append(_pad_cols(w))
    for l in range(NUM_LAYERS):
        for name in ("qkv_b", "out_b", "ff1_b", "ff2_b",
                     "n1_w", "n1_b", "n2_w", "n2_b"):
            v_rows.append(_pad_cols(sp[name][l]))
    for b in range(NUM_BLOCKS):
        v_rows.append(_pad_cols(sp["skip_b"][b]))
    v_rows += [_pad_cols(sp["fn_w"]), _pad_cols(sp["fn_b"])]
    for v in extra_v:
        v_rows.append(_pad_cols(v))
    return jnp.concatenate(w_rows, axis=0), jnp.concatenate(v_rows, axis=0)


def init_params(key):
    ks = jax.random.split(key, 7)
    params = {
        # nn.Linear weights stored transposed to (in, out)
        "skel_w": _nrm(ks[0], (NFEATS, LATENT_DIM)),
        "skel_b": _nrm(ks[1], (1, LATENT_DIM)),
        "final_w": _nrm(ks[2], (LATENT_DIM, NFEATS)),
        "final_b": _nrm(ks[3], (1, NFEATS)),
        # mlp_dist=False -> global_motion_token is (2*latent_size, latent_dim)
        "global_motion_token": jax.random.normal(ks[4], (NTOK, LATENT_DIM), jnp.float32),
        "encoder": init_skip_stack(ks[5], NUM_LAYERS, LATENT_DIM, FF_SIZE),
        "decoder": init_skip_stack(ks[6], NUM_LAYERS, LATENT_DIM, FF_SIZE),
    }
    params["enc_w"], params["enc_v"] = pack_stack(
        params["encoder"],
        extra_w=(params["skel_w"],),
        extra_v=(params["skel_b"], params["global_motion_token"]))
    params["dec_w"], params["dec_v"] = pack_stack(
        params["decoder"],
        extra_w=(params["final_w"],),
        extra_v=(params["final_b"],))
    return params


def sinusoidal_pe(T, d):
    pos = np.arange(T)[:, None].astype(np.float64)
    div = np.exp(np.arange(0, d, 2).astype(np.float64) * (-np.log(10000.0) / d))
    pe = np.zeros((T, d), dtype=np.float64)
    pe[:, 0::2] = np.sin(pos * div)
    pe[:, 1::2] = np.cos(pos * div)
    return jnp.asarray(pe, jnp.float32)


# ---------------- encode / decode (MotionPrior semantics) ----------------
def encode(features, params, lengths=None, rng=None):
    bs, nframes, _ = features.shape
    if lengths is None:
        lengths = [nframes] * bs
    T = NTOK + nframes
    lengths_arr = jnp.asarray(lengths)
    frame_valid = jnp.arange(nframes)[None, :] < lengths_arr[:, None]
    aug_valid = jnp.concatenate([jnp.ones((bs, NTOK), bool), frame_valid], axis=1)
    mask_bias = jnp.where(aug_valid, 0.0, -1e9).astype(jnp.float32)   # (bs, T)

    dist_flat = pl.pallas_call(
        encode_kernel,
        out_shape=jax.ShapeDtypeStruct((bs * NTOK, LATENT_DIM), jnp.float32),
    )(features.reshape(bs * nframes, NFEATS), mask_bias,
      sinusoidal_pe(T, LATENT_DIM), params["enc_w"], params["enc_v"])

    dist_tok = dist_flat.reshape(bs, NTOK, LATENT_DIM)
    dist = jnp.transpose(dist_tok, (1, 0, 2))          # (2*latent_size, bs, D) time-first
    mu, logvar = dist[:LATENT_SIZE], dist[LATENT_SIZE:]
    std = jnp.exp(0.5 * logvar)                        # logvar.exp().pow(0.5)
    eps = jax.random.normal(rng, mu.shape, jnp.float32)
    latent = mu + std * eps                            # Normal(mu, std).rsample()
    return latent, (mu, std)


def decode(z, lengths, params):
    # z: (latent_size, bs, D) time-first (matches torch); arch='all_encoder'
    zs, bs = z.shape[0], z.shape[1]
    nframes = int(max(lengths))
    T = zs + nframes
    lengths_arr = jnp.asarray(lengths)
    frame_valid = jnp.arange(nframes)[None, :] < lengths_arr[:, None]
    aug_valid = jnp.concatenate([jnp.ones((bs, zs), bool), frame_valid], axis=1)
    mask_bias = jnp.where(aug_valid, 0.0, -1e9).astype(jnp.float32)   # (bs, T)
    keep = frame_valid.reshape(bs * nframes, 1).astype(jnp.float32)   # (bs*F, 1)

    out_flat = pl.pallas_call(
        decode_kernel,
        out_shape=jax.ShapeDtypeStruct((bs * nframes, NFEATS), jnp.float32),
    )(jnp.transpose(z, (1, 0, 2)).reshape(bs * zs, LATENT_DIM), mask_bias, keep,
      sinusoidal_pe(T, LATENT_DIM), params["dec_w"], params["dec_v"])
    return out_flat.reshape(bs, nframes, NFEATS)        # (bs, nframes, nfeats)


# TODO(synk): dropout and torch.distributions.Normal are represented by eval-mode
# identity and explicit reparameterization (mu + std * eps) respectively.

if __name__ == "__main__":
    key = jax.random.PRNGKey(0)
    k_feat, k_param, k_eps = jax.random.split(key, 3)
    bs, nframes = 2, 8
    features = jax.random.normal(k_feat, (bs, nframes, NFEATS), jnp.float32)
    params = init_params(k_param)

    latent, (mu, std) = encode(features, params, rng=k_eps)
    feats_out = decode(latent, [nframes] * bs, params)
    jax.block_until_ready((latent, mu, std, feats_out))

    assert latent.shape == (LATENT_SIZE, bs, LATENT_DIM)
    assert mu.shape == (LATENT_SIZE, bs, LATENT_DIM)
    assert feats_out.shape == (bs, nframes, NFEATS)
    assert bool(jnp.all(jnp.isfinite(latent))) and bool(jnp.all(jnp.isfinite(feats_out)))
    print("KERNEL_OK")
</pallas_src>

<mosaic_0001>
module attributes {stable_mosaic.version = 11 : i64} {
  func.func @encode_kernel(%arg0: memref<16x16xf32, #tpu.memory_space<vmem>>, %arg1: memref<2x10xf32, #tpu.memory_space<vmem>>, %arg2: memref<10x32xf32, #tpu.memory_space<vmem>>, %arg3: memref<560x96xf32, #tpu.memory_space<vmem>>, %arg4: memref<30x96xf32, #tpu.memory_space<vmem>>, %arg5: memref<4x32xf32, #tpu.memory_space<vmem>>) attributes {dimension_semantics = [], scalar_prefetch = 0 : i64, scratch_operands = 0 : i64, tpu.core_type = #tpu.core_type<tc>} {
    %c544 = arith.constant 544 : index
    %c0 = arith.constant 0 : index
    %0 = vector.load %arg3[%c544, %c0] : memref<560x96xf32, #tpu.memory_space<vmem>>, vector<16x32xf32>
    %c27 = arith.constant 27 : index
    %c0_0 = arith.constant 0 : index
    %1 = vector.load %arg4[%c27, %c0_0] : memref<30x96xf32, #tpu.memory_space<vmem>>, vector<1x32xf32>
    %c28 = arith.constant 28 : index
    %c0_1 = arith.constant 0 : index
    %2 = vector.load %arg4[%c28, %c0_1] : memref<30x96xf32, #tpu.memory_space<vmem>>, vector<2x32xf32>
    %c0_2 = arith.constant 0 : index
    %c0_3 = arith.constant 0 : index
    %3 = vector.load %arg0[%c0_2, %c0_3] : memref<16x16xf32, #tpu.memory_space<vmem>>, vector<16x16xf32>
    %cst = arith.constant dense<0.000000e+00> : vector<16x32xf32>
    %4 = tpu.matmul %3, %0, %cst {dimension_numbers = #tpu.dot_dimension_numbers<[1], [0], [0], [1], [0, 0, 1, 1], [], []>} : vector<16x16xf32>, vector<16x32xf32>, vector<16x32xf32> -> vector<16x32xf32>
    %5 = vector.broadcast %1 : vector<1x32xf32> to vector<16x32xf32>
    %6 = arith.addf %4, %5 : vector<16x32xf32>
    %c0_4 = arith.constant 0 : index
    %c0_5 = arith.constant 0 : index
    %7 = vector.load %arg2[%c0_4, %c0_5] : memref<10x32xf32, #tpu.memory_space<vmem>>, vector<10x32xf32>
    %8 = vector.extract_strided_slice %7 {offsets = [0, 0], sizes = [2, 32], strides = [1, 1]} : vector<10x32xf32> to vector<2x32xf32>
    %9 = arith.addf %2, %8 : vector<2x32xf32>
    %10 = vector.extract_strided_slice %7 {offsets = [2, 0], sizes = [8, 32], strides = [1, 1]} : vector<10x32xf32> to vector<8x32xf32>
    %11 = vector.extract_strided_slice %6 {offsets = [0, 0], sizes = [8, 32], strides = [1, 1]} : vector<16x32xf32> to vector<8x32xf32>
    %12 = arith.addf %11, %10 : vector<8x32xf32>
    %13 = vector.extract_strided_slice %6 {offsets = [8, 0], sizes = [8, 32], strides = [1, 1]} : vector<16x32xf32> to vector<8x32xf32>
    %14 = arith.addf %13, %10 : vector<8x32xf32>
    %15 = tpu.concatenate %9, %12, %9, %14 in 0 : vector<2x32xf32>, vector<8x32xf32>, vector<2x32xf32>, vector<8x32xf32> -> vector<20x32xf32>
    %c0_6 = arith.constant 0 : index
    %c0_7 = arith.constant 0 : index
    %16 = vector.load %arg1[%c0_6, %c0_7] : memref<2x10xf32, #tpu.memory_space<vmem>>, vector<1x10xf32>
    %17 = vector.shape_cast %16 : vector<1x10xf32> to vector<1x10xf32>
    %18 = vector.broadcast %17 : vector<1x10xf32> to vector<10x10xf32>
    %c1 = arith.constant 1 : index
    %c0_8 = arith.constant 0 : index
    %19 = vector.load %arg1[%c1, %c0_8] : memref<2x10xf32, #tpu.memory_space<vmem>>, vector<1x10xf32>
    %20 = vector.shape_cast %19 : vector<1x10xf32> to vector<1x10xf32>
    %21 = vector.broadcast %20 : vector<1x10xf32> to vector<10x10xf32>
    %c0_9 = arith.constant 0 : index
    %c0_10 = arith.constant 0 : index
    %22 = vector.load %arg3[%c0_9, %c0_10] : memref<560x96xf32, #tpu.memory_space<vmem>>, vector<32x96xf32>
    %c32 = arith.constant 32 : index
    %c0_11 = arith.constant 0 : index
    %23 = vector.load %arg3[%c32, %c0_11] : memref<560x96xf32, #tpu.memory_space<vmem>>, vector<32x32xf32>
    %c64 = arith.constant 64 : index
    %c0_12 = arith.constant 0 : index
    %24 = vector.load %arg3[%c64, %c0_12] : memref<560x96xf32, #tpu.memory_space<vmem>>, vector<32x64xf32>
    %c96 = arith.constant 96 : index
    %c0_13 = arith.constant 0 : index
    %25 = vector.load %arg3[%c96, %c0_13] : memref<560x96xf32, #tpu.memory_space<vmem>>, vector<64x32xf32>
    %c0_14 = arith.constant 0 : index
    %c0_15 = arith.constant 0 : index
    %26 = vector.load %arg4[%c0_14, %c0_15] : memref<30x96xf32, #tpu.memory_space<vmem>>, vector<1x96xf32>
    %c1_16 = arith.constant 1 : index
    %c0_17 = arith.constant 0 : index
    %27 = vector.load %arg4[%c1_16, %c0_17] : memref<30x96xf32, #tpu.memory_space<vmem>>, vector<1x32xf32>
    %c2 = arith.constant 2 : index
    %c0_18 = arith.constant 0 : index
    %28 = vector.load %arg4[%c2, %c0_18] : memref<30x96xf32, #tpu.memory_space<vmem>>, vector<1x64xf32>
    %c3 = arith.constant 3 : index
    %c0_19 = arith.constant 0 : index
    %29 = vector.load %arg4[%c3, %c0_19] : memref<30x96xf32, #tpu.memory_space<vmem>>, vector<1x32xf32>
    %c4 = arith.constant 4 : index
    %c0_20 = arith.constant 0 : index
    %30 = vector.load %arg4[%c4, %c0_20] : memref<30x96xf32, #tpu.memory_space<vmem>>, vector<1x32xf32>
    %c5 = arith.constant 5 : index
    %c0_21 = arith.constant 0 : index
    %31 = vector.load %arg4[%c5, %c0_21] : memref<30x96xf32, #tpu.memory_space<vmem>>, vector<1x32xf32>
    %c6 = arith.constant 6 : index
    %c0_22 = arith.constant 0 : index
    %32 = vector.load %arg4[%c6, %c0_22] : memref<30x96xf32, #tpu.memory_space<vmem>>, vector<1x32xf32>
    %c7 = arith.constant 7 : index
    %c0_23 = arith.constant 0 : index
    %33 = vector.load %arg4[%c7, %c0_23] : memref<30x96xf32, #tpu.memory_space<vmem>>, vector<1x32xf32>
    %cst_24 = arith.constant dense<0.000000e+00> : vector<20x96xf32>
    %34 = tpu.matmul %15, %22, %cst_24 {dimension_numbers = #tpu.dot_dimension_numbers<[1], [0], [0], [1], [0, 0, 1, 1], [], []>} : vector<20x32xf32>, vector<32x96xf32>, vector<20x96xf32> -> vector<20x96xf32>
    %35 = vector.broadcast %26 : vector<1x96xf32> to vector<20x96xf32>
    %36 = arith.addf %34, %35 : vector<20x96xf32>
    %37 = vector.extract_strided_slice %36 {offsets = [0, 0], sizes = [10, 16], strides = [1, 1]} : vector<20x96xf32> to vector<10x16xf32>
    %38 = vector.extract_strided_slice %36 {offsets = [0, 32], sizes = [10, 16], strides = [1, 1]} : vector<20x96xf32> to vector<10x16xf32>
    %39 = vector.extract_strided_slice %36 {offsets = [0, 64], sizes = [10, 16], strides = [1, 1]} : vector<20x96xf32> to vector<10x16xf32>
    %40 = tpu.transpose %38, [1, 0] : vector<10x16xf32> -> vector<16x10xf32>
    %cst_25 = arith.constant dense<0.000000e+00> : vector<10x10xf32>
    %41 = tpu.matmul %37, %40, %cst_25 {dimension_numbers = #tpu.dot_dimension_numbers<[1], [0], [0], [1], [0, 0, 1, 1], [], []>} : vector<10x16xf32>, vector<16x10xf32>, vector<10x10xf32> -> vector<10x10xf32>
    %cst_26 = arith.constant 2.500000e-01 : f32
    %42 = vector.broadcast %cst_26 : f32 to vector<10x10xf32>
    %43 = arith.mulf %41, %42 : vector<10x10xf32>
    %44 = arith.addf %43, %18 : vector<10x10xf32>
    %cst_27 = arith.constant dense<0xFF800000> : vector<10xf32>
    %45 = vector.multi_reduction <maximumf>, %44, %cst_27 [1] : vector<10x10xf32> to vector<10xf32>
    %46 = vector.shape_cast %45 : vector<10xf32> to vector<10x1xf32>
    %47 = vector.broadcast %46 : vector<10x1xf32> to vector<10x10xf32>
    %48 = arith.subf %44, %47 : vector<10x10xf32>
    %49 = math.exp %48 : vector<10x10xf32>
    %cst_28 = arith.constant dense<0.000000e+00> : vector<10xf32>
    %50 = vector.multi_reduction <add>, %49, %cst_28 [1] : vector<10x10xf32> to vector<10xf32>
    %51 = vector.shape_cast %50 : vector<10xf32> to vector<10x1xf32>
    %52 = tpu.reciprocal %51 {approx = true} : vector<10x1xf32> -> vector<10x1xf32>
    %53 = vector.broadcast %52 : vector<10x1xf32> to vector<10x10xf32>
    %54 = arith.mulf %49, %53 : vector<10x10xf32>
    %cst_29 = arith.constant dense<0.000000e+00> : vector<10x16xf32>
    %55 = tpu.matmul %54, %39, %cst_29 {dimension_numbers = #tpu.dot_dimension_numbers<[1], [0], [0], [1], [0, 0, 1, 1], [], []>} : vector<10x10xf32>, vector<10x16xf32>, vector<10x16xf32> -> vector<10x16xf32>
    %56 = vector.extract_strided_slice %36 {offsets = [0, 16], sizes = [10, 16], strides = [1, 1]} : vector<20x96xf32> to vector<10x16xf32>
    %57 = vector.extract_strided_slice %36 {offsets = [0, 48], sizes = [10, 16], strides = [1, 1]} : vector<20x96xf32> to vector<10x16xf32>
    %58 = vector.extract_strided_slice %36 {offsets = [0, 80], sizes = [10, 16], strides = [1, 1]} : vector<20x96xf32> to vector<10x16xf32>
    %59 = tpu.transpose %57, [1, 0] : vector<10x16xf32> -> vector<16x10xf32>
    %cst_30 = arith.constant dense<0.000000e+00> : vector<10x10xf32>
    %60 = tpu.matmul %56, %59, %cst_30 {dimension_numbers = #tpu.dot_dimension_numbers<[1], [0], [0], [1], [0, 0, 1, 1], [], []>} : vector<10x16xf32>, vector<16x10xf32>, vector<10x10xf32> -> vector<10x10xf32>
    %cst_31 = arith.constant 2.500000e-01 : f32
    %61 = vector.broadcast %cst_31 : f32 to vector<10x10xf32>
    %62 = arith.mulf %60, %61 : vector<10x10xf32>
    %63 = arith.addf %62, %18 : vector<10x10xf32>
    %cst_32 = arith.constant dense<0xFF800000> : vector<10xf32>
    %64 = vector.multi_reduction <maximumf>, %63, %cst_32 [1] : vector<10x10xf32> to vector<10xf32>
    %65 = vector.shape_cast %64 : vector<10xf32> to vector<10x1xf32>
    %66 = vector.broadcast %65 : vector<10x1xf32> to vector<10x10xf32>
    %67 = arith.subf %63, %66 : vector<10x10xf32>
    %68 = math.exp %67 : vector<10x10xf32>
    %cst_33 = arith.constant dense<0.000000e+00> : vector<10xf32>
    %69 = vector.multi_reduction <add>, %68, %cst_33 [1] : vector<10x10xf32> to vector<10xf32>
    %70 = vector.shape_cast %69 : vector<10xf32> to vector<10x1xf32>
    %71 = tpu.reciprocal %70 {approx = true} : vector<10x1xf32> -> vector<10x1xf32>
    %72 = vector.broadcast %71 : vector<10x1xf32> to vector<10x10xf32>
    %73 = arith.mulf %68, %72 : vector<10x10xf32>
    %cst_34 = arith.constant dense<0.000000e+00> : vector<10x16xf32>
    %74 = tpu.matmul %73, %58, %cst_34 {dimension_numbers = #tpu.dot_dimension_numbers<[1], [0], [0], [1], [0, 0, 1, 1], [], []>} : vector<10x10xf32>, vector<10x16xf32>, vector<10x16xf32> -> vector<10x16xf32>
    %75 = tpu.concatenate %55, %74 in 1 : vector<10x16xf32>, vector<10x16xf32> -> vector<10x32xf32>
    %76 = vector.extract_strided_slice %36 {offsets = [10, 0], sizes = [10, 16], strides = [1, 1]} : vector<20x96xf32> to vector<10x16xf32>
    %77 = vector.extract_strided_slice %36 {offsets = [10, 32], sizes = [10, 16], strides = [1, 1]} : vector<20x96xf32> to vector<10x16xf32>
    %78 = vector.extract_strided_slice %36 {offsets = [10, 64], sizes = [10, 16], strides = [1, 1]} : vector<20x96xf32> to vector<10x16xf32>
    %79 = tpu.transpose %77, [1, 0] : vector<10x16xf32> -> vector<16x10xf32>
    %cst_35 = arith.constant dense<0.000000e+00> : vector<10x10xf32>
    %80 = tpu.matmul %76, %79, %cst_35 {dimension_numbers = #tpu.dot_dimension_numbers<[1], [0], [0], [1], [0, 0, 1, 1], [], []>} : vector<10x16xf32>, vector<16x10xf32>, vector<10x10xf32> -> vector<10x10xf32>
    %cst_36 = arith.constant 2.500000e-01 : f32
    %81 = vector.broadcast %cst_36 : f32 to vector<10x10xf32>
    %82 = arith.mulf %80, %81 : vector<10x10xf32>
    %83 = arith.addf %82, %21 : vector<10x10xf32>
    %cst_37 = arith.constant dense<0xFF800000> : vector<10xf32>
    %84 = vector.multi_reduction <maximumf>, %83, %cst_37 [1] : vector<10x10xf32> to vector<10xf32>
    %85 = vector.shape_cast %84 : vector<10xf32> to vector<10x1xf32>
    %86 = vector.broadcast %85 : vector<10x1xf32> to vector<10x10xf32>
    %87 = arith.subf %83, %86 : vector<10x10xf32>
    %88 = math.exp %87 : vector<10x10xf32>
    %cst_38 = arith.constant dense<0.000000e+00> : vector<10xf32>
    %89 = vector.multi_reduction <add>, %88, %cst_38 [1] : vector<10x10xf32> to vector<10xf32>
    %90 = vector.shape_cast %89 : vector<10xf32> to vector<10x1xf32>
    %91 = tpu.reciprocal %90 {approx = true} : vector<10x1xf32> -> vector<10x1xf32>
    %92 = vector.broadcast %91 : vector<10x1xf32> to vector<10x10xf32>
    %93 = arith.mulf %88, %92 : vector<10x10xf32>
    %cst_39 = arith.constant dense<0.000000e+00> : vector<10x16xf32>
    %94 = tpu.matmul %93, %78, %cst_39 {dimension_numbers = #tpu.dot_dimension_numbers<[1], [0], [0], [1], [0, 0, 1, 1], [], []>} : vector<10x10xf32>, vector<10x16xf32>, vector<10x16xf32> -> vector<10x16xf32>
    %95 = vector.extract_strided_slice %36 {offsets = [10, 16], sizes = [10, 16], strides = [1, 1]} : vector<20x96xf32> to vector<10x16xf32>
    %96 = vector.extract_strided_slice %36 {offsets = [10, 48], sizes = [10, 16], strides = [1, 1]} : vector<20x96xf32> to vector<10x16xf32>
    %97 = vector.extract_strided_slice %36 {offsets = [10, 80], sizes = [10, 16], strides = [1, 1]} : vector<20x96xf32> to vector<10x16xf32>
    %98 = tpu.transpose %96, [1, 0] : vector<10x16xf32> -> vector<16x10xf32>
    %cst_40 = arith.constant dense<0.000000e+00> : vector<10x10xf32>
    %99 = tpu.matmul %95, %98, %cst_40 {dimension_numbers = #tpu.dot_dimension_numbers<[1], [0], [0], [1], [0, 0, 1, 1], [], []>} : vector<10x16xf32>, vector<16x10xf32>, vector<10x10xf32> -> vector<10x10xf32>
    %cst_41 = arith.constant 2.500000e-01 : f32
    %100 = vector.broadcast %cst_41 : f32 to vector<10x10xf32>
    %101 = arith.mulf %99, %100 : vector<10x10xf32>
    %102 = arith.addf %101, %21 : vector<10x10xf32>
    %cst_42 = arith.constant dense<0xFF800000> : vector<10xf32>
    %103 = vector.multi_reduction <maximumf>, %102, %cst_42 [1] : vector<10x10xf32> to vector<10xf32>
    %104 = vector.shape_cast %103 : vector<10xf32> to vector<10x1xf32>
    %105 = vector.broadcast %104 : vector<10x1xf32> to vector<10x10xf32>
    %106 = arith.subf %102, %105 : vector<10x10xf32>
    %107 = math.exp %106 : vector<10x10xf32>
    %cst_43 = arith.constant dense<0.000000e+00> : vector<10xf32>
    %108 = vector.multi_reduction <add>, %107, %cst_43 [1] : vector<10x10xf32> to vector<10xf32>
    %109 = vector.shape_cast %108 : vector<10xf32> to vector<10x1xf32>
    %110 = tpu.reciprocal %109 {approx = true} : vector<10x1xf32> -> vector<10x1xf32>
    %111 = vector.broadcast %110 : vector<10x1xf32> to vector<10x10xf32>
    %112 = arith.mulf %107, %111 : vector<10x10xf32>
    %cst_44 = arith.constant dense<0.000000e+00> : vector<10x16xf32>
    %113 = tpu.matmul %112, %97, %cst_44 {dimension_numbers = #tpu.dot_dimension_numbers<[1], [0], [0], [1], [0, 0, 1, 1], [], []>} : vector<10x10xf32>, vector<10x16xf32>, vector<10x16xf32> -> vector<10x16xf32>
    %114 = tpu.concatenate %94, %113 in 1 : vector<10x16xf32>, vector<10x16xf32> -> vector<10x32xf32>
    %115 = tpu.concatenate %75, %114 in 0 : vector<10x32xf32>, vector<10x32xf32> -> vector<20x32xf32>
    %cst_45 = arith.constant dense<0.000000e+00> : vector<20x32xf32>
    %116 = tpu.matmul %115, %23, %cst_45 {dimension_numbers = #tpu.dot_dimension_numbers<[1], [0], [0], [1], [0, 0, 1, 1], [], []>} : vector<20x32xf32>, vector<32x32xf32>, vector<20x32xf32> -> vector<20x32xf32>
    %117 = vector.broadcast %27 : vector<1x32xf32> to vector<20x32xf32>
    %118 = arith.addf %116, %117 : vector<20x32xf32>
    %119 = arith.addf %15, %118 : vector<20x32xf32>
    %cst_46 = arith.constant dense<0.000000e+00> : vector<20xf32>
    %120 = vector.multi_reduction <add>, %119, %cst_46 [1] : vector<20x32xf32> to vector<20xf32>
    %121 = vector.shape_cast %120 : vector<20xf32> to vector<20x1xf32>
    %cst_47 = arith.constant 3.200000e+01 : f32
    %122 = vector.broadcast %cst_47 : f32 to vector<20x1xf32>
    %123 = arith.divf %121, %122 : vector<20x1xf32>
    %124 = vector.broadcast %123 : vector<20x1xf32> to vector<20x32xf32>
    %125 = arith.subf %119, %124 : vector<20x32xf32>
    %126 = arith.mulf %125, %125 : vector<20x32xf32>
    %cst_48 = arith.constant dense<0.000000e+00> : vector<20xf32>
    %127 = vector.multi_reduction <add>, %126, %cst_48 [1] : vector<20x32xf32> to vector<20xf32>
    %128 = vector.shape_cast %127 : vector<20xf32> to vector<20x1xf32>
    %cst_49 = arith.constant 3.200000e+01 : f32
    %129 = vector.broadcast %cst_49 : f32 to vector<20x1xf32>
    %130 = arith.divf %128, %129 : vector<20x1xf32>
    %cst_50 = arith.constant 9.99999974E-6 : f32
    %131 = vector.broadcast %cst_50 : f32 to vector<20x1xf32>
    %132 = arith.addf %130, %131 : vector<20x1xf32>
    %133 = math.rsqrt %132 : vector<20x1xf32>
    %134 = vector.broadcast %133 : vector<20x1xf32> to vector<20x32xf32>
    %135 = arith.mulf %125, %134 : vector<20x32xf32>
    %136 = vector.broadcast %30 : vector<1x32xf32> to vector<20x32xf32>
    %137 = arith.mulf %135, %136 : vector<20x32xf32>
    %138 = vector.broadcast %31 : vector<1x32xf32> to vector<20x32xf32>
    %139 = arith.addf %137, %138 : vector<20x32xf32>
    %cst_51 = arith.constant dense<0.000000e+00> : vector<20x64xf32>
    %140 = tpu.matmul %139, %24, %cst_51 {dimension_numbers = #tpu.dot_dimension_numbers<[1], [0], [0], [1], [0, 0, 1, 1], [], []>} : vector<20x32xf32>, vector<32x64xf32>, vector<20x64xf32> -> vector<20x64xf32>
    %141 = vector.broadcast %28 : vector<1x64xf32> to vector<20x64xf32>
    %142 = arith.addf %140, %141 : vector<20x64xf32>
    %cst_52 = arith.constant 0.000000e+00 : f32
    %143 = vector.broadcast %cst_52 : f32 to vector<20x64xf32>
    %144 = arith.maximumf %142, %143 : vector<20x64xf32>
    %cst_53 = arith.constant dense<0.000000e+00> : vector<20x32xf32>
    %145 = tpu.matmul %144, %25, %cst_53 {dimension_numbers = #tpu.dot_dimension_numbers<[1], [0], [0], [1], [0, 0, 1, 1], [], []>} : vector<20x64xf32>, vector<64x32xf32>, vector<20x32xf32> -> vector<20x32xf32>
    %146 = arith.addf %139, %145 : vector<20x32xf32>
    %147 = vector.broadcast %29 : vector<1x32xf32> to vector<20x32xf32>
    %148 = arith.addf %146, %147 : vector<20x32xf32>
    %cst_54 = arith.constant dense<0.000000e+00> : vector<20xf32>
    %149 = vector.multi_reduction <add>, %148, %cst_54 [1] : vector<20x32xf32> to vector<20xf32>
    %150 = vector.shape_cast %149 : vector<20xf32> to vector<20x1xf32>
    %cst_55 = arith.constant 3.200000e+01 : f32
    %151 = vector.broadcast %cst_55 : f32 to vector<20x1xf32>
    %152 = arith.divf %150, %151 : vector<20x1xf32>
    %153 = vector.broadcast %152 : vector<20x1xf32> to vector<20x32xf32>
    %154 = arith.subf %148, %153 : vector<20x32xf32>
    %155 = arith.mulf %154, %154 : vector<20x32xf32>
    %cst_56 = arith.constant dense<0.000000e+00> : vector<20xf32>
    %156 = vector.multi_reduction <add>, %155, %cst_56 [1] : vector<20x32xf32> to vector<20xf32>
    %157 = vector.shape_cast %156 : vector<20xf32> to vector<20x1xf32>
    %cst_57 = arith.constant 3.200000e+01 : f32
    %158 = vector.broadcast %cst_57 : f32 to vector<20x1xf32>
    %159 = arith.divf %157, %158 : vector<20x1xf32>
    %cst_58 = arith.constant 9.99999974E-6 : f32
    %160 = vector.broadcast %cst_58 : f32 to vector<20x1xf32>
    %161 = arith.addf %159, %160 : vector<20x1xf32>
    %162 = math.rsqrt %161 : vector<20x1xf32>
    %163 = vector.broadcast %162 : vector<20x1xf32> to vector<20x32xf32>
    %164 = arith.mulf %154, %163 : vector<20x32xf32>
    %165 = vector.broadcast %32 : vector<1x32xf32> to vector<20x32xf32>
    %166 = arith.mulf %164, %165 : vector<20x32xf32>
    %167 = vector.broadcast %33 : vector<1x32xf32> to vector<20x32xf32>
    %168 = arith.addf %166, %167 : vector<20x32xf32>
    %c160 = arith.constant 160 : index
    %c0_59 = arith.constant 0 : index
    %169 = vector.load %arg3[%c160, %c0_59] : memref<560x96xf32, #tpu.memory_space<vmem>>, vector<32x96xf32>
    %c192 = arith.constant 192 : index
    %c0_60 = arith.constant 0 : index
    %170 = vector.load %arg3[%c192, %c0_60] : memref<560x96xf32, #tpu.memory_space<vmem>>, vector<32x32xf32>
    %c224 = arith.constant 224 : index
    %c0_61 = arith.constant 0 : index
    %171 = vector.load %arg3[%c224, %c0_61] : memref<560x96xf32, #tpu.memory_space<vmem>>, vector<32x64xf32>
    %c256 = arith.constant 256 : index
    %c0_62 = arith.constant 0 : index
    %172 = vector.load %arg3[%c256, %c0_62] : memref<560x96xf32, #tpu.memory_space<vmem>>, vector<64x32xf32>
    %c8 = arith.constant 8 : index
    %c0_63 = arith.constant 0 : index
    %173 = vector.load %arg4[%c8, %c0_63] : memref<30x96xf32, #tpu.memory_space<vmem>>, vector<1x96xf32>
    %c9 = arith.constant 9 : index
    %c0_64 = arith.constant 0 : index
    %174 = vector.load %arg4[%c9, %c0_64] : memref<30x96xf32, #tpu.memory_space<vmem>>, vector<1x32xf32>
    %c10 = arith.constant 10 : index
    %c0_65 = arith.constant 0 : index
    %175 = vector.load %arg4[%c10, %c0_65] : memref<30x96xf32, #tpu.memory_space<vmem>>, vector<1x64xf32>
    %c11 = arith.constant 11 : index
    %c0_66 = arith.constant 0 : index
    %176 = vector.load %arg4[%c11, %c0_66] : memref<30x96xf32, #tpu.memory_space<vmem>>, vector<1x32xf32>
    %c12 = arith.constant 12 : index
    %c0_67 = arith.constant 0 : index
    %177 = vector.load %arg4[%c12, %c0_67] : memref<30x96xf32, #tpu.memory_space<vmem>>, vector<1x32xf32>
    %c13 = arith.constant 13 : index
    %c0_68 = arith.constant 0 : index
    %178 = vector.load %arg4[%c13, %c0_68] : memref<30x96xf32, #tpu.memory_space<vmem>>, vector<1x32xf32>
    %c14 = arith.constant 14 : index
    %c0_69 = arith.constant 0 : index
    %179 = vector.load %arg4[%c14, %c0_69] : memref<30x96xf32, #tpu.memory_space<vmem>>, vector<1x32xf32>
    %c15 = arith.constant 15 : index
    %c0_70 = arith.constant 0 : index
    %180 = vector.load %arg4[%c15, %c0_70] : memref<30x96xf32, #tpu.memory_space<vmem>>, vector<1x32xf32>
    %cst_71 = arith.constant dense<0.000000e+00> : vector<20x96xf32>
    %181 = tpu.matmul %168, %169, %cst_71 {dimension_numbers = #tpu.dot_dimension_numbers<[1], [0], [0], [1], [0, 0, 1, 1], [], []>} : vector<20x32xf32>, vector<32x96xf32>, vector<20x96xf32> -> vector<20x96xf32>
    %182 = vector.broadcast %173 : vector<1x96xf32> to vector<20x96xf32>
    %183 = arith.addf %181, %182 : vector<20x96xf32>
    %184 = vector.extract_strided_slice %183 {offsets = [0, 0], sizes = [10, 16], strides = [1, 1]} : vector<20x96xf32> to vector<10x16xf32>
    %185 = vector.extract_strided_slice %183 {offsets = [0, 32], sizes = [10, 16], strides = [1, 1]} : vector<20x96xf32> to vector<10x16xf32>
    %186 = vector.extract_strided_slice %183 {offsets = [0, 64], sizes = [10, 16], strides = [1, 1]} : vector<20x96xf32> to vector<10x16xf32>
    %187 = tpu.transpose %185, [1, 0] : vector<10x16xf32> -> vector<16x10xf32>
    %cst_72 = arith.constant dense<0.000000e+00> : vector<10x10xf32>
    %188 = tpu.matmul %184, %187, %cst_72 {dimension_numbers = #tpu.dot_dimension_numbers<[1], [0], [0], [1], [0, 0, 1, 1], [], []>} : vector<10x16xf32>, vector<16x10xf32>, vector<10x10xf32> -> vector<10x10xf32>
    %cst_73 = arith.constant 2.500000e-01 : f32
    %189 = vector.broadcast %cst_73 : f32 to vector<10x10xf32>
    %190 = arith.mulf %188, %189 : vector<10x10xf32>
    %191 = arith.addf %190, %18 : vector<10x10xf32>
    %cst_74 = arith.constant dense<0xFF800000> : vector<10xf32>
    %192 = vector.multi_reduction <maximumf>, %191, %cst_74 [1] : vector<10x10xf32> to vector<10xf32>
    %193 = vector.shape_cast %192 : vector<10xf32> to vector<10x1xf32>
    %194 = vector.broadcast %193 : vector<10x1xf32> to vector<10x10xf32>
    %195 = arith.subf %191, %194 : vector<10x10xf32>
    %196 = math.exp %195 : vector<10x10xf32>
    %cst_75 = arith.constant dense<0.000000e+00> : vector<10xf32>
    %197 = vector.multi_reduction <add>, %196, %cst_75 [1] : vector<10x10xf32> to vector<10xf32>
    %198 = vector.shape_cast %197 : vector<10xf32> to vector<10x1xf32>
    %199 = tpu.reciprocal %198 {approx = true} : vector<10x1xf32> -> vector<10x1xf32>
    %200 = vector.broadcast %199 : vector<10x1xf32> to vector<10x10xf32>
    %201 = arith.mulf %196, %200 : vector<10x10xf32>
    %cst_76 = arith.constant dense<0.000000e+00> : vector<10x16xf32>
    %202 = tpu.matmul %201, %186, %cst_76 {dimension_numbers = #tpu.dot_dimension_numbers<[1], [0], [0], [1], [0, 0, 1, 1], [], []>} : vector<10x10xf32>, vector<10x16xf32>, vector<10x16xf32> -> vector<10x16xf32>
    %203 = vector.extract_strided_slice %183 {offsets = [0, 16], sizes = [10, 16], strides = [1, 1]} : vector<20x96xf32> to vector<10x16xf32>
    %204 = vector.extract_strided_slice %183 {offsets = [0, 48], sizes = [10, 16], strides = [1, 1]} : vector<20x96xf32> to vector<10x16xf32>
    %205 = vector.extract_strided_slice %183 {offsets = [0, 80], sizes = [10, 16], strides = [1, 1]} : vector<20x96xf32> to vector<10x16xf32>
    %206 = tpu.transpose %204, [1, 0] : vector<10x16xf32> -> vector<16x10xf32>
    %cst_77 = arith.constant dense<0.000000e+00> : vector<10x10xf32>
    %207 = tpu.matmul %203, %206, %cst_77 {dimension_numbers = #tpu.dot_dimension_numbers<[1], [0], [0], [1], [0, 0, 1, 1], [], []>} : vector<10x16xf32>, vector<16x10xf32>, vector<10x10xf32> -> vector<10x10xf32>
    %cst_78 = arith.constant 2.500000e-01 : f32
    %208 = vector.broadcast %cst_78 : f32 to vector<10x10xf32>
    %209 = arith.mulf %207, %208 : vector<10x10xf32>
    %210 = arith.addf %209, %18 : vector<10x10xf32>
    %cst_79 = arith.constant dense<0xFF800000> : vector<10xf32>
    %211 = vector.multi_reduction <maximumf>, %210, %cst_79 [1] : vector<10x10xf32> to vector<10xf32>
    %212 = vector.shape_cast %211 : vector<10xf32> to vector<10x1xf32>
    %213 = vector.broadcast %212 : vector<10x1xf32> to vector<10x10xf32>
    %214 = arith.subf %210, %213 : vector<10x10xf32>
    %215 = math.exp %214 : vector<10x10xf32>
    %cst_80 = arith.constant dense<0.000000e+00> : vector<10xf32>
    %216 = vector.multi_reduction <add>, %215, %cst_80 [1] : vector<10x10xf32> to vector<10xf32>
    %217 = vector.shape_cast %216 : vector<10xf32> to vector<10x1xf32>
    %218 = tpu.reciprocal %217 {approx = true} : vector<10x1xf32> -> vector<10x1xf32>
    %219 = vector.broadcast %218 : vector<10x1xf32> to vector<10x10xf32>
    %220 = arith.mulf %215, %219 : vector<10x10xf32>
    %cst_81 = arith.constant dense<0.000000e+00> : vector<10x16xf32>
    %221 = tpu.matmul %220, %205, %cst_81 {dimension_numbers = #tpu.dot_dimension_numbers<[1], [0], [0], [1], [0, 0, 1, 1], [], []>} : vector<10x10xf32>, vector<10x16xf32>, vector<10x16xf32> -> vector<10x16xf32>
    %222 = tpu.concatenate %202, %221 in 1 : vector<10x16xf32>, vector<10x16xf32> -> vector<10x32xf32>
    %223 = vector.extract_strided_slice %183 {offsets = [10, 0], sizes = [10, 16], strides = [1, 1]} : vector<20x96xf32> to vector<10x16xf32>
    %224 = vector.extract_strided_slice %183 {offsets = [10, 32], sizes = [10, 16], strides = [1, 1]} : vector<20x96xf32> to vector<10x16xf32>
    %225 = vector.extract_strided_slice %183 {offsets = [10, 64], sizes = [10, 16], strides = [1, 1]} : vector<20x96xf32> to vector<10x16xf32>
    %226 = tpu.transpose %224, [1, 0] : vector<10x16xf32> -> vector<16x10xf32>
    %cst_82 = arith.constant dense<0.000000e+00> : vector<10x10xf32>
    %227 = tpu.matmul %223, %226, %cst_82 {dimension_numbers = #tpu.dot_dimension_numbers<[1], [0], [0], [1], [0, 0, 1, 1], [], []>} : vector<10x16xf32>, vector<16x10xf32>, vector<10x10xf32> -> vector<10x10xf32>
    %cst_83 = arith.constant 2.500000e-01 : f32
    %228 = vector.broadcast %cst_83 : f32 to vector<10x10xf32>
    %229 = arith.mulf %227, %228 : vector<10x10xf32>
    %230 = arith.addf %229, %21 : vector<10x10xf32>
    %cst_84 = arith.constant dense<0xFF800000> : vector<10xf32>
    %231 = vector.multi_reduction <maximumf>, %230, %cst_84 [1] : vector<10x10xf32> to vector<10xf32>
    %232 = vector.shape_cast %231 : vector<10xf32> to vector<10x1xf32>
    %233 = vector.broadcast %232 : vector<10x1xf32> to vector<10x10xf32>
    %234 = arith.subf %230, %233 : vector<10x10xf32>
    %235 = math.exp %234 : vector<10x10xf32>
    %cst_85 = arith.constant dense<0.000000e+00> : vector<10xf32>
    %236 = vector.multi_reduction <add>, %235, %cst_85 [1] : vector<10x10xf32> to vector<10xf32>
    %237 = vector.shape_cast %236 : vector<10xf32> to vector<10x1xf32>
    %238 = tpu.reciprocal %237 {approx = true} : vector<10x1xf32> -> vector<10x1xf32>
    %239 = vector.broadcast %238 : vector<10x1xf32> to vector<10x10xf32>
    %240 = arith.mulf %235, %239 : vector<10x10xf32>
    %cst_86 = arith.constant dense<0.000000e+00> : vector<10x16xf32>
    %241 = tpu.matmul %240, %225, %cst_86 {dimension_numbers = #tpu.dot_dimension_numbers<[1], [0], [0], [1], [0, 0, 1, 1], [], []>} : vector<10x10xf32>, vector<10x16xf32>, vector<10x16xf32> -> vector<10x16xf32>
    %242 = vector.extract_strided_slice %183 {offsets = [10, 16], sizes = [10, 16], strides = [1, 1]} : vector<20x96xf32> to vector<10x16xf32>
    %243 = vector.extract_strided_slice %183 {offsets = [10, 48], sizes = [10, 16], strides = [1, 1]} : vector<20x96xf32> to vector<10x16xf32>
    %244 = vector.extract_strided_slice %183 {offsets = [10, 80], sizes = [10, 16], strides = [1, 1]} : vector<20x96xf32> to vector<10x16xf32>
    %245 = tpu.transpose %243, [1, 0] : vector<10x16xf32> -> vector<16x10xf32>
    %cst_87 = arith.constant dense<0.000000e+00> : vector<10x10xf32>
    %246 = tpu.matmul %242, %245, %cst_87 {dimension_numbers = #tpu.dot_dimension_numbers<[1], [0], [0], [1], [0, 0, 1, 1], [], []>} : vector<10x16xf32>, vector<16x10xf32>, vector<10x10xf32> -> vector<10x10xf32>
    %cst_88 = arith.constant 2.500000e-01 : f32
    %247 = vector.broadcast %cst_88 : f32 to vector<10x10xf32>
    %248 = arith.mulf %246, %247 : vector<10x10xf32>
    %249 = arith.addf %248, %21 : vector<10x10xf32>
    %cst_89 = arith.constant dense<0xFF800000> : vector<10xf32>
    %250 = vector.multi_reduction <maximumf>, %249, %cst_89 [1] : vector<10x10xf32> to vector<10xf32>
    %251 = vector.shape_cast %250 : vector<10xf32> to vector<10x1xf32>
    %252 = vector.broadcast %251 : vector<10x1xf32> to vector<10x10xf32>
    %253 = arith.subf %249, %252 : vector<10x10xf32>
    %254 = math.exp %253 : vector<10x10xf32>
    %cst_90 = arith.constant dense<0.000000e+00> : vector<10xf32>
    %255 = vector.multi_reduction <add>, %254, %cst_90 [1] : vector<10x10xf32> to vector<10xf32>
    %256 = vector.shape_cast %255 : vector<10xf32> to vector<10x1xf32>
    %257 = tpu.reciprocal %256 {approx = true} : vector<10x1xf32> -> vector<10x1xf32>
    %258 = vector.broadcast %257 : vector<10x1xf32> to vector<10x10xf32>
    %259 = arith.mulf %254, %258 : vector<10x10xf32>
    %cst_91 = arith.constant dense<0.000000e+00> : vector<10x16xf32>
    %260 = tpu.matmul %259, %244, %cst_91 {dimension_numbers = #tpu.dot_dimension_numbers<[1], [0], [0], [1], [0, 0, 1, 1], [], []>} : vector<10x10xf32>, vector<10x16xf32>, vector<10x16xf32> -> vector<10x16xf32>
    %261 = tpu.concatenate %241, %260 in 1 : vector<10x16xf32>, vector<10x16xf32> -> vector<10x32xf32>
    %262 = tpu.concatenate %222, %261 in 0 : vector<10x32xf32>, vector<10x32xf32> -> vector<20x32xf32>
    %cst_92 = arith.constant dense<0.000000e+00> : vector<20x32xf32>
    %263 = tpu.matmul %262, %170, %cst_92 {dimension_numbers = #tpu.dot_dimension_numbers<[1], [0], [0], [1], [0, 0, 1, 1], [], []>} : vector<20x32xf32>, vector<32x32xf32>, vector<20x32xf32> -> vector<20x32xf32>
    %264 = vector.broadcast %174 : vector<1x32xf32> to vector<20x32xf32>
    %265 = arith.addf %263, %264 : vector<20x32xf32>
    %266 = arith.addf %168, %265 : vector<20x32xf32>
    %cst_93 = arith.constant dense<0.000000e+00> : vector<20xf32>
    %267 = vector.multi_reduction <add>, %266, %cst_93 [1] : vector<20x32xf32> to vector<20xf32>
    %268 = vector.shape_cast %267 : vector<20xf32> to vector<20x1xf32>
    %cst_94 = arith.constant 3.200000e+01 : f32
    %269 = vector.broadcast %cst_94 : f32 to vector<20x1xf32>
    %270 = arith.divf %268, %269 : vector<20x1xf32>
    %271 = vector.broadcast %270 : vector<20x1xf32> to vector<20x32xf32>
    %272 = arith.subf %266, %271 : vector<20x32xf32>
    %273 = arith.mulf %272, %272 : vector<20x32xf32>
    %cst_95 = arith.constant dense<0.000000e+00> : vector<20xf32>
    %274 = vector.multi_reduction <add>, %273, %cst_95 [1] : vector<20x32xf32> to vector<20xf32>
    %275 = vector.shape_cast %274 : vector<20xf32> to vector<20x1xf32>
    %cst_96 = arith.constant 3.200000e+01 : f32
    %276 = vector.broadcast %cst_96 : f32 to vector<20x1xf32>
    %277 = arith.divf %275, %276 : vector<20x1xf32>
    %cst_97 = arith.constant 9.99999974E-6 : f32
    %278 = vector.broadcast %cst_97 : f32 to vector<20x1xf32>
    %279 = arith.addf %277, %278 : vector<20x1xf32>
    %280 = math.rsqrt %279 : vector<20x1xf32>
    %281 = vector.broadcast %280 : vector<20x1xf32> to vector<20x32xf32>
    %282 = arith.mulf %272, %281 : vector<20x32xf32>
    %283 = vector.broadcast %177 : vector<1x32xf32> to vector<20x32xf32>
    %284 = arith.mulf %282, %283 : vector<20x32xf32>
    %285 = vector.broadcast %178 : vector<1x32xf32> to vector<20x32xf32>
    %286 = arith.addf %284, %285 : vector<20x32xf32>
    %cst_98 = arith.constant dense<0.000000e+00> : vector<20x64xf32>
    %287 = tpu.matmul %286, %171, %cst_98 {dimension_numbers = #tpu.dot_dimension_numbers<[1], [0], [0], [1], [0, 0, 1, 1], [], []>} : vector<20x32xf32>, vector<32x64xf32>, vector<20x64xf32> -> vector<20x64xf32>
    %288 = vector.broadcast %175 : vector<1x64xf32> to vector<20x64xf32>
    %289 = arith.addf %287, %288 : vector<20x64xf32>
    %cst_99 = arith.constant 0.000000e+00 : f32
    %290 = vector.broadcast %cst_99 : f32 to vector<20x64xf32>
    %291 = arith.maximumf %289, %290 : vector<20x64xf32>
    %cst_100 = arith.constant dense<0.000000e+00> : vector<20x32xf32>
    %292 = tpu.matmul %291, %172, %cst_100 {dimension_numbers = #tpu.dot_dimension_numbers<[1], [0], [0], [1], [0, 0, 1, 1], [], []>} : vector<20x64xf32>, vector<64x32xf32>, vector<20x32xf32> -> vector<20x32xf32>
    %293 = arith.addf %286, %292 : vector<20x32xf32>
    %294 = vector.broadcast %176 : vector<1x32xf32> to vector<20x32xf32>
    %295 = arith.addf %293, %294 : vector<20x32xf32>
    %cst_101 = arith.constant dense<0.000000e+00> : vector<20xf32>
    %296 = vector.multi_reduction <add>, %295, %cst_101 [1] : vector<20x32xf32> to vector<20xf32>
    %297 = vector.shape_cast %296 : vector<20xf32> to vector<20x1xf32>
    %cst_102 = arith.constant 3.200000e+01 : f32
    %298 = vector.broadcast %cst_102 : f32 to vector<20x1xf32>
    %299 = arith.divf %297, %298 : vector<20x1xf32>
    %300 = vector.broadcast %299 : vector<20x1xf32> to vector<20x32xf32>
    %301 = arith.subf %295, %300 : vector<20x32xf32>
    %302 = arith.mulf %301, %301 : vector<20x32xf32>
    %cst_103 = arith.constant dense<0.000000e+00> : vector<20xf32>
    %303 = vector.multi_reduction <add>, %302, %cst_103 [1] : vector<20x32xf32> to vector<20xf32>
    %304 = vector.shape_cast %303 : vector<20xf32> to vector<20x1xf32>
    %cst_104 = arith.constant 3.200000e+01 : f32
    %305 = vector.broadcast %cst_104 : f32 to vector<20x1xf32>
    %306 = arith.divf %304, %305 : vector<20x1xf32>
    %cst_105 = arith.constant 9.99999974E-6 : f32
    %307 = vector.broadcast %cst_105 : f32 to vector<20x1xf32>
    %308 = arith.addf %306, %307 : vector<20x1xf32>
    %309 = math.rsqrt %308 : vector<20x1xf32>
    %310 = vector.broadcast %309 : vector<20x1xf32> to vector<20x32xf32>
    %311 = arith.mulf %301, %310 : vector<20x32xf32>
    %312 = vector.broadcast %179 : vector<1x32xf32> to vector<20x32xf32>
    %313 = arith.mulf %311, %312 : vector<20x32xf32>
    %314 = vector.broadcast %180 : vector<1x32xf32> to vector<20x32xf32>
    %315 = arith.addf %313, %314 : vector<20x32xf32>
    %316 = tpu.concatenate %315, %168 in 1 : vector<20x32xf32>, vector<20x32xf32> -> vector<20x64xf32>
    %c480 = arith.constant 480 : index
    %c0_106 = arith.constant 0 : index
    %317 = vector.load %arg3[%c480, %c0_106] : memref<560x96xf32, #tpu.memory_space<vmem>>, vector<64x32xf32>
    %cst_107 = arith.constant dense<0.000000e+00> : vector<20x32xf32>
    %318 = tpu.matmul %316, %317, %cst_107 {dimension_numbers = #tpu.dot_dimension_numbers<[1], [0], [0], [1], [0, 0, 1, 1], [], []>} : vector<20x64xf32>, vector<64x32xf32>, vector<20x32xf32> -> vector<20x32xf32>
    %c24 = arith.constant 24 : index
    %c0_108 = arith.constant 0 : index
    %319 = vector.load %arg4[%c24, %c0_108] : memref<30x96xf32, #tpu.memory_space<vmem>>, vector<1x32xf32>
    %320 = vector.broadcast %319 : vector<1x32xf32> to vector<20x32xf32>
    %321 = arith.addf %318, %320 : vector<20x32xf32>
    %c320 = arith.constant 320 : index
    %c0_109 = arith.constant 0 : index
    %322 = vector.load %arg3[%c320, %c0_109] : memref<560x96xf32, #tpu.memory_space<vmem>>, vector<32x96xf32>
    %c352 = arith.constant 352 : index
    %c0_110 = arith.constant 0 : index
    %323 = vector.load %arg3[%c352, %c0_110] : memref<560x96xf32, #tpu.memory_space<vmem>>, vector<32x32xf32>
    %c384 = arith.constant 384 : index
    %c0_111 = arith.constant 0 : index
    %324 = vector.load %arg3[%c384, %c0_111] : memref<560x96xf32, #tpu.memory_space<vmem>>, vector<32x64xf32>
    %c416 = arith.constant 416 : index
    %c0_112 = arith.constant 0 : index
    %325 = vector.load %arg3[%c416, %c0_112] : memref<560x96xf32, #tpu.memory_space<vmem>>, vector<64x32xf32>
    %c16 = arith.constant 16 : index
    %c0_113 = arith.constant 0 : index
    %326 = vector.load %arg4[%c16, %c0_113] : memref<30x96xf32, #tpu.memory_space<vmem>>, vector<1x96xf32>
    %c17 = arith.constant 17 : index
    %c0_114 = arith.constant 0 : index
    %327 = vector.load %arg4[%c17, %c0_114] : memref<30x96xf32, #tpu.memory_space<vmem>>, vector<1x32xf32>
    %c18 = arith.constant 18 : index
    %c0_115 = arith.constant 0 : index
    %328 = vector.load %arg4[%c18, %c0_115] : memref<30x96xf32, #tpu.memory_space<vmem>>, vector<1x64xf32>
    %c19 = arith.constant 19 : index
    %c0_116 = arith.constant 0 : index
    %329 = vector.load %arg4[%c19, %c0_116] : memref<30x96xf32, #tpu.memory_space<vmem>>, vector<1x32xf32>
    %c20 = arith.constant 20 : index
    %c0_117 = arith.constant 0 : index
    %330 = vector.load %arg4[%c20, %c0_117] : memref<30x96xf32, #tpu.memory_space<vmem>>, vector<1x32xf32>
    %c21 = arith.constant 21 : index
    %c0_118 = arith.constant 0 : index
    %331 = vector.load %arg4[%c21, %c0_118] : memref<30x96xf32, #tpu.memory_space<vmem>>, vector<1x32xf32>
    %c22 = arith.constant 22 : index
    %c0_119 = arith.constant 0 : index
    %332 = vector.load %arg4[%c22, %c0_119] : memref<30x96xf32, #tpu.memory_space<vmem>>, vector<1x32xf32>
    %c23 = arith.constant 23 : index
    %c0_120 = arith.constant 0 : index
    %333 = vector.load %arg4[%c23, %c0_120] : memref<30x96xf32, #tpu.memory_space<vmem>>, vector<1x32xf32>
    %cst_121 = arith.constant dense<0.000000e+00> : vector<20x96xf32>
    %334 = tpu.matmul %321, %322, %cst_121 {dimension_numbers = #tpu.dot_dimension_numbers<[1], [0], [0], [1], [0, 0, 1, 1], [], []>} : vector<20x32xf32>, vector<32x96xf32>, vector<20x96xf32> -> vector<20x96xf32>
    %335 = vector.broadcast %326 : vector<1x96xf32> to vector<20x96xf32>
    %336 = arith.addf %334, %335 : vector<20x96xf32>
    %337 = vector.extract_strided_slice %336 {offsets = [0, 0], sizes = [10, 16], strides = [1, 1]} : vector<20x96xf32> to vector<10x16xf32>
    %338 = vector.extract_strided_slice %336 {offsets = [0, 32], sizes = [10, 16], strides = [1, 1]} : vector<20x96xf32> to vector<10x16xf32>
    %339 = vector.extract_strided_slice %336 {offsets = [0, 64], sizes = [10, 16], strides = [1, 1]} : vector<20x96xf32> to vector<10x16xf32>
    %340 = tpu.transpose %338, [1, 0] : vector<10x16xf32> -> vector<16x10xf32>
    %cst_122 = arith.constant dense<0.000000e+00> : vector<10x10xf32>
    %341 = tpu.matmul %337, %340, %cst_122 {dimension_numbers = #tpu.dot_dimension_numbers<[1], [0], [0], [1], [0, 0, 1, 1], [], []>} : vector<10x16xf32>, vector<16x10xf32>, vector<10x10xf32> -> vector<10x10xf32>
    %cst_123 = arith.constant 2.500000e-01 : f32
    %342 = vector.broadcast %cst_123 : f32 to vector<10x10xf32>
    %343 = arith.mulf %341, %342 : vector<10x10xf32>
    %344 = arith.addf %343, %18 : vector<10x10xf32>
    %cst_124 = arith.constant dense<0xFF800000> : vector<10xf32>
    %345 = vector.multi_reduction <maximumf>, %344, %cst_124 [1] : vector<10x10xf32> to vector<10xf32>
    %346 = vector.shape_cast %345 : vector<10xf32> to vector<10x1xf32>
    %347 = vector.broadcast %346 : vector<10x1xf32> to vector<10x10xf32>
    %348 = arith.subf %344, %347 : vector<10x10xf32>
    %349 = math.exp %348 : vector<10x10xf32>
    %cst_125 = arith.constant dense<0.000000e+00> : vector<10xf32>
    %350 = vector.multi_reduction <add>, %349, %cst_125 [1] : vector<10x10xf32> to vector<10xf32>
    %351 = vector.shape_cast %350 : vector<10xf32> to vector<10x1xf32>
    %352 = tpu.reciprocal %351 {approx = true} : vector<10x1xf32> -> vector<10x1xf32>
    %353 = vector.broadcast %352 : vector<10x1xf32> to vector<10x10xf32>
    %354 = arith.mulf %349, %353 : vector<10x10xf32>
    %cst_126 = arith.constant dense<0.000000e+00> : vector<10x16xf32>
    %355 = tpu.matmul %354, %339, %cst_126 {dimension_numbers = #tpu.dot_dimension_numbers<[1], [0], [0], [1], [0, 0, 1, 1], [], []>} : vector<10x10xf32>, vector<10x16xf32>, vector<10x16xf32> -> vector<10x16xf32>
    %356 = vector.extract_strided_slice %336 {offsets = [0, 16], sizes = [10, 16], strides = [1, 1]} : vector<20x96xf32> to vector<10x16xf32>
    %357 = vector.extract_strided_slice %336 {offsets = [0, 48], sizes = [10, 16], strides = [1, 1]} : vector<20x96xf32> to vector<10x16xf32>
    %358 = vector.extract_strided_slice %336 {offsets = [0, 80], sizes = [10, 16], strides = [1, 1]} : vector<20x96xf32> to vector<10x16xf32>
    %359 = tpu.transpose %357, [1, 0] : vector<10x16xf32> -> vector<16x10xf32>
    %cst_127 = arith.constant dense<0.000000e+00> : vector<10x10xf32>
    %360 = tpu.matmul %356, %359, %cst_127 {dimension_numbers = #tpu.dot_dimension_numbers<[1], [0], [0], [1], [0, 0, 1, 1], [], []>} : vector<10x16xf32>, vector<16x10xf32>, vector<10x10xf32> -> vector<10x10xf32>
    %cst_128 = arith.constant 2.500000e-01 : f32
    %361 = vector.broadcast %cst_128 : f32 to vector<10x10xf32>
    %362 = arith.mulf %360, %361 : vector<10x10xf32>
    %363 = arith.addf %362, %18 : vector<10x10xf32>
    %cst_129 = arith.constant dense<0xFF800000> : vector<10xf32>
    %364 = vector.multi_reduction <maximumf>, %363, %cst_129 [1] : vector<10x10xf32> to vector<10xf32>
    %365 = vector.shape_cast %364 : vector<10xf32> to vector<10x1xf32>
    %366 = vector.broadcast %365 : vector<10x1xf32> to vector<10x10xf32>
    %367 = arith.subf %363, %366 : vector<10x10xf32>
    %368 = math.exp %367 : vector<10x10xf32>
    %cst_130 = arith.constant dense<0.000000e+00> : vector<10xf32>
    %369 = vector.multi_reduction <add>, %368, %cst_130 [1] : vector<10x10xf32> to vector<10xf32>
    %370 = vector.shape_cast %369 : vector<10xf32> to vector<10x1xf32>
    %371 = tpu.reciprocal %370 {approx = true} : vector<10x1xf32> -> vector<10x1xf32>
    %372 = vector.broadcast %371 : vector<10x1xf32> to vector<10x10xf32>
    %373 = arith.mulf %368, %372 : vector<10x10xf32>
    %cst_131 = arith.constant dense<0.000000e+00> : vector<10x16xf32>
    %374 = tpu.matmul %373, %358, %cst_131 {dimension_numbers = #tpu.dot_dimension_numbers<[1], [0], [0], [1], [0, 0, 1, 1], [], []>} : vector<10x10xf32>, vector<10x16xf32>, vector<10x16xf32> -> vector<10x16xf32>
    %375 = tpu.concatenate %355, %374 in 1 : vector<10x16xf32>, vector<10x16xf32> -> vector<10x32xf32>
    %376 = vector.extract_strided_slice %336 {offsets = [10, 0], sizes = [10, 16], strides = [1, 1]} : vector<20x96xf32> to vector<10x16xf32>
    %377 = vector.extract_strided_slice %336 {offsets = [10, 32], sizes = [10, 16], strides = [1, 1]} : vector<20x96xf32> to vector<10x16xf32>
    %378 = vector.extract_strided_slice %336 {offsets = [10, 64], sizes = [10, 16], strides = [1, 1]} : vector<20x96xf32> to vector<10x16xf32>
    %379 = tpu.transpose %377, [1, 0] : vector<10x16xf32> -> vector<16x10xf32>
    %cst_132 = arith.constant dense<0.000000e+00> : vector<10x10xf32>
    %380 = tpu.matmul %376, %379, %cst_132 {dimension_numbers = #tpu.dot_dimension_numbers<[1], [0], [0], [1], [0, 0, 1, 1], [], []>} : vector<10x16xf32>, vector<16x10xf32>, vector<10x10xf32> -> vector<10x10xf32>
    %cst_133 = arith.constant 2.500000e-01 : f32
    %381 = vector.broadcast %cst_133 : f32 to vector<10x10xf32>
    %382 = arith.mulf %380, %381 : vector<10x10xf32>
    %383 = arith.addf %382, %21 : vector<10x10xf32>
    %cst_134 = arith.constant dense<0xFF800000> : vector<10xf32>
    %384 = vector.multi_reduction <maximumf>, %383, %cst_134 [1] : vector<10x10xf32> to vector<10xf32>
    %385 = vector.shape_cast %384 : vector<10xf32> to vector<10x1xf32>
    %386 = vector.broadcast %385 : vector<10x1xf32> to vector<10x10xf32>
    %387 = arith.subf %383, %386 : vector<10x10xf32>
    %388 = math.exp %387 : vector<10x10xf32>
    %cst_135 = arith.constant dense<0.000000e+00> : vector<10xf32>
    %389 = vector.multi_reduction <add>, %388, %cst_135 [1] : vector<10x10xf32> to vector<10xf32>
    %390 = vector.shape_cast %389 : vector<10xf32> to vector<10x1xf32>
    %391 = tpu.reciprocal %390 {approx = true} : vector<10x1xf32> -> vector<10x1xf32>
    %392 = vector.broadcast %391 : vector<10x1xf32> to vector<10x10xf32>
    %393 = arith.mulf %388, %392 : vector<10x10xf32>
    %cst_136 = arith.constant dense<0.000000e+00> : vector<10x16xf32>
    %394 = tpu.matmul %393, %378, %cst_136 {dimension_numbers = #tpu.dot_dimension_numbers<[1], [0], [0], [1], [0, 0, 1, 1], [], []>} : vector<10x10xf32>, vector<10x16xf32>, vector<10x16xf32> -> vector<10x16xf32>
    %395 = vector.extract_strided_slice %336 {offsets = [10, 16], sizes = [10, 16], strides = [1, 1]} : vector<20x96xf32> to vector<10x16xf32>
    %396 = vector.extract_strided_slice %336 {offsets = [10, 48], sizes = [10, 16], strides = [1, 1]} : vector<20x96xf32> to vector<10x16xf32>
    %397 = vector.extract_strided_slice %336 {offsets = [10, 80], sizes = [10, 16], strides = [1, 1]} : vector<20x96xf32> to vector<10x16xf32>
    %398 = tpu.transpose %396, [1, 0] : vector<10x16xf32> -> vector<16x10xf32>
    %cst_137 = arith.constant dense<0.000000e+00> : vector<10x10xf32>
    %399 = tpu.matmul %395, %398, %cst_137 {dimension_numbers = #tpu.dot_dimension_numbers<[1], [0], [0], [1], [0, 0, 1, 1], [], []>} : vector<10x16xf32>, vector<16x10xf32>, vector<10x10xf32> -> vector<10x10xf32>
    %cst_138 = arith.constant 2.500000e-01 : f32
    %400 = vector.broadcast %cst_138 : f32 to vector<10x10xf32>
    %401 = arith.mulf %399, %400 : vector<10x10xf32>
    %402 = arith.addf %401, %21 : vector<10x10xf32>
    %cst_139 = arith.constant dense<0xFF800000> : vector<10xf32>
    %403 = vector.multi_reduction <maximumf>, %402, %cst_139 [1] : vector<10x10xf32> to vector<10xf32>
    %404 = vector.shape_cast %403 : vector<10xf32> to vector<10x1xf32>
    %405 = vector.broadcast %404 : vector<10x1xf32> to vector<10x10xf32>
    %406 = arith.subf %402, %405 : vector<10x10xf32>
    %407 = math.exp %406 : vector<10x10xf32>
    %cst_140 = arith.constant dense<0.000000e+00> : vector<10xf32>
    %408 = vector.multi_reduction <add>, %407, %cst_140 [1] : vector<10x10xf32> to vector<10xf32>
    %409 = vector.shape_cast %408 : vector<10xf32> to vector<10x1xf32>
    %410 = tpu.reciprocal %409 {approx = true} : vector<10x1xf32> -> vector<10x1xf32>
    %411 = vector.broadcast %410 : vector<10x1xf32> to vector<10x10xf32>
    %412 = arith.mulf %407, %411 : vector<10x10xf32>
    %cst_141 = arith.constant dense<0.000000e+00> : vector<10x16xf32>
    %413 = tpu.matmul %412, %397, %cst_141 {dimension_numbers = #tpu.dot_dimension_numbers<[1], [0], [0], [1], [0, 0, 1, 1], [], []>} : vector<10x10xf32>, vector<10x16xf32>, vector<10x16xf32> -> vector<10x16xf32>
    %414 = tpu.concatenate %394, %413 in 1 : vector<10x16xf32>, vector<10x16xf32> -> vector<10x32xf32>
    %415 = tpu.concatenate %375, %414 in 0 : vector<10x32xf32>, vector<10x32xf32> -> vector<20x32xf32>
    %cst_142 = arith.constant dense<0.000000e+00> : vector<20x32xf32>
    %416 = tpu.matmul %415, %323, %cst_142 {dimension_numbers = #tpu.dot_dimension_numbers<[1], [0], [0], [1], [0, 0, 1, 1], [], []>} : vector<20x32xf32>, vector<32x32xf32>, vector<20x32xf32> -> vector<20x32xf32>
    %417 = vector.broadcast %327 : vector<1x32xf32> to vector<20x32xf32>
    %418 = arith.addf %416, %417 : vector<20x32xf32>
    %419 = arith.addf %321, %418 : vector<20x32xf32>
    %cst_143 = arith.constant dense<0.000000e+00> : vector<20xf32>
    %420 = vector.multi_reduction <add>, %419, %cst_143 [1] : vector<20x32xf32> to vector<20xf32>
    %421 = vector.shape_cast %420 : vector<20xf32> to vector<20x1xf32>
    %cst_144 = arith.constant 3.200000e+01 : f32
    %422 = vector.broadcast %cst_144 : f32 to vector<20x1xf32>
    %423 = arith.divf %421, %422 : vector<20x1xf32>
    %424 = vector.broadcast %423 : vector<20x1xf32> to vector<20x32xf32>
    %425 = arith.subf %419, %424 : vector<20x32xf32>
    %426 = arith.mulf %425, %425 : vector<20x32xf32>
    %cst_145 = arith.constant dense<0.000000e+00> : vector<20xf32>
    %427 = vector.multi_reduction <add>, %426, %cst_145 [1] : vector<20x32xf32> to vector<20xf32>
    %428 = vector.shape_cast %427 : vector<20xf32> to vector<20x1xf32>
    %cst_146 = arith.constant 3.200000e+01 : f32
    %429 = vector.broadcast %cst_146 : f32 to vector<20x1xf32>
    %430 = arith.divf %428, %429 : vector<20x1xf32>
    %cst_147 = arith.constant 9.99999974E-6 : f32
    %431 = vector.broadcast %cst_147 : f32 to vector<20x1xf32>
    %432 = arith.addf %430, %431 : vector<20x1xf32>
    %433 = math.rsqrt %432 : vector<20x1xf32>
    %434 = vector.broadcast %433 : vector<20x1xf32> to vector<20x32xf32>
    %435 = arith.mulf %425, %434 : vector<20x32xf32>
    %436 = vector.broadcast %330 : vector<1x32xf32> to vector<20x32xf32>
    %437 = arith.mulf %435, %436 : vector<20x32xf32>
    %438 = vector.broadcast %331 : vector<1x32xf32> to vector<20x32xf32>
    %439 = arith.addf %437, %438 : vector<20x32xf32>
    %cst_148 = arith.constant dense<0.000000e+00> : vector<20x64xf32>
    %440 = tpu.matmul %439, %324, %cst_148 {dimension_numbers = #tpu.dot_dimension_numbers<[1], [0], [0], [1], [0, 0, 1, 1], [], []>} : vector<20x32xf32>, vector<32x64xf32>, vector<20x64xf32> -> vector<20x64xf32>
    %441 = vector.broadcast %328 : vector<1x64xf32> to vector<20x64xf32>
    %442 = arith.addf %440, %441 : vector<20x64xf32>
    %cst_149 = arith.constant 0.000000e+00 : f32
    %443 = vector.broadcast %cst_149 : f32 to vector<20x64xf32>
    %444 = arith.maximumf %442, %443 : vector<20x64xf32>
    %cst_150 = arith.constant dense<0.000000e+00> : vector<20x32xf32>
    %445 = tpu.matmul %444, %325, %cst_150 {dimension_numbers = #tpu.dot_dimension_numbers<[1], [0], [0], [1], [0, 0, 1, 1], [], []>} : vector<20x64xf32>, vector<64x32xf32>, vector<20x32xf32> -> vector<20x32xf32>
    %446 = arith.addf %439, %445 : vector<20x32xf32>
    %447 = vector.broadcast %329 : vector<1x32xf32> to vector<20x32xf32>
    %448 = arith.addf %446, %447 : vector<20x32xf32>
    %cst_151 = arith.constant dense<0.000000e+00> : vector<20xf32>
    %449 = vector.multi_reduction <add>, %448, %cst_151 [1] : vector<20x32xf32> to vector<20xf32>
    %450 = vector.shape_cast %449 : vector<20xf32> to vector<20x1xf32>
    %cst_152 = arith.constant 3.200000e+01 : f32
    %451 = vector.broadcast %cst_152 : f32 to vector<20x1xf32>
    %452 = arith.divf %450, %451 : vector<20x1xf32>
    %453 = vector.broadcast %452 : vector<20x1xf32> to vector<20x32xf32>
    %454 = arith.subf %448, %453 : vector<20x32xf32>
    %455 = arith.mulf %454, %454 : vector<20x32xf32>
    %cst_153 = arith.constant dense<0.000000e+00> : vector<20xf32>
    %456 = vector.multi_reduction <add>, %455, %cst_153 [1] : vector<20x32xf32> to vector<20xf32>
    %457 = vector.shape_cast %456 : vector<20xf32> to vector<20x1xf32>
    %cst_154 = arith.constant 3.200000e+01 : f32
    %458 = vector.broadcast %cst_154 : f32 to vector<20x1xf32>
    %459 = arith.divf %457, %458 : vector<20x1xf32>
    %cst_155 = arith.constant 9.99999974E-6 : f32
    %460 = vector.broadcast %cst_155 : f32 to vector<20x1xf32>
    %461 = arith.addf %459, %460 : vector<20x1xf32>
    %462 = math.rsqrt %461 : vector<20x1xf32>
    %463 = vector.broadcast %462 : vector<20x1xf32> to vector<20x32xf32>
    %464 = arith.mulf %454, %463 : vector<20x32xf32>
    %465 = vector.broadcast %332 : vector<1x32xf32> to vector<20x32xf32>
    %466 = arith.mulf %464, %465 : vector<20x32xf32>
    %467 = vector.broadcast %333 : vector<1x32xf32> to vector<20x32xf32>
    %468 = arith.addf %466, %467 : vector<20x32xf32>
    %c25 = arith.constant 25 : index
    %c0_156 = arith.constant 0 : index
    %469 = vector.load %arg4[%c25, %c0_156] : memref<30x96xf32, #tpu.memory_space<vmem>>, vector<1x32xf32>
    %c26 = arith.constant 26 : index
    %c0_157 = arith.constant 0 : index
    %470 = vector.load %arg4[%c26, %c0_157] : memref<30x96xf32, #tpu.memory_space<vmem>>, vector<1x32xf32>
    %cst_158 = arith.constant dense<0.000000e+00> : vector<20xf32>
    %471 = vector.multi_reduction <add>, %468, %cst_158 [1] : vector<20x32xf32> to vector<20xf32>
    %472 = vector.shape_cast %471 : vector<20xf32> to vector<20x1xf32>
    %cst_159 = arith.constant 3.200000e+01 : f32
    %473 = vector.broadcast %cst_159 : f32 to vector<20x1xf32>
    %474 = arith.divf %472, %473 : vector<20x1xf32>
    %475 = vector.broadcast %474 : vector<20x1xf32> to vector<20x32xf32>
    %476 = arith.subf %468, %475 : vector<20x32xf32>
    %477 = arith.mulf %476, %476 : vector<20x32xf32>
    %cst_160 = arith.constant dense<0.000000e+00> : vector<20xf32>
    %478 = vector.multi_reduction <add>, %477, %cst_160 [1] : vector<20x32xf32> to vector<20xf32>
    %479 = vector.shape_cast %478 : vector<20xf32> to vector<20x1xf32>
    %cst_161 = arith.constant 3.200000e+01 : f32
    %480 = vector.broadcast %cst_161 : f32 to vector<20x1xf32>
    %481 = arith.divf %479, %480 : vector<20x1xf32>
    %cst_162 = arith.constant 9.99999974E-6 : f32
    %482 = vector.broadcast %cst_162 : f32 to vector<20x1xf32>
    %483 = arith.addf %481, %482 : vector<20x1xf32>
    %484 = math.rsqrt %483 : vector<20x1xf32>
    %485 = vector.broadcast %484 : vector<20x1xf32> to vector<20x32xf32>
    %486 = arith.mulf %476, %485 : vector<20x32xf32>
    %487 = vector.broadcast %469 : vector<1x32xf32> to vector<20x32xf32>
    %488 = arith.mulf %486, %487 : vector<20x32xf32>
    %489 = vector.broadcast %470 : vector<1x32xf32> to vector<20x32xf32>
    %490 = arith.addf %488, %489 : vector<20x32xf32>
    %491 = vector.extract_strided_slice %490 {offsets = [0, 0], sizes = [2, 32], strides = [1, 1]} : vector<20x32xf32> to vector<2x32xf32>
    %492 = vector.extract_strided_slice %490 {offsets = [10, 0], sizes = [2, 32], strides = [1, 1]} : vector<20x32xf32> to vector<2x32xf32>
    %493 = tpu.concatenate %491, %492 in 0 : vector<2x32xf32>, vector<2x32xf32> -> vector<4x32xf32>
    %c0_163 = arith.constant 0 : index
    %c0_164 = arith.constant 0 : index
    %494 = vector.load %arg5[%c0_163, %c0_164] : memref<4x32xf32, #tpu.memory_space<vmem>>, vector<4x32xf32>
    tpu.vector_store %arg5[%c0_163, %c0_164], %493 {strides = array<i32>} : memref<4x32xf32, #tpu.memory_space<vmem>>, vector<4x32xf32>,
    return
  }
}

</mosaic_0001>

<bundles_post_ra>
// kernel: tpu_custom_call.1
= control target key start
LH: loop header
LB: loop body
LE: loop exit
PB: predicated region body
PF: predicated region fallthrough
CT: control target
= control target key end

     0   :  { %vm31_vm0 = vcmask 130048   ;;  %s6878_s0 = inlined_call_operand.vmem [shape: f32[16,16], index: 0, kind: input, shape index: {}]   ;;  %s6879_s1 = inlined_call_operand.vmem [shape: f32[2,10], index: 1, kind: input, shape index: {}]   ;;  %s6880_s2 = inlined_call_operand.vmem [shape: f32[10,32], index: 2, kind: input, shape index: {}]   ;;  %s6881_s3 = inlined_call_operand.vmem [shape: f32[560,96], index: 3, kind: input, shape index: {}]   ;;  %s6882_s4 = inlined_call_operand.vmem [shape: f32[30,96], index: 4, kind: input, shape index: {}]   ;;  %s6883_s5 = inlined_call_operand.hbm [shape: f32[4,32], index: 5, kind: output, shape index: {}]  }
   0x1   :  { %v21_v0 = vld [vmem:[%s6881_s3 + $0x220] sm:$0xff]  ;;  %v22_v1 = vld [vmem:[%s6881_s3 + $0x228] sm:$0xff] }
   0x2   :  { %v25_v2 = vld [vmem:[%s6878_s0] sm:$0xff]  ;;  %v5182_v3 = vpack.c.bf16 %v22_v1, %v21_v0 }
   0x3   :  { %4758 = vmatprep.mubr.msk.f32.mxu0 %vm31_vm0, %v25_v2 }
   0x4   :  { %10 = vsyncpa [#allocation3], 0  ;;  %5183 = vmatprep.subr.bf16.mxu0 %v5182_v3  ;;  %v26_v4 = vld [vmem:[%s6878_s0 + $0x8] sm:$0xff]  ;;  %v149_v5 = vld [vmem:[%s6881_s3] sm:$0xff]  ;;  %v5725_v7 = vmov 0.0|0.0   ;;  %vm5726_vm1 = vmmov 0  }
   0x5   :  { %5185 = vmatpush3.bf16.msra.mxu0 %v5182_v3  ;;  %v150_v6 = vld [vmem:[%s6881_s3 + $0x8] sm:$0xff]  ;;  %5186 = vmatprep.subr.bf16.mxu1 %v5725_v7  ;;  %v151_v9 = vld [vmem:[%s6881_s3 + $0x10] sm:$0xff]  ;;  %v152_v10 = vld [vmem:[%s6881_s3 + $0x18] sm:$0xff]  ;;  %v5727_v12 = vmov 0.0   ;;  %vm118_vm2 = vcmask 1045504   ;;  %vm134_vm3 = vcmask 1041408  }
   0x6   :  { %v5187_v8 = vpack.c.bf16 %v150_v6, %v149_v5  ;;  %v5190_v11 = vpack.c.bf16 %v152_v10, %v151_v9  ;;  %4769 = vmatprep.mubr.msk.f32.mxu1 %vm5726_vm1, %v5727_v12  ;;  %v113_v13 = vld [vmem:[%s6880_s2] sm:$0xff]  ;;  %v114_v14 = vld [vmem:[%s6880_s2 + $0x8] sm:$0x3]  ;;  %v24_v17 = vld [vmem:[%s6882_s4 + $0x1c] sm:$0x3]  ;;  %vm181_vm4 = vcmask 261120  }
   0x7   :  { %v119_v15 = vrot.slane %v113_v13, 2  ;;  %v120_v16 = vrot.slane %v114_v14, 2  ;;  %v4392_v18 = vld [vmem:[%s6882_s4 + $0x1b] ss:$0 sm:$0xff]  ;;  %v115_v22 = vadd.f32 %v113_v13, %v24_v17  ;;  %vm137_vm5 = vcmask 1043456   ;;  %s5728_s17 = smov 112   ;;  %vm5850_vm6 = vmpackc.low %vm31_vm0, %vm31_vm0 }
   0x8   :  { %4759 = vmatmul.mubr.msk.f32.vlgmr.msra.gmra.mrb[0].mxu0 %vm31_vm0, %v26_v4  ;;  %5188 = vmatpush3.bf16.msra.mxu1 %v5187_v8  ;;  %v4397_v33 = vld [vmem:[%s6882_s4] ss:$0 sm:$0xff]  ;;  %s5729_s18 = smov 96   ;;  %s5730_s19 = smov 80   ;;  %vm367_vm7 = vcmask 74752   ;;  %vm363_vm8 = vcmask 80896  }
   0x9   :  { %5189 = vmatprep.subr.bf16.mxu1 %v5725_v7  ;;  %v121_v20 = vsel %vm118_vm2, %v119_v15, %v120_v16  ;;  %v129_v26 = vrot.slane %v115_v22, 6  ;;  %v5868_v56 = vld [vmem:[%s6879_s1] ss:$0 sm:$0xff]  ;;  %s5731_s22 = smov 64   ;;  %vm5732_vm9 = vmmov 1   ;;  %s5733_s23 = smov 48  }
   0xa   :  { %vm5881_vm10 = vmpackc.low %vm134_vm3, %vm5732_vm9  ;;  %s5734_s26 = smov 16   ;;  %vm1363_vm11 = vcmask 523264   ;;  %vm1218_vm12 = vcmask 257024   ;;  %s5735_s16 = smov 32   ;;  %v5700_v48 = vld [vmem:[%s6879_s1 + $0x1] ss:$0 sm:$0xff] }
   0xb   :  { %s5736_s0 = smov [#allocation2]  }
   0xc   :  { %5191 = vmatpush3.bf16.msra.mxu1 %v5190_v11 }
  0xdb   :  { %v4760_v19 = vpop.f32.mrb[0].mxu0 }
  0xdc   :  { %v104_v21 = vpop.f32.mrb[1].mxu0  ;;  %v110_v23 = vadd.f32 %v4760_v19, %v4392_v18 }
  0xdd   :  { %v105_v24 = vadd.f32 %v4392_v18, %v104_v21 }
  0xde   :  { %v124_v27 = vadd.f32 %v121_v20, %v110_v23 }
  0xdf   :  { %v123_v25 = vadd.f32 %v121_v20, %v105_v24 }
  0xe0   :  { %v5816_v31 = vrot.slane %v124_v27, 4 }
  0xe1   :  { %v126_v28 = vrot.slane %v123_v25, 6 }
  0xe3   :  { %v5811_v29 = vsel %vm134_vm3, %v115_v22, %v126_v28  ;;  %v136_v30 = vsel %vm134_vm3, %v126_v28, %v129_v26 }
  0xe4   :  { %4770 = vmatmul.mubr.msk.f32.vlgmr.msra.gmra.mrb[0].mxu1 %vm181_vm4, %v5811_v29  ;;  %v5821_v32 = vsel %vm137_vm5, %v136_v30, %v5816_v31 }
  0xe5   :  { %4772 = vmatprep.mubr.msk.f32.mxu1 %vm5726_vm1, %v5727_v12 }
  0xe8   :  { %4773 = vmatmul.mubr.msk.f32.gmra.mrb[2].mxu1 %vm181_vm4, %v5821_v32 }
  0xe9   :  { %4775 = vmatprep.mubr.msk.f32.mxu1 %vm5726_vm1, %v5727_v12 }
  0xec   :  { %4776 = vmatmul.mubr.msk.f32.gmra.mrb[4].mxu1 %vm181_vm4, %v5816_v31 }
 0x1b7   :  { %v256_v34 = vpop.f32.mrb[0].mxu1 }
 0x1b8   :  { %v257_v35 = vadd.f32 %v4397_v33, %v256_v34  ;;  %v4771_v36 = vpop.f32.mrb[1].mxu1 }
 0x1ba   :  { %475 = vrot.lane.b32.xlu1 %v257_v35, %s5728_s17  ;;  %4782 = vmatprep.mubr.msk.f32.mxu0 %vm31_vm0, %v257_v35 }
 0x1bb   :  { %v261_v37 = vpop.f32.mrb[2].mxu1 }
 0x1bc   :  { %v5834_v38 = vadd.f32 %v4397_v33, %v261_v37  ;;  %v4774_v39 = vpop.f32.mrb[3].mxu1 }
 0x1be   :  { %477 = vrot.lane.b32.xlu1 %v5834_v38, %s5728_s17  ;;  %v5839_v40 = vpack.i.bf16 %v5834_v38, %v257_v35 }
 0x1bf   :  { %v266_v41 = vpop.f32.mrb[4].mxu1 }
 0x1c0   :  { %v5841_v42 = vadd.f32 %v4397_v33, %v266_v41  ;;  %5445 = vrot.lane.b32.xlu0 %v5839_v40, %s5729_s18  ;;  %v4777_v43 = vpop.f32.mrb[5].mxu1  ;;  %v691_v41 = vrot.slane %v5834_v38, 2 }
 0x1c2   :  { %v5894_v39 = vrot.slane %v5841_v42, 2 }
 0x1c4   :  { %5450 = vrot.lane.b32.xlu0 %v5839_v40, %s5730_s19  ;;  %v5899_v43 = vsel %vm118_vm2, %v691_v41, %v5894_v39 }
 0x22c   :  { %v476_v44 = vpop.permute.xlu1 %475 }
 0x22d   :  { %4796 = vmatprep.mubr.msk.f32.mxu1 %vm31_vm0, %v476_v44  ;;  %v5903_v44 = vpack.i.bf16 %v5894_v39, %v5899_v43 }
 0x230   :  { %v478_v54 = vpop.permute.xlu1 %477 }
 0x232   :  { %v5446_v45 = vpop.permute.xlu0 %5445 }
 0x233   :  { %v5448_v46 = vunpack.i.h.bf16 %v5446_v45  ;;  %v5447_v47 = vunpack.i.l.bf16 %v5446_v45 }
 0x235   :  { %v5192_v49 = vpack.c.bf16 %v5448_v46, %v5447_v47 }
 0x236   :  { %v5451_v50 = vpop.permute.xlu0 %5450 }
 0x237   :  { %v5453_v51 = vunpack.i.h.bf16 %v5451_v50  ;;  %v5452_v52 = vunpack.i.l.bf16 %v5451_v50  ;;  %5194 = vmatprep.subr.msk.bf16.mxu0 %vm5850_vm6, %v5192_v49 }
 0x238   :  { %5197 = vmatpush3.bf16.xpose.msk.msra.mxu0 %vm5850_vm6, %v5192_v49 }
 0x239   :  { %v5204_v53 = vpack.c.bf16 %v5453_v51, %v5452_v52 }
 0x23b   :  { %5206 = vmatprep.subr.msk.bf16.mxu1 %vm5850_vm6, %v5204_v53 }
 0x23c   :  { %5209 = vmatpush3.bf16.xpose.msk.msra.mxu1 %vm5850_vm6, %v5204_v53 }
 0x23f   :  { %4783 = vmatmul.mubr.msk.f32.vlgmr.msra.gmra.mrb[2].mxu0 %vm31_vm0, %v5834_v38 }
 0x243   :  { %4797 = vmatmul.mubr.msk.f32.vlgmr.msra.gmra.mrb[6].mxu1 %vm31_vm0, %v478_v54 }
 0x312   :  { %v4784_v55 = vpop.f32.mrb[2].mxu0 }
 0x313   :  { %v360_v57 = vmul.f32 0.25, %v4784_v55  ;;  %v350_v58 = vpop.f32.mrb[3].mxu0 }
 0x314   :  { %v359_v59 = vmul.f32 0.25, %v350_v58 }
 0x315   :  { %v362_v60 = vadd.f32 %v5868_v56, %v360_v57 }
 0x316   :  { %v4798_v61 = vpop.f32.mrb[6].mxu1  ;;  %v361_v62 = vadd.f32 %v5868_v56, %v359_v59 }
 0x317   :  { %v557_v63 = vpop.f32.mrb[7].mxu1  ;;  %v368_v0 = vsel %vm367_vm7, %v362_v60, -inf  ;;  %v567_v1 = vmul.f32 0.25, %v4798_v61 }
 0x318   :  { %v566_v2 = vmul.f32 0.25, %v557_v63  ;;  %369 = vmax.xlane.f32.xlu1 %v368_v0  ;;  %v364_v3 = vsel %vm363_vm8, %v361_v62, -inf }
 0x319   :  { %365 = vmax.xlane.f32.xlu0 %v364_v3  ;;  %v569_v6 = vadd.f32 %v5868_v56, %v567_v1 }
 0x31a   :  { %v568_v4 = vadd.f32 %v5868_v56, %v566_v2 }
 0x31b   :  { %v573_v8 = vsel %vm367_vm7, %v569_v6, -inf }
 0x31c   :  { %v570_v5 = vsel %vm363_vm8, %v568_v4, -inf }
 0x31d   :  { %571 = vmax.xlane.f32.xlu0 %v570_v5  ;;  %v5936_v5 = vld [vmem:[%s6879_s1 + $0x1] ss:$0 sm:$0xff] }
 0x321   :  { %574 = vmax.xlane.f32.xlu0 %v573_v8 }
 0x329   :  { %5455 = vrot.lane.b32.xlu1 %v5839_v40, %s5731_s22 }
 0x3a5   :  { %v370_v9 = vpop.xlane.xlu1 %369 }
 0x3a6   :  { %v372_v10 = vsub.f32 %v362_v60, %v370_v9  ;;  %v366_v11 = vpop.xlane.xlu0 %365 }
 0x3a7   :  { %v371_v13 = vsub.f32 %v361_v62, %v366_v11 }
 0x3a8   :  { %v375_v14 = vmul.f32 1.442695, %v372_v10 }
 0x3a9   :  { %v373_v15 = vmul.f32 1.442695, %v371_v13  ;;  %v5456_v16 = vpop.permute.xlu1 %5455 }
 0x3aa   :  { %5564 = vpow2.f32 %v375_v14  ;;  %v5458_v17 = vunpack.i.h.bf16 %v5456_v16  ;;  %v5457_v18 = vunpack.i.l.bf16 %v5456_v16  ;;  %v572_v19 = vpop.xlane.xlu0 %571 }
 0x3ab   :  { %5566 = vpow2.f32 %v373_v15  ;;  %v576_v21 = vsub.f32 %v568_v4, %v572_v19 }
 0x3ac   :  { %v5198_v22 = vpack.c.bf16 %v5458_v17, %v5457_v18 }
 0x3ad   :  { %v578_v23 = vmul.f32 1.442695, %v576_v21 }
 0x3ae   :  { %5200 = vmatprep.subr.msk.bf16.mxu0 %vm5881_vm10, %v5198_v22  ;;  %v575_v24 = vpop.xlane.xlu0 %574 }
 0x3af   :  { %5568 = vpow2.f32 %v578_v23  ;;  %v577_v25 = vsub.f32 %v569_v6, %v575_v24  ;;  %5203 = vmatpush3.bf16.msk.msra.mxu0 %vm5881_vm10, %v5198_v22 }
 0x3b1   :  { %v580_v26 = vmul.f32 1.442695, %v577_v25 }
 0x3b3   :  { %5570 = vpow2.f32 %v580_v26 }
 0x3b4   :  { %v5565_v27 = vpop.eup %5564 }
 0x3b5   :  { %v5567_v28 = vpop.eup %5566  ;;  %v380_v30 = vsel %vm367_vm7, %v5565_v27, 0.0 }
 0x3b6   :  { %381 = vadd.xlane.f32.xlu0 %v380_v30  ;;  %v377_v33 = vsel %vm363_vm8, %v5567_v28, 0.0 }
 0x3b7   :  { %378 = vadd.xlane.f32.xlu1 %v377_v33 }
 0x3b9   :  { %v5569_v34 = vpop.eup %5568 }
 0x3ba   :  { %v582_v35 = vsel %vm363_vm8, %v5569_v34, 0.0 }
 0x3bb   :  { %583 = vadd.xlane.f32.xlu1 %v582_v35 }
 0x3bd   :  { %v5571_v36 = vpop.eup %5570 }
 0x3be   :  { %v585_v37 = vsel %vm367_vm7, %v5571_v36, 0.0 }
 0x3bf   :  { %586 = vadd.xlane.f32.xlu0 %v585_v37 }
 0x3cc   :  { %5465 = vrot.lane.b32.xlu1 %v5903_v44, %s5729_s18 }
 0x3d5   :  { %5460 = vrot.lane.b32.xlu0 %v5839_v40, %s5733_s23 }
 0x443   :  { %v382_v45 = vpop.xlane.xlu0 %381 }
 0x444   :  { %5572 = vrcp.f32 %v382_v45  ;;  %v379_v42 = vpop.xlane.xlu1 %378 }
 0x445   :  { %5574 = vrcp.f32 %v379_v42 }
 0x448   :  { %v584_v38 = vpop.xlane.xlu1 %583 }
 0x449   :  { %5576 = vrcp.f32 %v584_v38 }
 0x44c   :  { %v587_v46 = vpop.xlane.xlu0 %586  ;;  %v5466_v47 = vpop.permute.xlu1 %5465 }
 0x44d   :  { %5578 = vrcp.f32 %v587_v46  ;;  %v5468_v51 = vunpack.i.h.bf16 %v5466_v47  ;;  %v5467_v54 = vunpack.i.l.bf16 %v5466_v47 }
 0x44e   :  { %v5573_v49 = vpop.eup %5572 }
 0x44f   :  { %v5575_v50 = vpop.eup %5574  ;;  %v386_v58 = vmul.f32 %v5573_v49, %v5565_v27  ;;  %v5216_v61 = vpack.c.bf16 %v5468_v51, %v5467_v54 }
 0x450   :  { %v5461_v52 = vpop.permute.xlu0 %5460  ;;  %v385_v53 = vmul.f32 %v5575_v50, %v5567_v28 }
 0x451   :  { %v5463_v55 = vunpack.i.h.bf16 %v5461_v52  ;;  %v5462_v57 = vunpack.i.l.bf16 %v5461_v52 }
 0x452   :  { %4789 = vmatprep.mubr.msk.f32.mxu0 %vm363_vm8, %v385_v53 }
 0x453   :  { %v5577_v40 = vpop.eup %5576  ;;  %v5210_v59 = vpack.c.bf16 %v5463_v55, %v5462_v57  ;;  %4790 = vmatmul.mubr.msk.f32.vlgmr.msra.gmra.mrb[4].mxu0 %vm363_vm8, %v386_v58 }
 0x454   :  { %v590_v60 = vmul.f32 %v5577_v40, %v5569_v34 }
 0x455   :  { %5212 = vmatprep.subr.msk.bf16.mxu0 %vm5881_vm10, %v5210_v59 }
 0x456   :  { %5215 = vmatpush3.bf16.msk.msra.mxu0 %vm5881_vm10, %v5210_v59  ;;  %4803 = vmatprep.mubr.msk.f32.mxu0 %vm363_vm8, %v590_v60 }
 0x457   :  { %v5579_v62 = vpop.eup %5578  ;;  %5218 = vmatprep.subr.msk.bf16.mxu0 %vm5850_vm6, %v5216_v61 }
 0x458   :  { %v591_v63 = vmul.f32 %v5579_v62, %v5571_v36 }
 0x45a   :  { %4804 = vmatmul.mubr.msk.f32.vlgmr.msra.gmra.mrb[6].mxu0 %vm363_vm8, %v591_v63 }
 0x45b   :  { %4810 = vmatprep.mubr.msk.f32.mxu0 %vm31_vm0, %v5899_v43 }
 0x45f   :  { %5221 = vmatpush3.bf16.xpose.msk.msra.mxu0 %vm5850_vm6, %v5216_v61 }
 0x466   :  { %4811 = vmatmul.mubr.msk.f32.vlgmr.msra.gmra.mrb[8].mxu0 %vm31_vm0, %v5894_v39 }
 0x526   :  { %v5925_v0 = vpop.f32.mrb[4].mxu0 }
 0x527   :  { %v5927_v1 = vpop.f32.mrb[5].mxu0 }
 0x52d   :  { %v5929_v2 = vpop.f32.mrb[6].mxu0 }
 0x52e   :  { %v5931_v3 = vpop.f32.mrb[7].mxu0 }
 0x539   :  { %v4812_v4 = vpop.f32.mrb[8].mxu0 }
 0x53a   :  { %v782_v6 = vmul.f32 0.25, %v4812_v4  ;;  %v772_v8 = vpop.f32.mrb[9].mxu0 }
 0x53b   :  { %v781_v9 = vmul.f32 0.25, %v772_v8 }
 0x53c   :  { %v784_v10 = vadd.f32 %v5936_v5, %v782_v6 }
 0x53d   :  { %v783_v11 = vadd.f32 %v5936_v5, %v781_v9 }
 0x53e   :  { %v788_v13 = vsel %vm367_vm7, %v784_v10, -inf }
 0x53f   :  { %789 = vmax.xlane.f32.xlu0 %v788_v13  ;;  %v785_v14 = vsel %vm363_vm8, %v783_v11, -inf }
 0x540   :  { %786 = vmax.xlane.f32.xlu1 %v785_v14 }
 0x5cc   :  { %v790_v15 = vpop.xlane.xlu0 %789 }
 0x5cd   :  { %v792_v16 = vsub.f32 %v784_v10, %v790_v15  ;;  %v787_v17 = vpop.xlane.xlu1 %786 }
 0x5ce   :  { %v791_v18 = vsub.f32 %v783_v11, %v787_v17 }
 0x5cf   :  { %v795_v19 = vmul.f32 1.442695, %v792_v16 }
 0x5d0   :  { %v793_v21 = vmul.f32 1.442695, %v791_v18 }
 0x5d1   :  { %5580 = vpow2.f32 %v795_v19 }
 0x5d2   :  { %5582 = vpow2.f32 %v793_v21 }
 0x5db   :  { %v5581_v22 = vpop.eup %5580 }
 0x5dc   :  { %v5583_v23 = vpop.eup %5582  ;;  %v800_v24 = vsel %vm367_vm7, %v5581_v22, 0.0 }
 0x5dd   :  { %801 = vadd.xlane.f32.xlu1 %v800_v24  ;;  %v797_v25 = vsel %vm363_vm8, %v5583_v23, 0.0 }
 0x5de   :  { %798 = vadd.xlane.f32.xlu0 %v797_v25 }
 0x5ee   :  { %5475 = vrot.lane.b32.xlu1 %v5903_v44, %s5730_s19 }
 0x5f2   :  { %895 = vrot.lane.b32.xlu1 %v5899_v43, %s5728_s17 }
 0x5f4   :  { %5470 = vrot.lane.b32.xlu0 %v5903_v44, %s5731_s22 }
 0x5f8   :  { %897 = vrot.lane.b32.xlu0 %v5894_v39, %s5728_s17 }
 0x66a   :  { %v802_v26 = vpop.xlane.xlu1 %801 }
 0x66b   :  { %5584 = vrcp.f32 %v802_v26  ;;  %v799_v27 = vpop.xlane.xlu0 %798 }
 0x66c   :  { %5586 = vrcp.f32 %v799_v27 }
 0x66e   :  { %v5476_v28 = vpop.permute.xlu1 %5475 }
 0x66f   :  { %v5471_v30 = vpop.permute.xlu0 %5470  ;;  %v5478_v33 = vunpack.i.h.bf16 %v5476_v28  ;;  %v5477_v34 = vunpack.i.l.bf16 %v5476_v28 }
 0x670   :  { %v5473_v35 = vunpack.i.h.bf16 %v5471_v30  ;;  %v5472_v36 = vunpack.i.l.bf16 %v5471_v30 }
 0x671   :  { %v5228_v41 = vpack.c.bf16 %v5478_v33, %v5477_v34  ;;  %v6015_v34 = vld [vmem:[%s6882_s4 + $0x1] ss:$0 sm:$0xff] }
 0x672   :  { %v5222_v37 = vpack.c.bf16 %v5473_v35, %v5472_v36  ;;  %v896_v38 = vpop.permute.xlu1 %895 }
 0x673   :  { %v898_v46 = vpop.permute.xlu0 %897 }
 0x674   :  { %5224 = vmatprep.subr.msk.bf16.mxu1 %vm5881_vm10, %v5222_v37 }
 0x675   :  { %v5585_v43 = vpop.eup %5584  ;;  %5227 = vmatpush3.bf16.msk.msra.mxu1 %vm5881_vm10, %v5222_v37 }
 0x676   :  { %v5587_v39 = vpop.eup %5586  ;;  %5230 = vmatprep.subr.msk.bf16.mxu1 %vm5850_vm6, %v5228_v41  ;;  %v806_v42 = vmul.f32 %v5585_v43, %v5581_v22  ;;  %v155_v22 = vld [vmem:[%s6881_s3 + $0x30] sm:$0xff] }
 0x677   :  { %v805_v45 = vmul.f32 %v5587_v39, %v5583_v23  ;;  %v156_v23 = vld [vmem:[%s6881_s3 + $0x38] sm:$0xff] }
 0x678   :  { %v5244_v24 = vpack.c.bf16 %v156_v23, %v155_v22 }
 0x679   :  { %4817 = vmatprep.mubr.msk.f32.mxu1 %vm363_vm8, %v805_v45 }
 0x67a   :  { %4818 = vmatmul.mubr.msk.f32.vlgmr.msra.gmra.mrb[8].mxu1 %vm363_vm8, %v806_v42 }
 0x67b   :  { %4824 = vmatprep.mubr.msk.f32.mxu1 %vm31_vm0, %v896_v38 }
 0x67e   :  { %5233 = vmatpush3.bf16.xpose.msk.msra.mxu1 %vm5850_vm6, %v5228_v41 }
 0x67f   :  { %5246 = vmatprep.subr.bf16.mxu1 %v5725_v7 }
 0x685   :  { %4825 = vmatmul.mubr.msk.f32.vlgmr.msra.gmra.mrb[10].mxu1 %vm31_vm0, %v898_v46 }
 0x686   :  { %4859 = vmatprep.mubr.msk.f32.mxu1 %vm5726_vm1, %v5727_v12 }
 0x74d   :  { %v5967_v47 = vpop.f32.mrb[8].mxu1 }
 0x74e   :  { %v5969_v49 = vpop.f32.mrb[9].mxu1 }
 0x758   :  { %v4826_v50 = vpop.f32.mrb[10].mxu1 }
 0x759   :  { %v987_v51 = vmul.f32 0.25, %v4826_v50  ;;  %v977_v52 = vpop.f32.mrb[11].mxu1 }
 0x75a   :  { %v986_v53 = vmul.f32 0.25, %v977_v52 }
 0x75b   :  { %v989_v54 = vadd.f32 %v5936_v5, %v987_v51  ;;  %v158_v51 = vld [vmem:[%s6881_s3 + $0x48] sm:$0xff] }
 0x75c   :  { %v988_v55 = vadd.f32 %v5936_v5, %v986_v53  ;;  %v159_v53 = vld [vmem:[%s6881_s3 + $0x50] sm:$0xff] }
 0x75d   :  { %v993_v57 = vsel %vm367_vm7, %v989_v54, -inf }
 0x75e   :  { %994 = vmax.xlane.f32.xlu0 %v993_v57  ;;  %v990_v58 = vsel %vm363_vm8, %v988_v55, -inf }
 0x75f   :  { %991 = vmax.xlane.f32.xlu1 %v990_v58 }
 0x7eb   :  { %v995_v40 = vpop.xlane.xlu0 %994 }
 0x7ec   :  { %v997_v59 = vsub.f32 %v989_v54, %v995_v40  ;;  %v992_v60 = vpop.xlane.xlu1 %991  ;;  %v160_v54 = vld [vmem:[%s6881_s3 + $0x58] sm:$0xff] }
 0x7ed   :  { %v996_v61 = vsub.f32 %v988_v55, %v992_v60  ;;  %v5250_v55 = vpack.c.bf16 %v160_v54, %v159_v53 }
 0x7ee   :  { %v1000_v62 = vmul.f32 1.442695, %v997_v59 }
 0x7ef   :  { %v998_v63 = vmul.f32 1.442695, %v996_v61 }
 0x7f0   :  { %5588 = vpow2.f32 %v1000_v62 }
 0x7f1   :  { %5590 = vpow2.f32 %v998_v63 }
 0x7fa   :  { %v5589_v4 = vpop.eup %5588 }
 0x7fb   :  { %v5591_v6 = vpop.eup %5590  ;;  %v1005_v8 = vsel %vm367_vm7, %v5589_v4, 0.0 }
 0x7fc   :  { %1006 = vadd.xlane.f32.xlu1 %v1005_v8  ;;  %v1002_v9 = vsel %vm363_vm8, %v5591_v6, 0.0 }
 0x7fd   :  { %1003 = vadd.xlane.f32.xlu0 %v1002_v9  ;;  %v6059_v9 = vld [vmem:[%s6882_s4 + $0x5] ss:$0 sm:$0xff] }
 0x80d   :  { %682 = vrot.lane.b32.xlu1 %v5931_v3, %s5734_s26  ;;  %v153_v3 = vld [vmem:[%s6881_s3 + $0x20] sm:$0xff] }
 0x813   :  { %5480 = vrot.lane.b32.xlu0 %v5903_v44, %s5733_s23  ;;  %v154_v44 = vld [vmem:[%s6881_s3 + $0x28] sm:$0xff] }
 0x814   :  { %v5241_v19 = vpack.c.bf16 %v154_v44, %v153_v3  ;;  %v165_v44 = vld [vmem:[%s6881_s3 + $0x80] sm:$0xff] }
 0x817   :  { %684 = vrot.lane.b32.xlu0 %v5929_v2, %s5734_s26 }
 0x889   :  { %v1007_v10 = vpop.xlane.xlu1 %1006 }
 0x88a   :  { %5592 = vrcp.f32 %v1007_v10  ;;  %v1004_v11 = vpop.xlane.xlu0 %1003 }
 0x88b   :  { %5594 = vrcp.f32 %v1004_v11 }
 0x88d   :  { %v683_v25 = vpop.permute.xlu1 %682 }
 0x88e   :  { %v5481_v13 = vpop.permute.xlu0 %5480  ;;  %v688_v26 = vsel %vm31_vm0, %v5927_v1, %v683_v25 }
 0x88f   :  { %v5483_v14 = vunpack.i.h.bf16 %v5481_v13  ;;  %v5482_v15 = vunpack.i.l.bf16 %v5481_v13  ;;  %v162_v13 = vld [vmem:[%s6881_s3 + $0x68] sm:$0xff] }
 0x891   :  { %v5234_v16 = vpack.c.bf16 %v5483_v14, %v5482_v15  ;;  %v163_v14 = vld [vmem:[%s6881_s3 + $0x70] sm:$0xff] }
 0x892   :  { %v685_v37 = vpop.permute.xlu0 %684 }
 0x893   :  { %5236 = vmatprep.subr.msk.bf16.mxu0 %vm5881_vm10, %v5234_v16  ;;  %v689_v45 = vsel %vm31_vm0, %v5925_v0, %v685_v37  ;;  %v157_v0 = vld [vmem:[%s6881_s3 + $0x40] sm:$0xff] }
 0x894   :  { %v5593_v2 = vpop.eup %5592  ;;  %5239 = vmatpush3.bf16.msk.msra.mxu0 %vm5881_vm10, %v5234_v16  ;;  %v5247_v52 = vpack.c.bf16 %v158_v51, %v157_v0  ;;  %v164_v16 = vld [vmem:[%s6881_s3 + $0x78] sm:$0xff] }
 0x895   :  { %v5595_v17 = vpop.eup %5594  ;;  %5240 = vmatprep.subr.bf16.mxu0 %v5725_v7  ;;  %v1011_v21 = vmul.f32 %v5593_v2, %v5589_v4  ;;  %v5256_v3 = vpack.c.bf16 %v164_v16, %v163_v14  ;;  %v166_v2 = vld [vmem:[%s6881_s3 + $0x88] sm:$0xff] }
 0x896   :  { %v1010_v18 = vmul.f32 %v5595_v17, %v5591_v6  ;;  %5248 = vmatpush3.bf16.msra.mxu1 %v5247_v52  ;;  %v6054_v6 = vld [vmem:[%s6882_s4 + $0x4] ss:$0 sm:$0xff]  ;;  %v5259_v17 = vpack.c.bf16 %v166_v2, %v165_v44 }
 0x897   :  { %5249 = vmatprep.subr.bf16.mxu1 %v5725_v7 }
 0x898   :  { %4831 = vmatprep.mubr.msk.f32.mxu0 %vm363_vm8, %v1010_v18  ;;  %v167_v18 = vld [vmem:[%s6881_s3 + $0x90] sm:$0xff] }
 0x899   :  { %4832 = vmatmul.mubr.msk.f32.vlgmr.msra.gmra.mrb[10].mxu0 %vm363_vm8, %v1011_v21 }
 0x89a   :  { %5242 = vmatpush3.bf16.msra.mxu0 %v5241_v19  ;;  %4842 = vmatprep.mubr.msk.f32.mxu0 %vm5726_vm1, %v5727_v12  ;;  %v168_v19 = vld [vmem:[%s6881_s3 + $0x98] sm:$0xff] }
 0x89b   :  { %5243 = vmatprep.subr.bf16.mxu0 %v5725_v7  ;;  %5251 = vmatpush3.bf16.msra.mxu1 %v5250_v55  ;;  %v5262_v21 = vpack.c.bf16 %v168_v19, %v167_v18  ;;  %v1516_v18 = vld [vmem:[%s6881_s3 + $0xa0] sm:$0xff]  ;;  %v1517_v19 = vld [vmem:[%s6881_s3 + $0xa8] sm:$0xff] }
 0x89c   :  { %5264 = vmatprep.subr.bf16.mxu1 %v5725_v7 }
 0x89e   :  { %5245 = vmatpush3.bf16.msra.mxu0 %v5244_v24 }
 0x89f   :  { %5252 = vmatprep.subr.bf16.mxu0 %v5725_v7 }
 0x8a1   :  { %4843 = vmatmul.mubr.msk.f32.vlgmr.msra.gmra.mrb[12].mxu0 %vm181_vm4, %v688_v26 }
 0x8a2   :  { %4845 = vmatprep.mubr.msk.f32.mxu0 %vm5726_vm1, %v5727_v12 }
 0x96c   :  { %v4833_v27 = vpop.f32.mrb[10].mxu0 }
 0x96d   :  { %v1091_v28 = vpop.f32.mrb[11].mxu0 }
 0x96e   :  { %1102 = vrot.lane.b32.xlu1 %v1091_v28, %s5734_s26 }
 0x974   :  { %v1195_v30 = vpop.f32.mrb[12].mxu0 }
 0x975   :  { %v4844_v33 = vpop.f32.mrb[13].mxu0  ;;  %v1196_v35 = vadd.f32 %v6015_v34, %v1195_v30 }
 0x977   :  { %v1209_v1 = vadd.f32 %v1196_v35, %v5811_v29  ;;  %v6109_v35 = vld [vmem:[%s6882_s4 + $0x2] ss:$0 sm:$0xff] }
 0x979   :  { %v1212_v36 = vsel %vm181_vm4, %v1209_v1, 0.0 }
 0x992   :  { %1213 = vadd.xlane.f32.xlu1 %v1212_v36 }
 0x9e0   :  { %v1103_v41 = vpop.permute.xlu1 %1102 }
 0x9e1   :  { %v6022_v43 = vsel %vm31_vm0, %v5969_v49, %v1103_v41 }
 0x9e2   :  { %v1112_v39 = vrot.slane %v6022_v43, 6 }
 0x9e4   :  { %v1116_v42 = vsel %vm134_vm3, %v689_v45, %v1112_v39 }
 0x9e5   :  { %4846 = vmatmul.mubr.msk.f32.gmra.mrb[14].mxu0 %vm181_vm4, %v1116_v42 }
 0x9e6   :  { %4848 = vmatprep.mubr.msk.f32.mxu0 %vm5726_vm1, %v5727_v12 }
 0xa1f   :  { %v1214_v29 = vpop.xlane.xlu1 %1213 }
 0xa20   :  { %v1223_v38 = vmul.f32 0.03125, %v1214_v29 }
 0xa22   :  { %v1226_v46 = vsub.f32 %v1209_v1, %v1223_v38 }
 0xa24   :  { %v1229_v50 = vmul.f32 %v1226_v46, %v1226_v46 }
 0xa26   :  { %v1232_v49 = vsel %vm181_vm4, %v1229_v50, 0.0 }
 0xa27   :  { %1233 = vadd.xlane.f32.xlu1 %v1232_v49 }
 0xab4   :  { %v1234_v57 = vpop.xlane.xlu1 %1233 }
 0xab5   :  { %v1241_v58 = vmul.f32 0.03125, %v1234_v57 }
 0xab7   :  { %v1244_v40 = vadd.f32 1e-05, %v1241_v58 }
 0xab8   :  { %v1200_v59 = vpop.f32.mrb[14].mxu0 }
 0xab9   :  { %5596 = vrsqrt.f32 %v1244_v40  ;;  %v1201_v60 = vadd.f32 %v6015_v34, %v1200_v59  ;;  %v4847_v61 = vpop.f32.mrb[15].mxu0  ;;  %v6127_v40 = vld [vmem:[%s6882_s4 + $0x3] ss:$0 sm:$0xff] }
 0xabb   :  { %v1210_v62 = vadd.f32 %v1201_v60, %v5821_v32  ;;  %v161_v32 = vld [vmem:[%s6881_s3 + $0x60] sm:$0xff] }
 0xabc   :  { %v5253_v15 = vpack.c.bf16 %v162_v13, %v161_v32 }
 0xabd   :  { %v1215_v63 = vsel %vm181_vm4, %v1210_v62, 0.0 }
 0xabe   :  { %1216 = vadd.xlane.f32.xlu0 %v1215_v63  ;;  %5254 = vmatpush3.bf16.msra.mxu0 %v5253_v15 }
 0xabf   :  { %5255 = vmatprep.subr.bf16.mxu0 %v5725_v7 }
 0xac2   :  { %5257 = vmatpush3.bf16.msra.mxu0 %v5256_v3 }
 0xac3   :  { %v5597_v4 = vpop.eup %5596  ;;  %5258 = vmatprep.subr.bf16.mxu0 %v5725_v7 }
 0xac4   :  { %v1250_v8 = vmul.f32 %v5597_v4, %v1226_v46 }
 0xac6   :  { %v1257_v10 = vmul.f32 %v6054_v6, %v1250_v8  ;;  %5260 = vmatpush3.bf16.msra.mxu0 %v5259_v17 }
 0xac7   :  { %5261 = vmatprep.subr.bf16.mxu0 %v5725_v7 }
 0xac8   :  { %v6063_v11 = vadd.f32 %v6059_v9, %v1257_v10 }
 0xaca   :  { %4860 = vmatmul.mubr.msk.f32.vlgmr.msra.gmra.mrb[12].mxu1 %vm181_vm4, %v6063_v11  ;;  %5263 = vmatpush3.bf16.msra.mxu0 %v5262_v21  ;;  %v5265_v21 = vpack.c.bf16 %v1517_v19, %v1516_v18 }
 0xacb   :  { %4862 = vmatprep.mubr.msk.f32.mxu1 %vm5726_vm1, %v5727_v12 }
 0xacc   :  { %5266 = vmatpush3.bf16.msra.mxu1 %v5265_v21 }
 0xacd   :  { %5267 = vmatprep.subr.bf16.mxu1 %v5725_v7 }
 0xad4   :  { %1104 = vrot.lane.b32.xlu0 %v4833_v27, %s5734_s26 }
 0xb4b   :  { %v1217_v22 = vpop.xlane.xlu0 %1216 }
 0xb4c   :  { %v1224_v23 = vmul.f32 0.03125, %v1217_v22 }
 0xb4e   :  { %v1227_v24 = vsub.f32 %v1210_v62, %v1224_v23 }
 0xb4f   :  { %v1105_v25 = vpop.permute.xlu0 %1104 }
 0xb50   :  { %v1109_v26 = vsel %vm31_vm0, %v5967_v47, %v1105_v25  ;;  %v1230_v27 = vmul.f32 %v1227_v24, %v1227_v24 }
 0xb51   :  { %v1113_v28 = vrot.slane %v1109_v26, 6 }
 0xb52   :  { %v1235_v30 = vsel %vm181_vm4, %v1230_v27, 0.0 }
 0xb53   :  { %1236 = vadd.xlane.f32.xlu1 %v1235_v30  ;;  %v1114_v33 = vsel %vm134_vm3, %v1112_v39, %v1113_v28 }
 0xb54   :  { %4849 = vmatmul.mubr.msk.f32.gmra.mrb[16].mxu0 %vm181_vm4, %v1114_v33 }
 0xb55   :  { %4884 = vmatprep.mubr.msk.f32.mxu0 %vm5726_vm1, %v5727_v12 }
 0xb9d   :  { %v1346_v47 = vpop.f32.mrb[12].mxu1 }
 0xb9e   :  { %v1347_v1 = vadd.f32 %v6109_v35, %v1346_v47  ;;  %v4861_v36 = vpop.f32.mrb[13].mxu1 }
 0xba0   :  { %v1360_v37 = vmax.f32 %v1347_v1, 0.0  ;;  %v6160_v1 = vld [vmem:[%s6882_s4 + $0x6] ss:$0 sm:$0xff] }
 0xba2   :  { %4885 = vmatmul.mubr.msk.f32.vlgmr.msra.gmra.mrb[18].mxu0 %vm1363_vm11, %v1360_v37  ;;  %v6165_v37 = vld [vmem:[%s6882_s4 + $0x7] ss:$0 sm:$0xff] }
 0xba3   :  { %4887 = vmatprep.mubr.msk.f32.mxu0 %vm5726_vm1, %v5727_v12 }
 0xbe0   :  { %v1237_v41 = vpop.xlane.xlu1 %1236 }
 0xbe1   :  { %v1242_v43 = vmul.f32 0.03125, %v1237_v41 }
 0xbe3   :  { %v1245_v39 = vadd.f32 1e-05, %v1242_v43 }
 0xbe5   :  { %5598 = vrsqrt.f32 %v1245_v39 }
 0xbef   :  { %v5599_v45 = vpop.eup %5598 }
 0xbf0   :  { %v1251_v42 = vmul.f32 %v5599_v45, %v1227_v24 }
 0xbf2   :  { %v1258_v29 = vmul.f32 %v6054_v6, %v1251_v42 }
 0xbf4   :  { %v1265_v38 = vadd.f32 %v6059_v9, %v1258_v29 }
 0xbf6   :  { %4863 = vmatmul.mubr.msk.f32.gmra.mrb[14].mxu1 %vm181_vm4, %v1265_v38 }
 0xbf7   :  { %4865 = vmatprep.mubr.msk.f32.mxu1 %vm5726_vm1, %v5727_v12 }
 0xc27   :  { %v1205_v46 = vpop.f32.mrb[16].mxu0 }
 0xc28   :  { %v1206_v50 = vadd.f32 %v6015_v34, %v1205_v46  ;;  %v4850_v49 = vpop.f32.mrb[17].mxu0 }
 0xc2a   :  { %v1211_v0 = vadd.f32 %v1206_v50, %v5816_v31 }
 0xc2c   :  { %v1219_v51 = vsel %vm1218_vm12, %v1211_v0, 0.0 }
 0xc2d   :  { %1220 = vadd.xlane.f32.xlu1 %v1219_v51 }
 0xc75   :  { %v1439_v52 = vpop.f32.mrb[18].mxu0 }
 0xc76   :  { %v4886_v53 = vpop.f32.mrb[19].mxu0  ;;  %v1453_v57 = vadd.f32 %v1439_v52, %v6063_v11 }
 0xc78   :  { %v1460_v31 = vadd.f32 %v6127_v40, %v1453_v57 }
 0xc7a   :  { %v1463_v60 = vsel %vm181_vm4, %v1460_v31, 0.0 }
 0xcba   :  { %v1221_v54 = vpop.xlane.xlu1 %1220 }
 0xcbb   :  { %v1225_v55 = vmul.f32 0.03125, %v1221_v54  ;;  %v6181_v54 = vld [vmem:[%s6882_s4 + $0x8] ss:$0 sm:$0xff] }
 0xcbd   :  { %v1228_v58 = vsub.f32 %v1211_v0, %v1225_v55 }
 0xcbf   :  { %v1231_v34 = vmul.f32 %v1228_v58, %v1228_v58 }
 0xcc1   :  { %v1238_v59 = vsel %vm1218_vm12, %v1231_v34, 0.0 }
 0xcc2   :  { %1239 = vadd.xlane.f32.xlu1 %v1238_v59 }
 0xcc6   :  { %1464 = vadd.xlane.f32.xlu1 %v1463_v60 }
 0xcc9   :  { %v1351_v61 = vpop.f32.mrb[14].mxu1 }
 0xcca   :  { %v1352_v62 = vadd.f32 %v6109_v35, %v1351_v61  ;;  %v4864_v63 = vpop.f32.mrb[15].mxu1 }
 0xccc   :  { %v1361_v4 = vmax.f32 %v1352_v62, 0.0 }
 0xcce   :  { %4888 = vmatmul.mubr.msk.f32.gmra.mrb[20].mxu0 %vm1363_vm11, %v1361_v4 }
 0xccf   :  { %4890 = vmatprep.mubr.msk.f32.mxu0 %vm5726_vm1, %v5727_v12 }
 0xd4f   :  { %v1240_v8 = vpop.xlane.xlu1 %1239 }
 0xd50   :  { %v1243_v10 = vmul.f32 0.03125, %v1240_v8 }
 0xd52   :  { %v1246_v11 = vadd.f32 1e-05, %v1243_v10 }
 0xd53   :  { %v1465_v32 = vpop.xlane.xlu1 %1464 }
 0xd54   :  { %5600 = vrsqrt.f32 %v1246_v11  ;;  %v1472_v13 = vmul.f32 0.03125, %v1465_v32 }
 0xd56   :  { %v1475_v14 = vsub.f32 %v1460_v31, %v1472_v13 }
 0xd58   :  { %v1478_v15 = vmul.f32 %v1475_v14, %v1475_v14 }
 0xd5a   :  { %v1481_v16 = vsel %vm181_vm4, %v1478_v15, 0.0 }
 0xd5b   :  { %1482 = vadd.xlane.f32.xlu0 %v1481_v16 }
 0xd5e   :  { %v5601_v3 = vpop.eup %5600 }
 0xd5f   :  { %v1252_v44 = vmul.f32 %v5601_v3, %v1228_v58 }
 0xd61   :  { %v1259_v2 = vmul.f32 %v6054_v6, %v1252_v44  ;;  %v1518_v6 = vld [vmem:[%s6881_s3 + $0xb0] sm:$0xff] }
 0xd63   :  { %v1266_v17 = vadd.f32 %v6059_v9, %v1259_v2  ;;  %v1519_v9 = vld [vmem:[%s6881_s3 + $0xb8] sm:$0xff] }
 0xd64   :  { %v5268_v22 = vpack.c.bf16 %v1519_v9, %v1518_v6 }
 0xd65   :  { %4866 = vmatmul.mubr.msk.f32.gmra.mrb[16].mxu1 %vm181_vm4, %v1266_v17 }
 0xd66   :  { %4901 = vmatprep.mubr.msk.f32.mxu1 %vm5726_vm1, %v5727_v12  ;;  %5269 = vmatpush3.bf16.msra.mxu1 %v5268_v22 }
 0xda1   :  { %v1444_v23 = vpop.f32.mrb[20].mxu0 }
 0xda2   :  { %v1454_v24 = vadd.f32 %v1444_v23, %v1265_v38  ;;  %v4889_v25 = vpop.f32.mrb[21].mxu0 }
 0xda4   :  { %v1461_v26 = vadd.f32 %v6127_v40, %v1454_v24 }
 0xda6   :  { %v1466_v27 = vsel %vm181_vm4, %v1461_v26, 0.0 }
 0xda7   :  { %1467 = vadd.xlane.f32.xlu1 %v1466_v27 }
 0xde8   :  { %v1483_v28 = vpop.xlane.xlu0 %1482 }
 0xde9   :  { %v1490_v30 = vmul.f32 0.03125, %v1483_v28 }
 0xdeb   :  { %v1493_v33 = vadd.f32 1e-05, %v1490_v30 }
 0xded   :  { %5602 = vrsqrt.f32 %v1493_v33 }
 0xdf7   :  { %v5603_v47 = vpop.eup %5602 }
 0xdf8   :  { %v1499_v36 = vmul.f32 %v5603_v47, %v1475_v14 }
 0xdfa   :  { %v1506_v41 = vmul.f32 %v6160_v1, %v1499_v36 }
 0xdfc   :  { %v6169_v43 = vadd.f32 %v6165_v37, %v1506_v41 }
 0xdfe   :  { %4902 = vmatmul.mubr.msk.f32.vlgmr.msra.gmra.mrb[18].mxu1 %vm181_vm4, %v6169_v43 }
 0xdff   :  { %4904 = vmatprep.mubr.msk.f32.mxu1 %vm5726_vm1, %v5727_v12 }
 0xe34   :  { %v1468_v39 = vpop.xlane.xlu1 %1467 }
 0xe35   :  { %v1473_v45 = vmul.f32 0.03125, %v1468_v39 }
 0xe37   :  { %v1476_v42 = vsub.f32 %v1461_v26, %v1473_v45 }
 0xe38   :  { %v1356_v29 = vpop.f32.mrb[16].mxu1 }
 0xe39   :  { %v1357_v38 = vadd.f32 %v6109_v35, %v1356_v29  ;;  %v4867_v46 = vpop.f32.mrb[17].mxu1  ;;  %v1479_v50 = vmul.f32 %v1476_v42, %v1476_v42 }
 0xe3b   :  { %v1362_v49 = vmax.f32 %v1357_v38, 0.0  ;;  %v1484_v0 = vsel %vm181_vm4, %v1479_v50, 0.0 }
 0xe3c   :  { %1485 = vadd.xlane.f32.xlu1 %v1484_v0 }
 0xe3d   :  { %4891 = vmatmul.mubr.msk.f32.gmra.mrb[22].mxu0 %vm1363_vm11, %v1362_v49 }
 0xec9   :  { %v1486_v51 = vpop.xlane.xlu1 %1485 }
 0xeca   :  { %v1491_v52 = vmul.f32 0.03125, %v1486_v51 }
 0xecc   :  { %v1494_v53 = vadd.f32 1e-05, %v1491_v52 }
 0xece   :  { %5604 = vrsqrt.f32 %v1494_v53 }
 0xed1   :  { %v1623_v55 = vpop.f32.mrb[18].mxu1 }
 0xed2   :  { %v1624_v35 = vadd.f32 %v6181_v54, %v1623_v55  ;;  %v4903_v57 = vpop.f32.mrb[19].mxu1 }
 0xed4   :  { %4914 = vmatprep.mubr.msk.f32.mxu0 %vm31_vm0, %v1624_v35 }
 0xed8   :  { %v5605_v58 = vpop.eup %5604 }
 0xed9   :  { %v1500_v34 = vmul.f32 %v5605_v58, %v1476_v42 }
 0xedb   :  { %v1507_v59 = vmul.f32 %v6160_v1, %v1500_v34 }
 0xedd   :  { %v6187_v31 = vadd.f32 %v6165_v37, %v1507_v59 }
 0xedf   :  { %4905 = vmatmul.mubr.msk.f32.gmra.mrb[20].mxu1 %vm181_vm4, %v6187_v31 }
 0xee0   :  { %4907 = vmatprep.mubr.msk.f32.mxu1 %vm5726_vm1, %v5727_v12 }
 0xf10   :  { %v1449_v60 = vpop.f32.mrb[22].mxu0 }
 0xf11   :  { %v1455_v61 = vadd.f32 %v1449_v60, %v1266_v17  ;;  %v4892_v62 = vpop.f32.mrb[23].mxu0 }
 0xf13   :  { %v1462_v63 = vadd.f32 %v6127_v40, %v1455_v61 }
 0xf15   :  { %v1469_v4 = vsel %vm1218_vm12, %v1462_v63, 0.0 }
 0xf16   :  { %1470 = vadd.xlane.f32.xlu1 %v1469_v4 }
 0xfa3   :  { %v1471_v8 = vpop.xlane.xlu1 %1470 }
 0xfa4   :  { %v1474_v10 = vmul.f32 0.03125, %v1471_v8 }
 0xfa6   :  { %v1477_v11 = vsub.f32 %v1462_v63, %v1474_v10 }
 0xfa8   :  { %v1480_v32 = vmul.f32 %v1477_v11, %v1477_v11 }
 0xfaa   :  { %v1487_v13 = vsel %vm1218_vm12, %v1480_v32, 0.0 }
 0xfab   :  { %1488 = vadd.xlane.f32.xlu1 %v1487_v13 }
 0xfb2   :  { %v1628_v14 = vpop.f32.mrb[20].mxu1 }
 0xfb3   :  { %v6197_v15 = vadd.f32 %v6181_v54, %v1628_v14  ;;  %v4906_v16 = vpop.f32.mrb[21].mxu1 }
 0xfb5   :  { %v6200_v3 = vpack.i.bf16 %v6197_v15, %v1624_v35 }
 0xfb7   :  { %5490 = vrot.lane.b32.xlu0 %v6200_v3, %s5730_s19 }
 0xfbc   :  { %5485 = vrot.lane.b32.xlu1 %v6200_v3, %s5729_s18 }
 0xfc0   :  { %1840 = vrot.lane.b32.xlu1 %v1624_v35, %s5728_s17 }
 0xfc4   :  { %1842 = vrot.lane.b32.xlu1 %v6197_v15, %s5728_s17 }
0x1029   :  { %v5491_v40 = vpop.permute.xlu0 %5490 }
0x102a   :  { %v5493_v44 = vunpack.i.h.bf16 %v5491_v40  ;;  %v5492_v2 = vunpack.i.l.bf16 %v5491_v40 }
0x102c   :  { %v5282_v17 = vpack.c.bf16 %v5493_v44, %v5492_v2 }
0x102e   :  { %5284 = vmatprep.subr.msk.bf16.mxu1 %vm5850_vm6, %v5282_v17 }
0x102f   :  { %5287 = vmatpush3.bf16.xpose.msk.msra.mxu1 %vm5850_vm6, %v5282_v17  ;;  %v2056_v17 = vrot.slane %v6197_v15, 2 }
0x1038   :  { %v1489_v18 = vpop.xlane.xlu1 %1488 }
0x1039   :  { %v1492_v19 = vmul.f32 0.03125, %v1489_v18 }
0x103b   :  { %v1495_v21 = vadd.f32 1e-05, %v1492_v19 }
0x103c   :  { %v5486_v6 = vpop.permute.xlu1 %5485 }
0x103d   :  { %5606 = vrsqrt.f32 %v1495_v21  ;;  %v5488_v9 = vunpack.i.h.bf16 %v5486_v6  ;;  %v5487_v22 = vunpack.i.l.bf16 %v5486_v6 }
0x103f   :  { %v5270_v23 = vpack.c.bf16 %v5488_v9, %v5487_v22 }
0x1040   :  { %v1841_v27 = vpop.permute.xlu1 %1840 }
0x1041   :  { %5272 = vmatprep.subr.msk.bf16.mxu0 %vm5850_vm6, %v5270_v23 }
0x1042   :  { %5275 = vmatpush3.bf16.xpose.msk.msra.mxu0 %vm5850_vm6, %v5270_v23 }
0x1044   :  { %v1843_v30 = vpop.permute.xlu1 %1842 }
0x1047   :  { %v5607_v24 = vpop.eup %5606 }
0x1048   :  { %v1501_v25 = vmul.f32 %v5607_v24, %v1477_v11 }
0x1049   :  { %4915 = vmatmul.mubr.msk.f32.vlgmr.msra.gmra.mrb[24].mxu0 %vm31_vm0, %v6197_v15 }
0x104a   :  { %v1508_v26 = vmul.f32 %v6160_v1, %v1501_v25 }
0x104c   :  { %v6221_v28 = vadd.f32 %v6165_v37, %v1508_v26 }
0x104e   :  { %4908 = vmatmul.mubr.msk.f32.gmra.mrb[22].mxu1 %vm181_vm4, %v6221_v28 }
0x104f   :  { %4928 = vmatprep.mubr.msk.f32.mxu1 %vm31_vm0, %v1841_v27 }
0x1052   :  { %4929 = vmatmul.mubr.msk.f32.vlgmr.msra.gmra.mrb[24].mxu1 %vm31_vm0, %v1843_v30 }
0x111c   :  { %v4916_v33 = vpop.f32.mrb[24].mxu0 }
0x111d   :  { %v1727_v47 = vmul.f32 0.25, %v4916_v33  ;;  %v1717_v36 = vpop.f32.mrb[25].mxu0 }
0x111e   :  { %v1726_v41 = vmul.f32 0.25, %v1717_v36 }
0x111f   :  { %v1729_v39 = vadd.f32 %v5868_v56, %v1727_v47 }
0x1120   :  { %v1728_v1 = vadd.f32 %v5868_v56, %v1726_v41 }
0x1121   :  { %v1633_v45 = vpop.f32.mrb[22].mxu1  ;;  %v1733_v37 = vsel %vm367_vm7, %v1729_v39, -inf }
0x1122   :  { %v4909_v42 = vpop.f32.mrb[23].mxu1  ;;  %1734 = vmax.xlane.f32.xlu0 %v1733_v37  ;;  %v1730_v29 = vsel %vm363_vm8, %v1728_v1, -inf  ;;  %v1634_v44 = vadd.f32 %v6181_v54, %v1633_v45 }
0x1123   :  { %1731 = vmax.xlane.f32.xlu1 %v1730_v29 }
0x1124   :  { %v2057_v2 = vrot.slane %v1634_v44, 2 }
0x1125   :  { %v4930_v38 = vpop.f32.mrb[24].mxu1 }
0x1126   :  { %v1922_v46 = vpop.f32.mrb[25].mxu1  ;;  %v1932_v50 = vmul.f32 0.25, %v4930_v38  ;;  %v2058_v18 = vsel %vm118_vm2, %v2056_v17, %v2057_v2 }
0x1127   :  { %v1931_v49 = vmul.f32 0.25, %v1922_v46  ;;  %v6246_v19 = vpack.i.bf16 %v2057_v2, %v2058_v18 }
0x1128   :  { %v1934_v52 = vadd.f32 %v5868_v56, %v1932_v50 }
0x1129   :  { %v1933_v0 = vadd.f32 %v5868_v56, %v1931_v49 }
0x112a   :  { %v1938_v53 = vsel %vm367_vm7, %v1934_v52, -inf }
0x112b   :  { %v1935_v51 = vsel %vm363_vm8, %v1933_v0, -inf }
0x112c   :  { %1936 = vmax.xlane.f32.xlu1 %v1935_v51 }
0x1130   :  { %1939 = vmax.xlane.f32.xlu1 %v1938_v53 }
0x11af   :  { %v1735_v55 = vpop.xlane.xlu0 %1734 }
0x11b0   :  { %v1737_v35 = vsub.f32 %v1729_v39, %v1735_v55  ;;  %v1732_v57 = vpop.xlane.xlu1 %1731 }
0x11b1   :  { %v1736_v58 = vsub.f32 %v1728_v1, %v1732_v57 }
0x11b2   :  { %v1740_v34 = vmul.f32 1.442695, %v1737_v35 }
0x11b3   :  { %v1738_v59 = vmul.f32 1.442695, %v1736_v58 }
0x11b4   :  { %5608 = vpow2.f32 %v1740_v34 }
0x11b5   :  { %5610 = vpow2.f32 %v1738_v59 }
0x11b9   :  { %v1937_v60 = vpop.xlane.xlu1 %1936 }
0x11ba   :  { %v1941_v61 = vsub.f32 %v1933_v0, %v1937_v60 }
0x11bc   :  { %v1943_v62 = vmul.f32 1.442695, %v1941_v61 }
0x11bd   :  { %v1940_v63 = vpop.xlane.xlu1 %1939 }
0x11be   :  { %v5609_v4 = vpop.eup %5608  ;;  %5612 = vpow2.f32 %v1943_v62  ;;  %v1942_v8 = vsub.f32 %v1934_v52, %v1940_v63 }
0x11bf   :  { %v5611_v56 = vpop.eup %5610  ;;  %v1745_v10 = vsel %vm367_vm7, %v5609_v4, 0.0 }
0x11c0   :  { %v1945_v11 = vmul.f32 1.442695, %v1942_v8  ;;  %1746 = vadd.xlane.f32.xlu1 %v1745_v10  ;;  %v1742_v32 = vsel %vm363_vm8, %v5611_v56, 0.0 }
0x11c1   :  { %1743 = vadd.xlane.f32.xlu0 %v1742_v32 }
0x11c2   :  { %5614 = vpow2.f32 %v1945_v11 }
0x11c8   :  { %v5613_v13 = vpop.eup %5612 }
0x11c9   :  { %v1947_v14 = vsel %vm363_vm8, %v5613_v13, 0.0 }
0x11ca   :  { %1948 = vadd.xlane.f32.xlu0 %v1947_v14 }
0x11cc   :  { %v5615_v16 = vpop.eup %5614 }
0x11cd   :  { %v1950_v40 = vsel %vm367_vm7, %v5615_v16, 0.0 }
0x11ce   :  { %1951 = vadd.xlane.f32.xlu1 %v1950_v40 }
0x11df   :  { %5500 = vrot.lane.b32.xlu1 %v6200_v3, %s5733_s23 }
0x11e0   :  { %5495 = vrot.lane.b32.xlu0 %v6200_v3, %s5731_s22 }
0x11e3   :  { %5505 = vrot.lane.b32.xlu1 %v6246_v19, %s5729_s18 }
0x124d   :  { %v1747_v6 = vpop.xlane.xlu1 %1746 }
0x124e   :  { %v1744_v21 = vpop.xlane.xlu0 %1743 }
0x124f   :  { %5616 = vrcp.f32 %v1744_v21 }
0x1250   :  { %5618 = vrcp.f32 %v1747_v6 }
0x1257   :  { %v1949_v54 = vpop.xlane.xlu0 %1948 }
0x1258   :  { %5620 = vrcp.f32 %v1949_v54 }
0x1259   :  { %v5617_v15 = vpop.eup %5616 }
0x125a   :  { %v1750_v9 = vmul.f32 %v5617_v15, %v5611_v56  ;;  %v5619_v26 = vpop.eup %5618 }
0x125b   :  { %v5496_v22 = vpop.permute.xlu0 %5495  ;;  %v1952_v23 = vpop.xlane.xlu1 %1951  ;;  %v1751_v36 = vmul.f32 %v5619_v26, %v5609_v4 }
0x125c   :  { %v5498_v24 = vunpack.i.h.bf16 %v5496_v22  ;;  %v5497_v25 = vunpack.i.l.bf16 %v5496_v22  ;;  %5622 = vrcp.f32 %v1952_v23  ;;  %4921 = vmatprep.mubr.msk.f32.mxu0 %vm363_vm8, %v1750_v9 }
0x125e   :  { %v5276_v3 = vpack.c.bf16 %v5498_v24, %v5497_v25 }
0x125f   :  { %v5501_v27 = vpop.permute.xlu1 %5500 }
0x1260   :  { %v5503_v30 = vunpack.i.h.bf16 %v5501_v27  ;;  %v5502_v33 = vunpack.i.l.bf16 %v5501_v27  ;;  %5278 = vmatprep.subr.msk.bf16.mxu0 %vm5881_vm10, %v5276_v3 }
0x1261   :  { %5281 = vmatpush3.bf16.msk.msra.mxu0 %vm5881_vm10, %v5276_v3 }
0x1262   :  { %v5621_v47 = vpop.eup %5620  ;;  %v5288_v41 = vpack.c.bf16 %v5503_v30, %v5502_v33  ;;  %v6310_v30 = vld [vmem:[%s6879_s1 + $0x1] ss:$0 sm:$0xff] }
0x1263   :  { %v5506_v39 = vpop.permute.xlu1 %5505  ;;  %v1955_v1 = vmul.f32 %v5621_v47, %v5613_v13 }
0x1264   :  { %v5508_v45 = vunpack.i.h.bf16 %v5506_v39  ;;  %v5507_v37 = vunpack.i.l.bf16 %v5506_v39  ;;  %4922 = vmatmul.mubr.msk.f32.vlgmr.msra.gmra.mrb[26].mxu0 %vm363_vm8, %v1751_v36  ;;  %5290 = vmatprep.subr.msk.bf16.mxu0 %vm5881_vm10, %v5288_v41 }
0x1265   :  { %5293 = vmatpush3.bf16.msk.msra.mxu0 %vm5881_vm10, %v5288_v41  ;;  %4935 = vmatprep.mubr.msk.f32.mxu0 %vm363_vm8, %v1955_v1 }
0x1266   :  { %v5623_v42 = vpop.eup %5622  ;;  %v5294_v29 = vpack.c.bf16 %v5508_v45, %v5507_v37 }
0x1267   :  { %v1956_v38 = vmul.f32 %v5623_v42, %v5615_v16 }
0x1268   :  { %5296 = vmatprep.subr.msk.bf16.mxu0 %vm5850_vm6, %v5294_v29 }
0x1269   :  { %4936 = vmatmul.mubr.msk.f32.vlgmr.msra.gmra.mrb[28].mxu0 %vm363_vm8, %v1956_v38 }
0x126a   :  { %4942 = vmatprep.mubr.msk.f32.mxu0 %vm31_vm0, %v2058_v18 }
0x126e   :  { %5299 = vmatpush3.bf16.xpose.msk.msra.mxu0 %vm5850_vm6, %v5294_v29 }
0x1275   :  { %4943 = vmatmul.mubr.msk.f32.vlgmr.msra.gmra.mrb[30].mxu0 %vm31_vm0, %v2057_v2 }
0x1337   :  { %v6268_v46 = vpop.f32.mrb[26].mxu0 }
0x1338   :  { %v6270_v50 = vpop.f32.mrb[27].mxu0 }
0x133c   :  { %v6272_v49 = vpop.f32.mrb[28].mxu0 }
0x133d   :  { %v6274_v0 = vpop.f32.mrb[29].mxu0 }
0x1348   :  { %v4944_v51 = vpop.f32.mrb[30].mxu0 }
0x1349   :  { %v2147_v52 = vmul.f32 0.25, %v4944_v51  ;;  %v2137_v53 = vpop.f32.mrb[31].mxu0 }
0x134a   :  { %v2146_v55 = vmul.f32 0.25, %v2137_v53 }
0x134b   :  { %v2149_v35 = vadd.f32 %v5936_v5, %v2147_v52 }
0x134c   :  { %v2148_v57 = vadd.f32 %v5936_v5, %v2146_v55 }
0x134d   :  { %v2153_v58 = vsel %vm367_vm7, %v2149_v35, -inf }
0x134e   :  { %2154 = vmax.xlane.f32.xlu0 %v2153_v58  ;;  %v2150_v34 = vsel %vm363_vm8, %v2148_v57, -inf }
0x134f   :  { %2151 = vmax.xlane.f32.xlu1 %v2150_v34 }
0x1360   :  { %5510 = vrot.lane.b32.xlu1 %v6246_v19, %s5731_s22 }
0x1364   :  { %2260 = vrot.lane.b32.xlu1 %v2058_v18, %s5728_s17 }
0x1368   :  { %2262 = vrot.lane.b32.xlu1 %v2057_v2, %s5728_s17 }
0x13db   :  { %v2155_v59 = vpop.xlane.xlu0 %2154 }
0x13dc   :  { %v2157_v60 = vsub.f32 %v2149_v35, %v2155_v59  ;;  %v2152_v61 = vpop.xlane.xlu1 %2151 }
0x13dd   :  { %v2156_v62 = vsub.f32 %v2148_v57, %v2152_v61  ;;  %v1520_v61 = vld [vmem:[%s6881_s3 + $0xc0] sm:$0xff] }
0x13de   :  { %v2160_v63 = vmul.f32 1.442695, %v2157_v60 }
0x13df   :  { %v2158_v4 = vmul.f32 1.442695, %v2156_v62  ;;  %v1521_v62 = vld [vmem:[%s6881_s3 + $0xc8] sm:$0xff] }
0x13e0   :  { %5624 = vpow2.f32 %v2160_v63  ;;  %v5511_v5 = vpop.permute.xlu1 %5510 }
0x13e1   :  { %v5513_v8 = vunpack.i.h.bf16 %v5511_v5  ;;  %v5512_v56 = vunpack.i.l.bf16 %v5511_v5  ;;  %5626 = vpow2.f32 %v2158_v4  ;;  %v5319_v4 = vpack.c.bf16 %v1521_v62, %v1520_v61  ;;  %v1532_v61 = vld [vmem:[%s6881_s3 + $0x120] sm:$0xff]  ;;  %v1533_v62 = vld [vmem:[%s6881_s3 + $0x128] sm:$0xff] }
0x13e3   :  { %v5300_v10 = vpack.c.bf16 %v5513_v8, %v5512_v56  ;;  %v1523_v8 = vld [vmem:[%s6881_s3 + $0xd8] sm:$0xff] }
0x13e4   :  { %v2261_v9 = vpop.permute.xlu1 %2260 }
0x13e5   :  { %5302 = vmatprep.subr.msk.bf16.mxu1 %vm5881_vm10, %v5300_v10 }
0x13e6   :  { %5305 = vmatpush3.bf16.msk.msra.mxu1 %vm5881_vm10, %v5300_v10 }
0x13e8   :  { %v2263_v22 = vpop.permute.xlu1 %2262 }
0x13ea   :  { %v5625_v11 = vpop.eup %5624 }
0x13eb   :  { %v2165_v32 = vsel %vm367_vm7, %v5625_v11, 0.0  ;;  %v5627_v13 = vpop.eup %5626 }
0x13ec   :  { %2166 = vadd.xlane.f32.xlu0 %v2165_v32  ;;  %v2162_v14 = vsel %vm363_vm8, %v5627_v13, 0.0 }
0x13f0   :  { %2163 = vadd.xlane.f32.xlu0 %v2162_v14 }
0x1406   :  { %5515 = vrot.lane.b32.xlu0 %v6246_v19, %s5730_s19 }
0x1479   :  { %v2167_v16 = vpop.xlane.xlu0 %2166 }
0x147a   :  { %5628 = vrcp.f32 %v2167_v16 }
0x147d   :  { %v2164_v40 = vpop.xlane.xlu0 %2163 }
0x147e   :  { %5630 = vrcp.f32 %v2164_v40  ;;  %v6356_v40 = vld [vmem:[%s6882_s4 + $0x9] ss:$0 sm:$0xff] }
0x1481   :  { %v5516_v44 = vpop.permute.xlu0 %5515 }
0x1482   :  { %v5518_v2 = vunpack.i.h.bf16 %v5516_v44  ;;  %v5517_v17 = vunpack.i.l.bf16 %v5516_v44 }
0x1484   :  { %v5306_v18 = vpack.c.bf16 %v5518_v2, %v5517_v17  ;;  %v5629_v21 = vpop.eup %5628 }
0x1485   :  { %v2171_v15 = vmul.f32 %v5629_v21, %v5625_v11 }
0x1486   :  { %5308 = vmatprep.subr.msk.bf16.mxu1 %vm5850_vm6, %v5306_v18 }
0x1488   :  { %v5631_v6 = vpop.eup %5630 }
0x1489   :  { %v2170_v54 = vmul.f32 %v5631_v6, %v5627_v13 }
0x148b   :  { %4949 = vmatprep.mubr.msk.f32.mxu1 %vm363_vm8, %v2170_v54 }
0x148c   :  { %4950 = vmatmul.mubr.msk.f32.vlgmr.msra.gmra.mrb[26].mxu1 %vm363_vm8, %v2171_v15 }
0x148d   :  { %5311 = vmatpush3.bf16.xpose.msk.msra.mxu1 %vm5850_vm6, %v5306_v18  ;;  %4956 = vmatprep.mubr.msk.f32.mxu1 %vm31_vm0, %v2261_v9 }
0x148e   :  { %5324 = vmatprep.subr.bf16.mxu1 %v5725_v7 }
0x1494   :  { %4957 = vmatmul.mubr.msk.f32.vlgmr.msra.gmra.mrb[28].mxu1 %vm31_vm0, %v2263_v22 }
0x1495   :  { %4991 = vmatprep.mubr.msk.f32.mxu1 %vm5726_vm1, %v5727_v12 }
0x155f   :  { %v6303_v23 = vpop.f32.mrb[26].mxu1 }
0x1560   :  { %v6305_v24 = vpop.f32.mrb[27].mxu1 }
0x1567   :  { %v4958_v25 = vpop.f32.mrb[28].mxu1 }
0x1568   :  { %v2352_v3 = vmul.f32 0.25, %v4958_v25  ;;  %v2342_v26 = vpop.f32.mrb[29].mxu1 }
0x1569   :  { %v2351_v27 = vmul.f32 0.25, %v2342_v26 }
0x156a   :  { %v2354_v33 = vadd.f32 %v6310_v30, %v2352_v3  ;;  %v1525_v3 = vld [vmem:[%s6881_s3 + $0xe8] sm:$0xff] }
0x156b   :  { %v2353_v47 = vadd.f32 %v6310_v30, %v2351_v27  ;;  %v1526_v27 = vld [vmem:[%s6881_s3 + $0xf0] sm:$0xff] }
0x156c   :  { %v2358_v36 = vsel %vm367_vm7, %v2354_v33, -inf }
0x156d   :  { %2359 = vmax.xlane.f32.xlu0 %v2358_v36  ;;  %v2355_v41 = vsel %vm363_vm8, %v2353_v47, -inf }
0x156e   :  { %2356 = vmax.xlane.f32.xlu1 %v2355_v41 }
0x157f   :  { %5520 = vrot.lane.b32.xlu1 %v6246_v19, %s5733_s23 }
0x15fa   :  { %v2360_v39 = vpop.xlane.xlu0 %2359 }
0x15fb   :  { %v2362_v1 = vsub.f32 %v2354_v33, %v2360_v39  ;;  %v2357_v45 = vpop.xlane.xlu1 %2356  ;;  %v1527_v33 = vld [vmem:[%s6881_s3 + $0xf8] sm:$0xff] }
0x15fc   :  { %v2361_v37 = vsub.f32 %v2353_v47, %v2357_v45  ;;  %v5328_v47 = vpack.c.bf16 %v1527_v33, %v1526_v27 }
0x15fd   :  { %v2365_v42 = vmul.f32 1.442695, %v2362_v1 }
0x15fe   :  { %v2363_v29 = vmul.f32 1.442695, %v2361_v37 }
0x15ff   :  { %v5521_v38 = vpop.permute.xlu1 %5520 }
0x1600   :  { %5632 = vpow2.f32 %v2363_v29  ;;  %v5523_v51 = vunpack.i.h.bf16 %v5521_v38  ;;  %v5522_v52 = vunpack.i.l.bf16 %v5521_v38 }
0x1601   :  { %5634 = vpow2.f32 %v2365_v42 }
0x1602   :  { %v5312_v53 = vpack.c.bf16 %v5523_v51, %v5522_v52  ;;  %v6395_v51 = vld [vmem:[%s6882_s4 + $0xc] ss:$0 sm:$0xff] }
0x1604   :  { %5314 = vmatprep.subr.msk.bf16.mxu0 %vm5881_vm10, %v5312_v53 }
0x1605   :  { %5317 = vmatpush3.bf16.msk.msra.mxu0 %vm5881_vm10, %v5312_v53  ;;  %v6400_v53 = vld [vmem:[%s6882_s4 + $0xd] ss:$0 sm:$0xff] }
0x1606   :  { %5318 = vmatprep.subr.bf16.mxu0 %v5725_v7 }
0x160a   :  { %v5633_v19 = vpop.eup %5632 }
0x160b   :  { %v2367_v55 = vsel %vm363_vm8, %v5633_v19, 0.0  ;;  %v5635_v35 = vpop.eup %5634 }
0x160c   :  { %2368 = vadd.xlane.f32.xlu0 %v2367_v55  ;;  %v2370_v57 = vsel %vm367_vm7, %v5635_v35, 0.0 }
0x1610   :  { %2371 = vadd.xlane.f32.xlu0 %v2370_v57  ;;  %v1529_v57 = vld [vmem:[%s6881_s3 + $0x108] sm:$0xff] }
0x1626   :  { %2047 = vrot.lane.b32.xlu0 %v6274_v0, %s5734_s26  ;;  %v1522_v0 = vld [vmem:[%s6881_s3 + $0xd0] sm:$0xff] }
0x1627   :  { %v5322_v56 = vpack.c.bf16 %v1523_v8, %v1522_v0 }
0x1699   :  { %v2369_v58 = vpop.xlane.xlu0 %2368 }
0x169a   :  { %5636 = vrcp.f32 %v2369_v58  ;;  %v1530_v58 = vld [vmem:[%s6881_s3 + $0x110] sm:$0xff] }
0x169d   :  { %v2372_v34 = vpop.xlane.xlu0 %2371 }
0x169e   :  { %5638 = vrcp.f32 %v2372_v34 }
0x16a1   :  { %v2048_v10 = vpop.permute.xlu0 %2047 }
0x16a2   :  { %v2053_v11 = vsel %vm31_vm0, %v6270_v50, %v2048_v10 }
0x16a4   :  { %v5637_v59 = vpop.eup %5636 }
0x16a5   :  { %v2375_v60 = vmul.f32 %v5637_v59, %v5633_v19  ;;  %v1531_v59 = vld [vmem:[%s6881_s3 + $0x118] sm:$0xff] }
0x16a7   :  { %4963 = vmatprep.mubr.msk.f32.mxu0 %vm363_vm8, %v2375_v60  ;;  %v5334_v60 = vpack.c.bf16 %v1531_v59, %v1530_v58 }
0x16a8   :  { %v5639_v63 = vpop.eup %5638 }
0x16a9   :  { %v2376_v5 = vmul.f32 %v5639_v63, %v5635_v35  ;;  %v1528_v35 = vld [vmem:[%s6881_s3 + $0x100] sm:$0xff]  ;;  %v5337_v63 = vpack.c.bf16 %v1533_v62, %v1532_v61 }
0x16aa   :  { %v5331_v34 = vpack.c.bf16 %v1529_v57, %v1528_v35 }
0x16ab   :  { %4964 = vmatmul.mubr.msk.f32.vlgmr.msra.gmra.mrb[32].mxu0 %vm363_vm8, %v2376_v5  ;;  %v1535_v5 = vld [vmem:[%s6881_s3 + $0x138] sm:$0xff] }
0x16ac   :  { %5320 = vmatpush3.bf16.msra.mxu0 %v5319_v4  ;;  %4974 = vmatprep.mubr.msk.f32.mxu0 %vm5726_vm1, %v5727_v12  ;;  %v1534_v4 = vld [vmem:[%s6881_s3 + $0x130] sm:$0xff] }
0x16ad   :  { %5321 = vmatprep.subr.bf16.mxu0 %v5725_v7  ;;  %v5340_v0 = vpack.c.bf16 %v1535_v5, %v1534_v4 }
0x16b0   :  { %5323 = vmatpush3.bf16.msra.mxu0 %v5322_v56 }
0x16b1   :  { %5330 = vmatprep.subr.bf16.mxu0 %v5725_v7 }
0x16b3   :  { %4975 = vmatmul.mubr.msk.f32.vlgmr.msra.gmra.mrb[34].mxu0 %vm181_vm4, %v2053_v11 }
0x16b4   :  { %4977 = vmatprep.mubr.msk.f32.mxu0 %vm5726_vm1, %v5727_v12  ;;  %5332 = vmatpush3.bf16.msra.mxu0 %v5331_v34 }
0x16b5   :  { %5333 = vmatprep.subr.bf16.mxu0 %v5725_v7 }
0x16b8   :  { %5335 = vmatpush3.bf16.msra.mxu0 %v5334_v60 }
0x16b9   :  { %5336 = vmatprep.subr.bf16.mxu0 %v5725_v7 }
0x16bc   :  { %5338 = vmatpush3.bf16.msra.mxu0 %v5337_v63 }
0x16bd   :  { %5339 = vmatprep.subr.bf16.mxu0 %v5725_v7 }
0x16c0   :  { %5341 = vmatpush3.bf16.msra.mxu0 %v5340_v0  ;;  %v2890_v0 = vld [vmem:[%s6881_s3 + $0x1e0] sm:$0xff] }
0x16c1   :  { %5354 = vmatprep.subr.bf16.mxu0 %v5725_v7 }
0x177e   :  { %v4965_v32 = vpop.f32.mrb[32].mxu0 }
0x177f   :  { %v2456_v13 = vpop.f32.mrb[33].mxu0 }
0x1780   :  { %2467 = vrot.lane.b32.xlu1 %v2456_v13, %s5734_s26 }
0x1784   :  { %2049 = vrot.lane.b32.xlu1 %v6272_v49, %s5734_s26 }
0x1786   :  { %v2560_v14 = vpop.f32.mrb[34].mxu0 }
0x1787   :  { %v4976_v16 = vpop.f32.mrb[35].mxu0  ;;  %v2561_v50 = vadd.f32 %v6356_v40, %v2560_v14 }
0x1789   :  { %v2574_v44 = vadd.f32 %v2561_v50, %v6169_v43 }
0x178b   :  { %v2577_v2 = vsel %vm181_vm4, %v2574_v44, 0.0 }
0x17a8   :  { %2578 = vadd.xlane.f32.xlu1 %v2577_v2 }
0x17f2   :  { %v2468_v17 = vpop.permute.xlu1 %2467 }
0x17f3   :  { %v6363_v18 = vsel %vm31_vm0, %v6305_v24, %v2468_v17 }
0x17f4   :  { %v2477_v49 = vrot.slane %v6363_v18, 6 }
0x17f6   :  { %v2050_v21 = vpop.permute.xlu1 %2049 }
0x17f7   :  { %v2054_v6 = vsel %vm31_vm0, %v6268_v46, %v2050_v21  ;;  %v1524_v46 = vld [vmem:[%s6881_s3 + $0xe0] sm:$0xff] }
0x17f8   :  { %v2481_v54 = vsel %vm134_vm3, %v2054_v6, %v2477_v49  ;;  %v5325_v26 = vpack.c.bf16 %v1525_v3, %v1524_v46 }
0x17f9   :  { %4978 = vmatmul.mubr.msk.f32.gmra.mrb[36].mxu0 %vm181_vm4, %v2481_v54 }
0x17fa   :  { %4980 = vmatprep.mubr.msk.f32.mxu0 %vm5726_vm1, %v5727_v12  ;;  %5326 = vmatpush3.bf16.msra.mxu1 %v5325_v26 }
0x17fb   :  { %5327 = vmatprep.subr.bf16.mxu1 %v5725_v7 }
0x17fe   :  { %5329 = vmatpush3.bf16.msra.mxu1 %v5328_v47 }
0x17ff   :  { %5342 = vmatprep.subr.bf16.mxu1 %v5725_v7 }
0x1835   :  { %v2579_v15 = vpop.xlane.xlu1 %2578 }
0x1836   :  { %v2586_v9 = vmul.f32 0.03125, %v2579_v15 }
0x1838   :  { %v2589_v22 = vsub.f32 %v2574_v44, %v2586_v9  ;;  %v6451_v44 = vld [vmem:[%s6882_s4 + $0xa] ss:$0 sm:$0xff] }
0x183a   :  { %v2592_v24 = vmul.f32 %v2589_v22, %v2589_v22 }
0x183c   :  { %v2595_v25 = vsel %vm181_vm4, %v2592_v24, 0.0 }
0x183d   :  { %2596 = vadd.xlane.f32.xlu1 %v2595_v25 }
0x18ca   :  { %v2597_v36 = vpop.xlane.xlu1 %2596 }
0x18cb   :  { %v2604_v41 = vmul.f32 0.03125, %v2597_v36 }
0x18cc   :  { %v2565_v39 = vpop.f32.mrb[36].mxu0 }
0x18cd   :  { %v2607_v1 = vadd.f32 1e-05, %v2604_v41  ;;  %v2566_v45 = vadd.f32 %v6356_v40, %v2565_v39  ;;  %v4979_v37 = vpop.f32.mrb[37].mxu0 }
0x18cf   :  { %5640 = vrsqrt.f32 %v2607_v1  ;;  %v2575_v42 = vadd.f32 %v2566_v45, %v6187_v31  ;;  %v6472_v1 = vld [vmem:[%s6882_s4 + $0xb] ss:$0 sm:$0xff] }
0x18d1   :  { %v2580_v29 = vsel %vm181_vm4, %v2575_v42, 0.0 }
0x18d2   :  { %2581 = vadd.xlane.f32.xlu0 %v2580_v29 }
0x18d9   :  { %v5641_v38 = vpop.eup %5640 }
0x18da   :  { %v2613_v52 = vmul.f32 %v5641_v38, %v2589_v22 }
0x18dc   :  { %v2620_v19 = vmul.f32 %v6395_v51, %v2613_v52 }
0x18de   :  { %v6404_v55 = vadd.f32 %v6400_v53, %v2620_v19 }
0x18e0   :  { %4992 = vmatmul.mubr.msk.f32.vlgmr.msra.gmra.mrb[30].mxu1 %vm181_vm4, %v6404_v55 }
0x18e1   :  { %4994 = vmatprep.mubr.msk.f32.mxu1 %vm5726_vm1, %v5727_v12 }
0x18e8   :  { %2469 = vrot.lane.b32.xlu0 %v4965_v32, %s5734_s26 }
0x195f   :  { %v2582_v8 = vpop.xlane.xlu0 %2581 }
0x1960   :  { %v2587_v56 = vmul.f32 0.03125, %v2582_v8  ;;  %v2892_v8 = vld [vmem:[%s6881_s3 + $0x1f0] sm:$0xff] }
0x1962   :  { %v2590_v10 = vsub.f32 %v2575_v42, %v2587_v56 }
0x1963   :  { %v2470_v11 = vpop.permute.xlu0 %2469 }
0x1964   :  { %v2474_v32 = vsel %vm31_vm0, %v6303_v23, %v2470_v11  ;;  %v2593_v13 = vmul.f32 %v2590_v10, %v2590_v10  ;;  %v2895_v11 = vld [vmem:[%s6881_s3 + $0x208] sm:$0xff] }
0x1965   :  { %v2478_v14 = vrot.slane %v2474_v32, 6 }
0x1966   :  { %v2598_v16 = vsel %vm181_vm4, %v2593_v13, 0.0  ;;  %v2896_v13 = vld [vmem:[%s6881_s3 + $0x210] sm:$0xff] }
0x1967   :  { %2599 = vadd.xlane.f32.xlu1 %v2598_v16  ;;  %v2479_v50 = vsel %vm134_vm3, %v2477_v49, %v2478_v14  ;;  %v2897_v14 = vld [vmem:[%s6881_s3 + $0x218] sm:$0xff] }
0x1968   :  { %4981 = vmatmul.mubr.msk.f32.gmra.mrb[38].mxu0 %vm181_vm4, %v2479_v50  ;;  %v5352_v16 = vpack.c.bf16 %v2897_v14, %v2896_v13 }
0x1969   :  { %5016 = vmatprep.mubr.msk.f32.mxu0 %vm5726_vm1, %v5727_v12 }
0x19b3   :  { %v2709_v23 = vpop.f32.mrb[30].mxu1 }
0x19b4   :  { %v2710_v2 = vadd.f32 %v6451_v44, %v2709_v23  ;;  %v4993_v17 = vpop.f32.mrb[31].mxu1 }
0x19b6   :  { %v2723_v21 = vmax.f32 %v2710_v2, 0.0 }
0x19b8   :  { %5017 = vmatmul.mubr.msk.f32.vlgmr.msra.gmra.mrb[40].mxu0 %vm1363_vm11, %v2723_v21 }
0x19b9   :  { %5019 = vmatprep.mubr.msk.f32.mxu0 %vm5726_vm1, %v5727_v12 }
0x19f4   :  { %v2600_v18 = vpop.xlane.xlu1 %2599 }
0x19f5   :  { %v2605_v49 = vmul.f32 0.03125, %v2600_v18 }
0x19f7   :  { %v2608_v6 = vadd.f32 1e-05, %v2605_v49 }
0x19f9   :  { %5642 = vrsqrt.f32 %v2608_v6 }
0x1a03   :  { %v5643_v54 = vpop.eup %5642 }
0x1a04   :  { %v2614_v15 = vmul.f32 %v5643_v54, %v2590_v10  ;;  %v2894_v10 = vld [vmem:[%s6881_s3 + $0x200] sm:$0xff] }
0x1a05   :  { %v5349_v32 = vpack.c.bf16 %v2895_v11, %v2894_v10 }
0x1a06   :  { %v2621_v9 = vmul.f32 %v6395_v51, %v2614_v15  ;;  %v6525_v15 = vld [vmem:[%s6882_s4 + $0xe] ss:$0 sm:$0xff] }
0x1a08   :  { %v6459_v22 = vadd.f32 %v6400_v53, %v2621_v9 }
0x1a0a   :  { %4995 = vmatmul.mubr.msk.f32.gmra.mrb[32].mxu1 %vm181_vm4, %v6459_v22 }
0x1a0b   :  { %4997 = vmatprep.mubr.msk.f32.mxu1 %vm5726_vm1, %v5727_v12 }
0x1a3b   :  { %v2570_v24 = vpop.f32.mrb[38].mxu0 }
0x1a3c   :  { %v2571_v25 = vadd.f32 %v6356_v40, %v2570_v24  ;;  %v4982_v46 = vpop.f32.mrb[39].mxu0 }
0x1a3e   :  { %v2576_v3 = vadd.f32 %v2571_v25, %v6221_v28 }
0x1a40   :  { %v2583_v26 = vsel %vm1218_vm12, %v2576_v3, 0.0 }
0x1a41   :  { %2584 = vadd.xlane.f32.xlu1 %v2583_v26 }
0x1a8b   :  { %v2801_v27 = vpop.f32.mrb[40].mxu0 }
0x1a8c   :  { %v5018_v33 = vpop.f32.mrb[41].mxu0  ;;  %v2815_v41 = vadd.f32 %v2801_v27, %v6404_v55 }
0x1a8e   :  { %v2822_v37 = vadd.f32 %v6472_v1, %v2815_v41 }
0x1a90   :  { %v2825_v42 = vsel %vm181_vm4, %v2822_v37, 0.0 }
0x1ace   :  { %v2585_v47 = vpop.xlane.xlu1 %2584 }
0x1acf   :  { %v2588_v36 = vmul.f32 0.03125, %v2585_v47 }
0x1ad1   :  { %v2591_v39 = vsub.f32 %v2576_v3, %v2588_v36 }
0x1ad3   :  { %v2594_v45 = vmul.f32 %v2591_v39, %v2591_v39 }
0x1ad5   :  { %v2601_v40 = vsel %vm1218_vm12, %v2594_v45, 0.0 }
0x1ad6   :  { %2602 = vadd.xlane.f32.xlu1 %v2601_v40 }
0x1ada   :  { %2826 = vadd.xlane.f32.xlu1 %v2825_v42  ;;  %v2993_v42 = vld [vmem:[%s6881_s3 + $0x148] sm:$0xff] }
0x1add   :  { %v2714_v29 = vpop.f32.mrb[32].mxu1 }
0x1ade   :  { %v2715_v38 = vadd.f32 %v6451_v44, %v2714_v29  ;;  %v4996_v52 = vpop.f32.mrb[33].mxu1  ;;  %v2994_v29 = vld [vmem:[%s6881_s3 + $0x150] sm:$0xff] }
0x1ae0   :  { %v2724_v19 = vmax.f32 %v2715_v38, 0.0  ;;  %v2995_v38 = vld [vmem:[%s6881_s3 + $0x158] sm:$0xff] }
0x1ae1   :  { %v5358_v52 = vpack.c.bf16 %v2995_v38, %v2994_v29 }
0x1ae2   :  { %5020 = vmatmul.mubr.msk.f32.gmra.mrb[42].mxu0 %vm1363_vm11, %v2724_v19 }
0x1ae3   :  { %5022 = vmatprep.mubr.msk.f32.mxu0 %vm5726_vm1, %v5727_v12 }
0x1b63   :  { %v2603_v55 = vpop.xlane.xlu1 %2602 }
0x1b64   :  { %v2606_v35 = vmul.f32 0.03125, %v2603_v55 }
0x1b66   :  { %v2609_v57 = vadd.f32 1e-05, %v2606_v35 }
0x1b67   :  { %v2827_v58 = vpop.xlane.xlu1 %2826 }
0x1b68   :  { %5644 = vrsqrt.f32 %v2609_v57  ;;  %v2834_v34 = vmul.f32 0.03125, %v2827_v58 }
0x1b6a   :  { %v2837_v59 = vsub.f32 %v2822_v37, %v2834_v34  ;;  %v2992_v37 = vld [vmem:[%s6881_s3 + $0x140] sm:$0xff] }
0x1b6c   :  { %v2840_v60 = vmul.f32 %v2837_v59, %v2837_v59 }
0x1b6e   :  { %v2843_v61 = vsel %vm181_vm4, %v2840_v60, 0.0 }
0x1b6f   :  { %2844 = vadd.xlane.f32.xlu1 %v2843_v61 }
0x1b72   :  { %v5645_v62 = vpop.eup %5644 }
0x1b73   :  { %v2615_v63 = vmul.f32 %v5645_v62, %v2591_v39 }
0x1b75   :  { %v2622_v4 = vmul.f32 %v6395_v51, %v2615_v63  ;;  %v2891_v51 = vld [vmem:[%s6881_s3 + $0x1e8] sm:$0xff] }
0x1b77   :  { %v6484_v5 = vadd.f32 %v6400_v53, %v2622_v4  ;;  %v5343_v53 = vpack.c.bf16 %v2891_v51, %v2890_v0 }
0x1b79   :  { %4998 = vmatmul.mubr.msk.f32.gmra.mrb[34].mxu1 %vm181_vm4, %v6484_v5 }
0x1b7a   :  { %5041 = vmatprep.mubr.msk.f32.mxu1 %vm5726_vm1, %v5727_v12  ;;  %5344 = vmatpush3.bf16.msra.mxu1 %v5343_v53 }
0x1b7b   :  { %5345 = vmatprep.subr.bf16.mxu1 %v5725_v7 }
0x1b80   :  { %2878 = vrot.lane.b32.xlu1 %v6169_v43, %s5735_s16  ;;  %v2893_v43 = vld [vmem:[%s6881_s3 + $0x1f8] sm:$0xff] }
0x1b81   :  { %v5346_v56 = vpack.c.bf16 %v2893_v43, %v2892_v8 }
0x1b83   :  { %5347 = vmatpush3.bf16.msra.mxu1 %v5346_v56 }
0x1b84   :  { %5348 = vmatprep.subr.bf16.mxu1 %v5725_v7 }
0x1b87   :  { %5350 = vmatpush3.bf16.msra.mxu1 %v5349_v32 }
0x1b88   :  { %5351 = vmatprep.subr.bf16.mxu1 %v5725_v7 }
0x1b8b   :  { %5353 = vmatpush3.bf16.msra.mxu1 %v5352_v16 }
0x1bb5   :  { %v2806_v50 = vpop.f32.mrb[42].mxu0 }
0x1bb6   :  { %v2816_v23 = vadd.f32 %v2806_v50, %v6459_v22  ;;  %v5021_v2 = vpop.f32.mrb[43].mxu0  ;;  %v6530_v22 = vld [vmem:[%s6882_s4 + $0xf] ss:$0 sm:$0xff] }
0x1bb8   :  { %v2823_v17 = vadd.f32 %v6472_v1, %v2816_v23 }
0x1bba   :  { %v2828_v21 = vsel %vm181_vm4, %v2823_v17, 0.0 }
0x1bbb   :  { %2829 = vadd.xlane.f32.xlu0 %v2828_v21 }
0x1bfc   :  { %v2845_v18 = vpop.xlane.xlu1 %2844 }
0x1bfd   :  { %v2852_v49 = vmul.f32 0.03125, %v2845_v18 }
0x1bff   :  { %v2855_v6 = vadd.f32 1e-05, %v2852_v49  ;;  %v4497_v49 = vld [vmem:[%s6882_s4 + $0x10] ss:$0 sm:$0xff] }
0x1c00   :  { %v2879_v46 = vpop.permute.xlu1 %2878 }
0x1c01   :  { %5646 = vrsqrt.f32 %v2855_v6 }
0x1c0b   :  { %v5647_v54 = vpop.eup %5646 }
0x1c0c   :  { %v2861_v9 = vmul.f32 %v5647_v54, %v2837_v59 }
0x1c0e   :  { %v2868_v24 = vmul.f32 %v6525_v15, %v2861_v9 }
0x1c10   :  { %v2875_v25 = vadd.f32 %v6530_v22, %v2868_v24 }
0x1c12   :  { %v2887_v3 = vsel %vm181_vm4, %v2875_v25, %v2879_v46 }
0x1c13   :  { %5042 = vmatmul.mubr.msk.f32.vlgmr.msra.gmra.mrb[36].mxu1 %vm1363_vm11, %v2887_v3 }
0x1c14   :  { %5044 = vmatprep.mubr.msk.f32.mxu1 %vm5726_vm1, %v5727_v12 }
0x1c48   :  { %v2830_v26 = vpop.xlane.xlu0 %2829 }
0x1c49   :  { %v2835_v27 = vmul.f32 0.03125, %v2830_v26 }
0x1c4b   :  { %v2838_v33 = vsub.f32 %v2823_v17, %v2835_v27 }
0x1c4c   :  { %v2719_v47 = vpop.f32.mrb[34].mxu1 }
0x1c4d   :  { %v2720_v36 = vadd.f32 %v6451_v44, %v2719_v47  ;;  %v4999_v41 = vpop.f32.mrb[35].mxu1  ;;  %v2841_v39 = vmul.f32 %v2838_v33, %v2838_v33  ;;  %v5355_v44 = vpack.c.bf16 %v2993_v42, %v2992_v37 }
0x1c4f   :  { %v2725_v45 = vmax.f32 %v2720_v36, 0.0  ;;  %v2846_v40 = vsel %vm181_vm4, %v2841_v39, 0.0  ;;  %5356 = vmatpush3.bf16.msra.mxu0 %v5355_v44 }
0x1c50   :  { %2847 = vadd.xlane.f32.xlu1 %v2846_v40  ;;  %5357 = vmatprep.subr.bf16.mxu0 %v5725_v7 }
0x1c51   :  { %5023 = vmatmul.mubr.msk.f32.gmra.mrb[44].mxu0 %vm1363_vm11, %v2725_v45 }
0x1c52   :  { %5058 = vmatprep.mubr.msk.f32.mxu0 %vm5726_vm1, %v5727_v12 }
0x1c53   :  { %5359 = vmatpush3.bf16.msra.mxu0 %v5358_v52 }
0x1c61   :  { %2880 = vrot.lane.b32.xlu1 %v6187_v31, %s5735_s16  ;;  %v6561_v31 = vld [vmem:[%s6882_s4 + $0x18] ss:$0 sm:$0xff] }
0x1cdd   :  { %v2848_v19 = vpop.xlane.xlu1 %2847 }
0x1cde   :  { %v2853_v55 = vmul.f32 0.03125, %v2848_v19 }
0x1ce0   :  { %v2856_v35 = vadd.f32 1e-05, %v2853_v55  ;;  %v5699_v55 = vld [vmem:[%s6879_s1] ss:$0 sm:$0xff] }
0x1ce1   :  { %v2881_v63 = vpop.permute.xlu1 %2880 }
0x1ce2   :  { %5648 = vrsqrt.f32 %v2856_v35 }
0x1ce6   :  { %v2978_v57 = vpop.f32.mrb[36].mxu1 }
0x1ce7   :  { %v6564_v58 = vadd.f32 %v6561_v31, %v2978_v57  ;;  %v5043_v34 = vpop.f32.mrb[37].mxu1 }
0x1ce9   :  { %5059 = vmatmul.mubr.msk.f32.vlgmr.msra.gmra.mrb[46].mxu0 %vm181_vm4, %v6564_v58 }
0x1cea   :  { %5061 = vmatprep.mubr.msk.f32.mxu0 %vm5726_vm1, %v5727_v12 }
0x1cec   :  { %v5649_v59 = vpop.eup %5648 }
0x1ced   :  { %v2862_v60 = vmul.f32 %v5649_v59, %v2838_v33 }
0x1cef   :  { %v2869_v61 = vmul.f32 %v6525_v15, %v2862_v60 }
0x1cf1   :  { %v2876_v62 = vadd.f32 %v6530_v22, %v2869_v61 }
0x1cf3   :  { %v2888_v4 = vsel %vm181_vm4, %v2876_v62, %v2881_v63 }
0x1cf4   :  { %5045 = vmatmul.mubr.msk.f32.gmra.mrb[38].mxu1 %vm1363_vm11, %v2888_v4 }
0x1cf5   :  { %5047 = vmatprep.mubr.msk.f32.mxu1 %vm5726_vm1, %v5727_v12 }
0x1d24   :  { %v2811_v0 = vpop.f32.mrb[44].mxu0 }
0x1d25   :  { %v2817_v51 = vadd.f32 %v2811_v0, %v6484_v5  ;;  %v5024_v53 = vpop.f32.mrb[45].mxu0 }
0x1d27   :  { %v2824_v8 = vadd.f32 %v6472_v1, %v2817_v51 }
0x1d29   :  { %v2831_v43 = vsel %vm1218_vm12, %v2824_v8, 0.0 }
0x1d2a   :  { %2832 = vadd.xlane.f32.xlu0 %v2831_v43 }
0x1d40   :  { %2882 = vrot.lane.b32.xlu0 %v6221_v28, %s5735_s16  ;;  %s4384_s16 = sshll.u32 %s5736_s0, 4  ;;  %s4385_s16 = int_to_ptr.vmem [resolvable:$true] %s4384_s16 }
0x1d41   :  { %s5701_s7 = scalar_lea.vmem %s4385_s16, 64  ;;  %p5706_p1 = scmp.lt.s32.totalorder %s4385_s16, %s4385_s16 }
0x1d42   :  { %p5702_p0 = scmp.ne.s32.totalorder %s4385_s16, %s5701_s7  ;;  %p5707_p2 = scmp.lt.s32.totalorder %s5701_s7, %s5701_s7 }
0x1d44   :  { %p5708_p3 = por %p5707_p2, %p5706_p1 }
0x1d46   :  { %p5709_p4 = pnand %p5708_p3, %p5702_p0 }
0x1db7   :  { %v2833_v56 = vpop.xlane.xlu0 %2832 }
0x1db8   :  { %v2836_v10 = vmul.f32 0.03125, %v2833_v56 }
0x1dba   :  { %v2839_v11 = vsub.f32 %v2824_v8, %v2836_v10 }
0x1dbb   :  { %v2883_v54 = vpop.permute.xlu0 %2882 }
0x1dbc   :  { %v3099_v32 = vpop.f32.mrb[46].mxu0  ;;  %v2842_v13 = vmul.f32 %v2839_v11, %v2839_v11 }
0x1dbd   :  { %v5060_v14 = vpop.f32.mrb[47].mxu0  ;;  %v3100_v9 = vadd.f32 %v4497_v49, %v3099_v32 }
0x1dbe   :  { %v2849_v16 = vsel %vm1218_vm12, %v2842_v13, 0.0 }
0x1dbf   :  { %2850 = vadd.xlane.f32.xlu1 %v2849_v16 }
0x1dc7   :  { %v2983_v50 = vpop.f32.mrb[38].mxu1 }
0x1dc8   :  { %v6583_v5 = vadd.f32 %v6561_v31, %v2983_v50  ;;  %v5046_v1 = vpop.f32.mrb[39].mxu1 }
0x1dca   :  { %5062 = vmatmul.mubr.msk.f32.gmra.mrb[48].mxu0 %vm181_vm4, %v6583_v5 }
0x1dcb   :  { %5064 = vmatprep.mubr.msk.f32.mxu0 %vm5726_vm1, %v5727_v12 }
0x1e4c   :  { %v2851_v28 = vpop.xlane.xlu1 %2850 }
0x1e4d   :  { %v2854_v23 = vmul.f32 0.03125, %v2851_v28 }
0x1e4f   :  { %v2857_v2 = vadd.f32 1e-05, %v2854_v23 }
0x1e51   :  { %5650 = vrsqrt.f32 %v2857_v2 }
0x1e5b   :  { %v5651_v17 = vpop.eup %5650 }
0x1e5c   :  { %v2863_v21 = vmul.f32 %v5651_v17, %v2839_v11 }
0x1e5e   :  { %v2870_v18 = vmul.f32 %v6525_v15, %v2863_v21 }
0x1e60   :  { %v2877_v6 = vadd.f32 %v6530_v22, %v2870_v18 }
0x1e62   :  { %v2889_v24 = vsel %vm181_vm4, %v2877_v6, %v2883_v54 }
0x1e63   :  { %5048 = vmatmul.mubr.msk.f32.gmra.mrb[40].mxu1 %vm1363_vm11, %v2889_v24 }
0x1e64   :  { %5071 = vmatprep.mubr.msk.f32.mxu1 %vm31_vm0, %v3100_v9 }
0x1e9d   :  { %v3104_v25 = vpop.f32.mrb[48].mxu0 }
0x1e9e   :  { %v3105_v46 = vadd.f32 %v4497_v49, %v3104_v25  ;;  %v5063_v3 = vpop.f32.mrb[49].mxu0 }
0x1ea0   :  { %3318 = vrot.lane.b32.xlu1 %v3105_v46, %s5728_s17  ;;  %v6598_v15 = vpack.i.bf16 %v3105_v46, %v3100_v9  ;;  %v3532_v63 = vrot.slane %v3105_v46, 2 }
0x1ea2   :  { %5525 = vrot.lane.b32.xlu0 %v6598_v15, %s5729_s18 }
0x1ea6   :  { %5530 = vrot.lane.b32.xlu0 %v6598_v15, %s5730_s19 }
0x1eaa   :  { %3316 = vrot.lane.b32.xlu0 %v3100_v9, %s5728_s17 }
0x1f12   :  { %v3319_v44 = vpop.permute.xlu1 %3318 }
0x1f14   :  { %v5526_v22 = vpop.permute.xlu0 %5525 }
0x1f15   :  { %v5528_v26 = vunpack.i.h.bf16 %v5526_v22  ;;  %v5527_v27 = vunpack.i.l.bf16 %v5526_v22 }
0x1f17   :  { %v5360_v33 = vpack.c.bf16 %v5528_v26, %v5527_v27 }
0x1f18   :  { %v5531_v47 = vpop.permute.xlu0 %5530 }
0x1f19   :  { %v5533_v36 = vunpack.i.h.bf16 %v5531_v47  ;;  %v5532_v41 = vunpack.i.l.bf16 %v5531_v47  ;;  %5362 = vmatprep.subr.msk.bf16.mxu1 %vm5850_vm6, %v5360_v33 }
0x1f1a   :  { %5365 = vmatpush3.bf16.xpose.msk.msra.mxu1 %vm5850_vm6, %v5360_v33 }
0x1f1b   :  { %v5372_v39 = vpack.c.bf16 %v5533_v36, %v5532_v41 }
0x1f1c   :  { %v3317_v42 = vpop.permute.xlu0 %3316 }
0x1f1d   :  { %5374 = vmatprep.subr.msk.bf16.mxu0 %vm5850_vm6, %v5372_v39 }
0x1f1e   :  { %5377 = vmatpush3.bf16.xpose.msk.msra.mxu0 %vm5850_vm6, %v5372_v39 }
0x1f21   :  { %5072 = vmatmul.mubr.msk.f32.vlgmr.msra.gmra.mrb[42].mxu1 %vm31_vm0, %v3105_v46 }
0x1f36   :  { %v2988_v45 = vpop.f32.mrb[40].mxu1 }
0x1f37   :  { %v6615_v40 = vadd.f32 %v6561_v31, %v2988_v45  ;;  %v5049_v37 = vpop.f32.mrb[41].mxu1 }
0x1f39   :  { %5065 = vmatmul.mubr.msk.f32.gmra.mrb[50].mxu0 %vm181_vm4, %v6615_v40 }
0x1f3a   :  { %5085 = vmatprep.mubr.msk.f32.mxu0 %vm31_vm0, %v3317_v42 }
0x1f3d   :  { %5086 = vmatmul.mubr.msk.f32.vlgmr.msra.gmra.mrb[52].mxu0 %vm31_vm0, %v3319_v44 }
0x1ff4   :  { %v5073_v29 = vpop.f32.mrb[42].mxu1 }
0x1ff5   :  { %v3203_v38 = vmul.f32 0.25, %v5073_v29  ;;  %v3193_v52 = vpop.f32.mrb[43].mxu1 }
0x1ff6   :  { %v3202_v19 = vmul.f32 0.25, %v3193_v52 }
0x1ff7   :  { %v3205_v35 = vadd.f32 %v5699_v55, %v3203_v38 }
0x1ff8   :  { %v3204_v31 = vadd.f32 %v5699_v55, %v3202_v19 }
0x1ff9   :  { %v3209_v57 = vsel %vm367_vm7, %v3205_v35, -inf }
0x1ffa   :  { %3210 = vmax.xlane.f32.xlu1 %v3209_v57  ;;  %v3206_v34 = vsel %vm363_vm8, %v3204_v31, -inf }
0x1ffb   :  { %3207 = vmax.xlane.f32.xlu0 %v3206_v34 }
0x200b   :  { %5535 = vrot.lane.b32.xlu1 %v6598_v15, %s5731_s22 }
0x200c   :  { %v3109_v59 = vpop.f32.mrb[50].mxu0 }
0x200d   :  { %v3110_v60 = vadd.f32 %v4497_v49, %v3109_v59  ;;  %v5066_v61 = vpop.f32.mrb[51].mxu0 }
0x200f   :  { %v6628_v62 = vrot.slane %v3110_v60, 2 }
0x2010   :  { %v5087_v4 = vpop.f32.mrb[52].mxu0 }
0x2011   :  { %v3398_v0 = vpop.f32.mrb[53].mxu0  ;;  %v6632_v51 = vsel %vm118_vm2, %v3532_v63, %v6628_v62  ;;  %v3408_v53 = vmul.f32 0.25, %v5087_v4 }
0x2012   :  { %v3407_v8 = vmul.f32 0.25, %v3398_v0  ;;  %v6636_v43 = vpack.i.bf16 %v6628_v62, %v6632_v51 }
0x2013   :  { %v3410_v11 = vadd.f32 %v5699_v55, %v3408_v53 }
0x2014   :  { %5545 = vrot.lane.b32.xlu1 %v6636_v43, %s5729_s18  ;;  %v3409_v56 = vadd.f32 %v5699_v55, %v3407_v8 }
0x2015   :  { %v3414_v32 = vsel %vm367_vm7, %v3410_v11, -inf }
0x2016   :  { %v3411_v10 = vsel %vm363_vm8, %v3409_v56, -inf }
0x2017   :  { %3412 = vmax.xlane.f32.xlu0 %v3411_v10 }
0x201b   :  { %3415 = vmax.xlane.f32.xlu0 %v3414_v32 }
0x2087   :  { %v3211_v13 = vpop.xlane.xlu1 %3210 }
0x2088   :  { %v3213_v14 = vsub.f32 %v3205_v35, %v3211_v13  ;;  %v3208_v21 = vpop.xlane.xlu0 %3207 }
0x2089   :  { %v3212_v49 = vsub.f32 %v3204_v31, %v3208_v21 }
0x208a   :  { %v3216_v16 = vmul.f32 1.442695, %v3213_v14 }
0x208b   :  { %v5536_v50 = vpop.permute.xlu1 %5535  ;;  %v3214_v9 = vmul.f32 1.442695, %v3212_v49 }
0x208c   :  { %5652 = vpow2.f32 %v3216_v16  ;;  %v5538_v1 = vunpack.i.h.bf16 %v5536_v50  ;;  %v5537_v28 = vunpack.i.l.bf16 %v5536_v50 }
0x208e   :  { %v5366_v23 = vpack.c.bf16 %v5538_v1, %v5537_v28 }
0x208f   :  { %v5546_v37 = vpop.permute.xlu1 %5545 }
0x2090   :  { %5368 = vmatprep.subr.msk.bf16.mxu1 %vm5881_vm10, %v5366_v23  ;;  %v5548_v19 = vunpack.i.h.bf16 %v5546_v37  ;;  %v5547_v55 = vunpack.i.l.bf16 %v5546_v37 }
0x2091   :  { %5371 = vmatpush3.bf16.msk.msra.mxu1 %vm5881_vm10, %v5366_v23 }
0x2092   :  { %v5384_v59 = vpack.c.bf16 %v5548_v19, %v5547_v55 }
0x2096   :  { %v5653_v2 = vpop.eup %5652 }
0x2097   :  { %v3221_v17 = vsel %vm367_vm7, %v5653_v2, 0.0 }
0x2098   :  { %3222 = vadd.xlane.f32.xlu0 %v3221_v17 }
0x20a4   :  { %v3413_v18 = vpop.xlane.xlu0 %3412 }
0x20a5   :  { %v3417_v24 = vsub.f32 %v3409_v56, %v3413_v18 }
0x20a7   :  { %v3419_v46 = vmul.f32 1.442695, %v3417_v24 }
0x20a8   :  { %v3416_v6 = vpop.xlane.xlu0 %3415 }
0x20a9   :  { %v3418_v54 = vsub.f32 %v3410_v11, %v3416_v6 }
0x20ab   :  { %v3421_v25 = vmul.f32 1.442695, %v3418_v54 }
0x20ad   :  { %5654 = vpow2.f32 %v3421_v25 }
0x20ae   :  { %5656 = vpow2.f32 %v3214_v9 }
0x20af   :  { %5658 = vpow2.f32 %v3419_v46 }
0x20b7   :  { %v5655_v3 = vpop.eup %5654 }
0x20b8   :  { %v3426_v22 = vsel %vm367_vm7, %v5655_v3, 0.0  ;;  %v5657_v26 = vpop.eup %5656 }
0x20b9   :  { %3427 = vadd.xlane.f32.xlu0 %v3426_v22  ;;  %v3218_v27 = vsel %vm363_vm8, %v5657_v26, 0.0  ;;  %v5659_v33 = vpop.eup %5658 }
0x20ba   :  { %v3423_v47 = vsel %vm363_vm8, %v5659_v33, 0.0 }
0x20bd   :  { %3219 = vadd.xlane.f32.xlu0 %v3218_v27 }
0x20c1   :  { %3424 = vadd.xlane.f32.xlu0 %v3423_v47 }
0x20d7   :  { %5540 = vrot.lane.b32.xlu0 %v6598_v15, %s5733_s23 }
0x2125   :  { %v3223_v36 = vpop.xlane.xlu0 %3222 }
0x2126   :  { %5660 = vrcp.f32 %v3223_v36 }
0x2130   :  { %v5661_v38 = vpop.eup %5660 }
0x2131   :  { %v3227_v57 = vmul.f32 %v5661_v38, %v5653_v2 }
0x2146   :  { %v3428_v41 = vpop.xlane.xlu0 %3427 }
0x214a   :  { %v3220_v39 = vpop.xlane.xlu0 %3219 }
0x214b   :  { %5662 = vrcp.f32 %v3220_v39 }
0x214c   :  { %5664 = vrcp.f32 %v3428_v41 }
0x214e   :  { %v3425_v45 = vpop.xlane.xlu0 %3424 }
0x214f   :  { %5666 = vrcp.f32 %v3425_v45 }
0x2152   :  { %v5541_v42 = vpop.permute.xlu0 %5540 }
0x2153   :  { %v5543_v44 = vunpack.i.h.bf16 %v5541_v42  ;;  %v5542_v29 = vunpack.i.l.bf16 %v5541_v42 }
0x2155   :  { %v5663_v52 = vpop.eup %5662  ;;  %v5378_v35 = vpack.c.bf16 %v5543_v44, %v5542_v29 }
0x2156   :  { %v3226_v31 = vmul.f32 %v5663_v52, %v5657_v26  ;;  %v5665_v15 = vpop.eup %5664 }
0x2157   :  { %5380 = vmatprep.subr.msk.bf16.mxu1 %vm5881_vm10, %v5378_v35  ;;  %v3432_v61 = vmul.f32 %v5665_v15, %v5655_v3 }
0x2158   :  { %5078 = vmatprep.mubr.msk.f32.mxu1 %vm363_vm8, %v3226_v31 }
0x2159   :  { %v5667_v34 = vpop.eup %5666  ;;  %5079 = vmatmul.mubr.msk.f32.vlgmr.msra.gmra.mrb[44].mxu1 %vm363_vm8, %v3227_v57 }
0x215a   :  { %5383 = vmatpush3.bf16.msk.msra.mxu1 %vm5881_vm10, %v5378_v35  ;;  %v3431_v60 = vmul.f32 %v5667_v34, %v5659_v33 }
0x215b   :  { %5386 = vmatprep.subr.msk.bf16.mxu1 %vm5850_vm6, %v5384_v59 }
0x215c   :  { %5092 = vmatprep.mubr.msk.f32.mxu1 %vm363_vm8, %v3431_v60 }
0x215d   :  { %5093 = vmatmul.mubr.msk.f32.vlgmr.msra.gmra.mrb[46].mxu1 %vm363_vm8, %v3432_v61 }
0x215e   :  { %5099 = vmatprep.mubr.msk.f32.mxu1 %vm31_vm0, %v6632_v51 }
0x2163   :  { %5389 = vmatpush3.bf16.xpose.msk.msra.mxu1 %vm5850_vm6, %v5384_v59 }
0x216a   :  { %5100 = vmatmul.mubr.msk.f32.vlgmr.msra.gmra.mrb[48].mxu1 %vm31_vm0, %v6628_v62 }
0x222c   :  { %v6668_v63 = vpop.f32.mrb[44].mxu1 }
0x222d   :  { %v6670_v4 = vpop.f32.mrb[45].mxu1 }
0x2230   :  { %v6672_v0 = vpop.f32.mrb[46].mxu1 }
0x2231   :  { %v6674_v53 = vpop.f32.mrb[47].mxu1 }
0x223d   :  { %v5101_v8 = vpop.f32.mrb[48].mxu1 }
0x223e   :  { %v3623_v56 = vmul.f32 0.25, %v5101_v8  ;;  %v3613_v10 = vpop.f32.mrb[49].mxu1 }
0x223f   :  { %v3622_v11 = vmul.f32 0.25, %v3613_v10 }
0x2240   :  { %v3625_v32 = vadd.f32 %v6310_v30, %v3623_v56 }
0x2241   :  { %v3624_v13 = vadd.f32 %v6310_v30, %v3622_v11 }
0x2242   :  { %v3629_v14 = vsel %vm367_vm7, %v3625_v32, -inf }
0x2243   :  { %3630 = vmax.xlane.f32.xlu0 %v3629_v14  ;;  %v3626_v16 = vsel %vm363_vm8, %v3624_v13, -inf }
0x2244   :  { %3627 = vmax.xlane.f32.xlu1 %v3626_v16  ;;  %v2996_v16 = vld [vmem:[%s6881_s3 + $0x160] sm:$0xff] }
0x22d0   :  { %v3631_v50 = vpop.xlane.xlu0 %3630 }
0x22d1   :  { %v3633_v1 = vsub.f32 %v3625_v32, %v3631_v50  ;;  %v3628_v28 = vpop.xlane.xlu1 %3627  ;;  %v2997_v50 = vld [vmem:[%s6881_s3 + $0x168] sm:$0xff] }
0x22d2   :  { %v3632_v23 = vsub.f32 %v3624_v13, %v3628_v28 }
0x22d3   :  { %v3636_v2 = vmul.f32 1.442695, %v3633_v1 }
0x22d4   :  { %v3634_v17 = vmul.f32 1.442695, %v3632_v23  ;;  %v5409_v23 = vpack.c.bf16 %v2997_v50, %v2996_v16  ;;  %v4534_v50 = vld [vmem:[%s6882_s4 + $0x15] ss:$0 sm:$0xff] }
0x22d5   :  { %5668 = vpow2.f32 %v3636_v2 }
0x22d6   :  { %5670 = vpow2.f32 %v3634_v17  ;;  %v2998_v17 = vld [vmem:[%s6881_s3 + $0x170] sm:$0xff] }
0x22df   :  { %v5669_v21 = vpop.eup %5668 }
0x22e0   :  { %v5671_v18 = vpop.eup %5670  ;;  %v3641_v49 = vsel %vm367_vm7, %v5669_v21, 0.0 }
0x22e1   :  { %3642 = vadd.xlane.f32.xlu1 %v3641_v49  ;;  %v3638_v30 = vsel %vm363_vm8, %v5671_v18, 0.0 }
0x22e2   :  { %3639 = vadd.xlane.f32.xlu0 %v3638_v30 }
0x22f2   :  { %5555 = vrot.lane.b32.xlu1 %v6636_v43, %s5730_s19 }
0x22f6   :  { %3736 = vrot.lane.b32.xlu1 %v6632_v51, %s5728_s17 }
0x22f8   :  { %5550 = vrot.lane.b32.xlu0 %v6636_v43, %s5731_s22 }
0x22fa   :  { %3738 = vrot.lane.b32.xlu1 %v6628_v62, %s5728_s17 }
0x236e   :  { %v3643_v6 = vpop.xlane.xlu1 %3642 }
0x236f   :  { %5672 = vrcp.f32 %v3643_v6  ;;  %v3640_v54 = vpop.xlane.xlu0 %3639 }
0x2370   :  { %5674 = vrcp.f32 %v3640_v54  ;;  %v4529_v54 = vld [vmem:[%s6882_s4 + $0x11] ss:$0 sm:$0xff] }
0x2372   :  { %v5556_v9 = vpop.permute.xlu1 %5555 }
0x2373   :  { %v5551_v24 = vpop.permute.xlu0 %5550  ;;  %v5558_v25 = vunpack.i.h.bf16 %v5556_v9  ;;  %v5557_v46 = vunpack.i.l.bf16 %v5556_v9 }
0x2374   :  { %v5553_v3 = vunpack.i.h.bf16 %v5551_v24  ;;  %v5552_v22 = vunpack.i.l.bf16 %v5551_v24 }
0x2375   :  { %v5396_v27 = vpack.c.bf16 %v5558_v25, %v5557_v46 }
0x2376   :  { %v5390_v26 = vpack.c.bf16 %v5553_v3, %v5552_v22  ;;  %v3737_v36 = vpop.permute.xlu1 %3736 }
0x2378   :  { %5392 = vmatprep.subr.msk.bf16.mxu0 %vm5881_vm10, %v5390_v26 }
0x2379   :  { %v5673_v51 = vpop.eup %5672  ;;  %5395 = vmatpush3.bf16.msk.msra.mxu0 %vm5881_vm10, %v5390_v26 }
0x237a   :  { %v5675_v62 = vpop.eup %5674  ;;  %5398 = vmatprep.subr.msk.bf16.mxu0 %vm5850_vm6, %v5396_v27  ;;  %v3647_v47 = vmul.f32 %v5673_v51, %v5669_v21  ;;  %v3739_v41 = vpop.permute.xlu1 %3738  ;;  %v2999_v21 = vld [vmem:[%s6881_s3 + $0x178] sm:$0xff] }
0x237b   :  { %v3646_v33 = vmul.f32 %v5675_v62, %v5671_v18  ;;  %v5412_v20 = vpack.c.bf16 %v2999_v21, %v2998_v17  ;;  %v3007_v17 = vld [vmem:[%s6881_s3 + $0x1b8] sm:$0xff] }
0x237d   :  { %5106 = vmatprep.mubr.msk.f32.mxu0 %vm363_vm8, %v3646_v33 }
0x237e   :  { %5107 = vmatmul.mubr.msk.f32.vlgmr.msra.gmra.mrb[54].mxu0 %vm363_vm8, %v3647_v47 }
0x237f   :  { %5113 = vmatprep.mubr.msk.f32.mxu0 %vm31_vm0, %v3737_v36 }
0x2382   :  { %5401 = vmatpush3.bf16.xpose.msk.msra.mxu0 %vm5850_vm6, %v5396_v27 }
0x2383   :  { %5414 = vmatprep.subr.bf16.mxu0 %v5725_v7 }
0x2389   :  { %5114 = vmatmul.mubr.msk.f32.vlgmr.msra.gmra.mrb[56].mxu0 %vm31_vm0, %v3739_v41 }
0x238a   :  { %5148 = vmatprep.mubr.msk.f32.mxu0 %vm5726_vm1, %v5727_v12 }
0x2451   :  { %v6705_v39 = vpop.f32.mrb[54].mxu0 }
0x2452   :  { %v6707_v45 = vpop.f32.mrb[55].mxu0 }
0x245c   :  { %v5115_v37 = vpop.f32.mrb[56].mxu0 }
0x245d   :  { %v3828_v42 = vmul.f32 0.25, %v5115_v37  ;;  %v3818_v44 = vpop.f32.mrb[57].mxu0 }
0x245e   :  { %v3827_v29 = vmul.f32 0.25, %v3818_v44 }
0x245f   :  { %v3830_v38 = vadd.f32 %v5700_v48, %v3828_v42 }
0x2460   :  { %v3829_v52 = vadd.f32 %v5700_v48, %v3827_v29 }
0x2461   :  { %v3834_v19 = vsel %vm367_vm7, %v3830_v38, -inf }
0x2462   :  { %3835 = vmax.xlane.f32.xlu1 %v3834_v19  ;;  %v3831_v55 = vsel %vm363_vm8, %v3829_v52, -inf }
0x2463   :  { %3832 = vmax.xlane.f32.xlu0 %v3831_v55  ;;  %v3003_v55 = vld [vmem:[%s6881_s3 + $0x198] sm:$0xff] }
0x2473   :  { %3523 = vrot.lane.b32.xlu1 %v6674_v53, %s5734_s26 }
0x24ef   :  { %v3836_v35 = vpop.xlane.xlu1 %3835 }
0x24f0   :  { %v3838_v31 = vsub.f32 %v3830_v38, %v3836_v35  ;;  %v3833_v57 = vpop.xlane.xlu0 %3832  ;;  %v3000_v38 = vld [vmem:[%s6881_s3 + $0x180] sm:$0xff] }
0x24f1   :  { %v3837_v15 = vsub.f32 %v3829_v52, %v3833_v57  ;;  %v3001_v52 = vld [vmem:[%s6881_s3 + $0x188] sm:$0xff] }
0x24f2   :  { %v3841_v34 = vmul.f32 1.442695, %v3838_v31  ;;  %v5415_v19 = vpack.c.bf16 %v3001_v52, %v3000_v38 }
0x24f3   :  { %v3839_v59 = vmul.f32 1.442695, %v3837_v15  ;;  %v3524_v18 = vpop.permute.xlu1 %3523 }
0x24f4   :  { %5676 = vpow2.f32 %v3841_v34  ;;  %v3529_v49 = vsel %vm31_vm0, %v6670_v4, %v3524_v18  ;;  %5416 = vmatpush3.bf16.msra.mxu0 %v5415_v19  ;;  %v3009_v18 = vld [vmem:[%s6881_s3 + $0x1c8] sm:$0xff]  ;;  %v4542_v19 = vld [vmem:[%s6882_s4 + $0x13] ss:$0 sm:$0xff] }
0x24f5   :  { %5678 = vpow2.f32 %v3839_v59  ;;  %5417 = vmatprep.subr.bf16.mxu0 %v5725_v7 }
0x24fe   :  { %v5677_v60 = vpop.eup %5676 }
0x24ff   :  { %v3846_v61 = vsel %vm367_vm7, %v5677_v60, 0.0  ;;  %v5679_v8 = vpop.eup %5678 }
0x2500   :  { %3847 = vadd.xlane.f32.xlu0 %v3846_v61  ;;  %v3843_v56 = vsel %vm363_vm8, %v5679_v8, 0.0 }
0x2504   :  { %3844 = vadd.xlane.f32.xlu0 %v3843_v56 }
0x251a   :  { %5560 = vrot.lane.b32.xlu0 %v6636_v43, %s5733_s23 }
0x258d   :  { %v3848_v53 = vpop.xlane.xlu0 %3847 }
0x258e   :  { %5680 = vrcp.f32 %v3848_v53 }
0x2591   :  { %v3845_v10 = vpop.xlane.xlu0 %3844 }
0x2592   :  { %5682 = vrcp.f32 %v3845_v10 }
0x2595   :  { %v5561_v11 = vpop.permute.xlu0 %5560 }
0x2596   :  { %v5563_v32 = vunpack.i.h.bf16 %v5561_v11  ;;  %v5562_v13 = vunpack.i.l.bf16 %v5561_v11 }
0x2598   :  { %v5402_v14 = vpack.c.bf16 %v5563_v32, %v5562_v13  ;;  %v5681_v43 = vpop.eup %5680 }
0x2599   :  { %v3852_v2 = vmul.f32 %v5681_v43, %v5677_v60 }
0x259a   :  { %5404 = vmatprep.subr.msk.bf16.mxu1 %vm5881_vm10, %v5402_v14 }
0x259b   :  { %5407 = vmatpush3.bf16.msk.msra.mxu1 %vm5881_vm10, %v5402_v14  ;;  %v4533_v14 = vld [vmem:[%s6882_s4 + $0x14] ss:$0 sm:$0xff] }
0x259c   :  { %v5683_v1 = vpop.eup %5682  ;;  %5408 = vmatprep.subr.bf16.mxu1 %v5725_v7 }
0x259d   :  { %v3851_v28 = vmul.f32 %v5683_v1, %v5679_v8  ;;  %v3004_v1 = vld [vmem:[%s6881_s3 + $0x1a0] sm:$0xff] }
0x259f   :  { %5120 = vmatprep.mubr.msk.f32.mxu1 %vm363_vm8, %v3851_v28  ;;  %v3005_v28 = vld [vmem:[%s6881_s3 + $0x1a8] sm:$0xff] }
0x25a0   :  { %5121 = vmatmul.mubr.msk.f32.vlgmr.msra.gmra.mrb[50].mxu1 %vm363_vm8, %v3852_v2  ;;  %v5421_v2 = vpack.c.bf16 %v3005_v28, %v3004_v1 }
0x25a1   :  { %5410 = vmatpush3.bf16.msra.mxu1 %v5409_v23  ;;  %5131 = vmatprep.mubr.msk.f32.mxu1 %vm5726_vm1, %v5727_v12  ;;  %v3006_v23 = vld [vmem:[%s6881_s3 + $0x1b0] sm:$0xff] }
0x25a2   :  { %5411 = vmatprep.subr.bf16.mxu1 %v5725_v7  ;;  %v5424_v21 = vpack.c.bf16 %v3007_v17, %v3006_v23 }
0x25a5   :  { %5413 = vmatpush3.bf16.msra.mxu1 %v5412_v20  ;;  %v3008_v20 = vld [vmem:[%s6881_s3 + $0x1c0] sm:$0xff] }
0x25a6   :  { %5420 = vmatprep.subr.bf16.mxu1 %v5725_v7 }
0x25a8   :  { %5132 = vmatmul.mubr.msk.f32.vlgmr.msra.gmra.mrb[52].mxu1 %vm181_vm4, %v3529_v49  ;;  %v5427_v49 = vpack.c.bf16 %v3009_v18, %v3008_v20  ;;  %v4543_v18 = vld [vmem:[%s6882_s4 + $0x16] ss:$0 sm:$0xff] }
0x25a9   :  { %5134 = vmatprep.mubr.msk.f32.mxu1 %vm5726_vm1, %v5727_v12  ;;  %5422 = vmatpush3.bf16.msra.mxu1 %v5421_v2 }
0x25aa   :  { %5423 = vmatprep.subr.bf16.mxu1 %v5725_v7 }
0x25ad   :  { %5425 = vmatpush3.bf16.msra.mxu1 %v5424_v21 }
0x25ae   :  { %5426 = vmatprep.subr.bf16.mxu1 %v5725_v7 }
0x25b1   :  { %5428 = vmatpush3.bf16.msra.mxu1 %v5427_v49 }
0x25b2   :  { %5429 = vmatprep.subr.bf16.mxu1 %v5725_v7 }
0x2673   :  { %v5122_v30 = vpop.f32.mrb[50].mxu1 }
0x2674   :  { %v3932_v6 = vpop.f32.mrb[51].mxu1 }
0x2675   :  { %3943 = vrot.lane.b32.xlu1 %v3932_v6, %s5734_s26  ;;  %v3011_v6 = vld [vmem:[%s6881_s3 + $0x1d8] sm:$0xff] }
0x2679   :  { %3525 = vrot.lane.b32.xlu1 %v6672_v0, %s5734_s26 }
0x267b   :  { %v4036_v9 = vpop.f32.mrb[52].mxu1 }
0x267c   :  { %v4037_v24 = vadd.f32 %v4529_v54, %v4036_v9  ;;  %v5133_v25 = vpop.f32.mrb[53].mxu1 }
0x267e   :  { %v4050_v4 = vadd.f32 %v4037_v24, %v6564_v58 }
0x2680   :  { %v4053_v46 = vsel %vm181_vm4, %v4050_v4, 0.0 }
0x2681   :  { %4054 = vadd.xlane.f32.xlu0 %v4053_v46 }
0x2697   :  { %3945 = vrot.lane.b32.xlu0 %v5122_v30, %s5734_s26  ;;  %v3010_v30 = vld [vmem:[%s6881_s3 + $0x1d0] sm:$0xff] }
0x26e7   :  { %v3944_v3 = vpop.permute.xlu1 %3943 }
0x26e8   :  { %v3949_v22 = vsel %vm31_vm0, %v6707_v45, %v3944_v3 }
0x26e9   :  { %v3953_v26 = vrot.slane %v3949_v22, 6 }
0x26eb   :  { %v3526_v0 = vpop.permute.xlu1 %3525 }
0x26ec   :  { %v3530_v27 = vsel %vm31_vm0, %v6668_v63, %v3526_v0 }
0x26ed   :  { %v3957_v51 = vsel %vm134_vm3, %v3530_v27, %v3953_v26 }
0x26ee   :  { %5135 = vmatmul.mubr.msk.f32.gmra.mrb[54].mxu1 %vm181_vm4, %v3957_v51 }
0x26ef   :  { %5137 = vmatprep.mubr.msk.f32.mxu1 %vm5726_vm1, %v5727_v12 }
0x270e   :  { %v4055_v58 = vpop.xlane.xlu0 %4054 }
0x270f   :  { %v4062_v63 = vmul.f32 0.03125, %v4055_v58  ;;  %v4535_v58 = vld [vmem:[%s6882_s4 + $0x12] ss:$0 sm:$0xff] }
0x2711   :  { %v4065_v45 = vsub.f32 %v4050_v4, %v4062_v63 }
0x2712   :  { %v3946_v62 = vpop.permute.xlu0 %3945 }
0x2713   :  { %v3950_v33 = vsel %vm31_vm0, %v6705_v39, %v3946_v62  ;;  %v4068_v48 = vmul.f32 %v4065_v45, %v4065_v45 }
0x2714   :  { %v3954_v47 = vrot.slane %v3950_v33, 6 }
0x2715   :  { %v4071_v39 = vsel %vm181_vm4, %v4068_v48, 0.0 }
0x2716   :  { %v3955_v36 = vsel %vm134_vm3, %v3953_v26, %v3954_v47 }
0x2717   :  { %5138 = vmatmul.mubr.msk.f32.gmra.mrb[56].mxu1 %vm181_vm4, %v3955_v36 }
0x2718   :  { %5173 = vmatprep.mubr.msk.f32.mxu1 %vm5726_vm1, %v5727_v12 }
0x27c1   :  { %v4041_v41 = vpop.f32.mrb[54].mxu1 }
0x27c2   :  { %v4042_v37 = vadd.f32 %v4529_v54, %v4041_v41  ;;  %v5136_v42 = vpop.f32.mrb[55].mxu1 }
0x27c4   :  { %v4051_v44 = vadd.f32 %v4042_v37, %v6583_v5  ;;  %v3002_v5 = vld [vmem:[%s6881_s3 + $0x190] sm:$0xff] }
0x27c5   :  { %v5418_v35 = vpack.c.bf16 %v3003_v55, %v3002_v5 }
0x27c6   :  { %v4056_v29 = vsel %vm181_vm4, %v4051_v44, 0.0 }
0x27c7   :  { %4057 = vadd.xlane.f32.xlu1 %v4056_v29  ;;  %5419 = vmatpush3.bf16.msra.mxu0 %v5418_v35 }
0x27cb   :  { %4072 = vadd.xlane.f32.xlu1 %v4071_v39 }
0x27ea   :  { %v4046_v31 = vpop.f32.mrb[56].mxu1 }
0x27eb   :  { %v5139_v57 = vpop.f32.mrb[57].mxu1  ;;  %v4047_v59 = vadd.f32 %v4529_v54, %v4046_v31  ;;  %v5430_v54 = vpack.c.bf16 %v3011_v6, %v3010_v30  ;;  %v4544_v30 = vld [vmem:[%s6882_s4 + $0x17] ss:$0 sm:$0xff] }
0x27ed   :  { %v4052_v53 = vadd.f32 %v4047_v59, %v6615_v40  ;;  %5431 = vmatpush3.bf16.msra.mxu1 %v5430_v54 }
0x27ef   :  { %v4059_v32 = vsel %vm1218_vm12, %v4052_v53, 0.0 }
0x2854   :  { %v4058_v15 = vpop.xlane.xlu1 %4057 }
0x2855   :  { %v4063_v34 = vmul.f32 0.03125, %v4058_v15 }
0x2857   :  { %v4066_v60 = vsub.f32 %v4051_v44, %v4063_v34 }
0x2858   :  { %v4073_v61 = vpop.xlane.xlu1 %4072 }
0x2859   :  { %v4080_v8 = vmul.f32 0.03125, %v4073_v61  ;;  %v4069_v56 = vmul.f32 %v4066_v60, %v4066_v60 }
0x285b   :  { %v4083_v10 = vadd.f32 1e-05, %v4080_v8  ;;  %v4074_v11 = vsel %vm181_vm4, %v4069_v56, 0.0 }
0x285c   :  { %4075 = vadd.xlane.f32.xlu1 %v4074_v11 }
0x285d   :  { %5684 = vrsqrt.f32 %v4083_v10 }
0x2860   :  { %4060 = vadd.xlane.f32.xlu1 %v4059_v32 }
0x2867   :  { %v5685_v13 = vpop.eup %5684 }
0x2868   :  { %v4089_v16 = vmul.f32 %v5685_v13, %v4065_v45 }
0x286a   :  { %v4096_v43 = vmul.f32 %v4533_v14, %v4089_v16 }
0x286c   :  { %v4103_v40 = vadd.f32 %v4534_v50, %v4096_v43 }
0x286e   :  { %5149 = vmatmul.mubr.msk.f32.vlgmr.msra.gmra.mrb[58].mxu0 %vm181_vm4, %v4103_v40 }
0x286f   :  { %5151 = vmatprep.mubr.msk.f32.mxu0 %vm5726_vm1, %v5727_v12 }
0x28e9   :  { %v4076_v9 = vpop.xlane.xlu1 %4075 }
0x28ea   :  { %v4081_v24 = vmul.f32 0.03125, %v4076_v9 }
0x28ec   :  { %v4084_v25 = vadd.f32 1e-05, %v4081_v24 }
0x28ed   :  { %v4061_v4 = vpop.xlane.xlu1 %4060 }
0x28ee   :  { %5686 = vrsqrt.f32 %v4084_v25  ;;  %v4064_v46 = vmul.f32 0.03125, %v4061_v4 }
0x28f0   :  { %v4067_v3 = vsub.f32 %v4052_v53, %v4064_v46 }
0x28f2   :  { %v4070_v22 = vmul.f32 %v4067_v3, %v4067_v3 }
0x28f4   :  { %v4077_v7 = vsel %vm1218_vm12, %v4070_v22, 0.0 }
0x28f5   :  { %4078 = vadd.xlane.f32.xlu1 %v4077_v7 }
0x28f8   :  { %v5687_v26 = vpop.eup %5686 }
0x28f9   :  { %v4090_v0 = vmul.f32 %v5687_v26, %v4066_v60 }
0x28fb   :  { %v4097_v27 = vmul.f32 %v4533_v14, %v4090_v0 }
0x28fd   :  { %v4104_v51 = vadd.f32 %v4534_v50, %v4097_v27 }
0x28ff   :  { %5152 = vmatmul.mubr.msk.f32.gmra.mrb[60].mxu0 %vm181_vm4, %v4104_v51 }
0x2900   :  { %5154 = vmatprep.mubr.msk.f32.mxu0 %vm5726_vm1, %v5727_v12 }
0x2941   :  { %v4185_v62 = vpop.f32.mrb[58].mxu0 }
0x2942   :  { %v4186_v33 = vadd.f32 %v4535_v58, %v4185_v62  ;;  %v5150_v47 = vpop.f32.mrb[59].mxu0 }
0x2944   :  { %v4199_v36 = vmax.f32 %v4186_v33, 0.0 }
0x2946   :  { %5174 = vmatmul.mubr.msk.f32.vlgmr.msra.gmra.mrb[58].mxu1 %vm1363_vm11, %v4199_v36 }
0x2947   :  { %5176 = vmatprep.mubr.msk.f32.mxu1 %vm5726_vm1, %v5727_v12 }
0x2982   :  { %v4079_v63 = vpop.xlane.xlu1 %4078 }
0x2983   :  { %v4082_v41 = vmul.f32 0.03125, %v4079_v63 }
0x2985   :  { %v4085_v45 = vadd.f32 1e-05, %v4082_v41 }
0x2987   :  { %5688 = vrsqrt.f32 %v4085_v45 }
0x2991   :  { %v5689_v37 = vpop.eup %5688 }
0x2992   :  { %v4091_v42 = vmul.f32 %v5689_v37, %v4067_v3 }
0x2994   :  { %v4098_v44 = vmul.f32 %v4533_v14, %v4091_v42 }
0x2996   :  { %v4105_v29 = vadd.f32 %v4534_v50, %v4098_v44 }
0x2998   :  { %5155 = vmatmul.mubr.msk.f32.gmra.mrb[62].mxu0 %vm181_vm4, %v4105_v29 }
0x29d2   :  { %v4190_v48 = vpop.f32.mrb[60].mxu0 }
0x29d3   :  { %v4191_v39 = vadd.f32 %v4535_v58, %v4190_v48  ;;  %v5153_v38 = vpop.f32.mrb[61].mxu0 }
0x29d5   :  { %v4200_v52 = vmax.f32 %v4191_v39, 0.0 }
0x29d7   :  { %5177 = vmatmul.mubr.msk.f32.gmra.mrb[60].mxu1 %vm1363_vm11, %v4200_v52  ;;  %v4545_v52 = vld [vmem:[%s6882_s4 + $0x19] ss:$0 sm:$0xff] }
0x29d8   :  { %5179 = vmatprep.mubr.msk.f32.mxu1 %vm5726_vm1, %v5727_v12 }
0x2a19   :  { %v4277_v5 = vpop.f32.mrb[58].mxu1 }
0x2a1a   :  { %v4290_v55 = vadd.f32 %v4277_v5, %v4103_v40  ;;  %v5175_v35 = vpop.f32.mrb[59].mxu1 }
0x2a1b   :  { %v4546_v35 = vld [vmem:[%s6882_s4 + $0x1a] ss:$0 sm:$0xff] }
0x2a1c   :  { %v4296_v31 = vadd.f32 %v4542_v19, %v4290_v55 }
0x2a1e   :  { %v4298_v57 = vsel %vm181_vm4, %v4296_v31, 0.0 }
0x2a1f   :  { %4299 = vadd.xlane.f32.xlu0 %v4298_v57 }
0x2a6b   :  { %v4195_v15 = vpop.f32.mrb[62].mxu0 }
0x2a6c   :  { %v4196_v34 = vadd.f32 %v4535_v58, %v4195_v15  ;;  %v5156_v59 = vpop.f32.mrb[63].mxu0 }
0x2a6e   :  { %v4201_v60 = vmax.f32 %v4196_v34, 0.0 }
0x2a70   :  { %5180 = vmatmul.mubr.msk.f32.gmra.mrb[62].mxu1 %vm1363_vm11, %v4201_v60 }
0x2aaa   :  { %v4282_v61 = vpop.f32.mrb[60].mxu1 }
0x2aab   :  { %v4291_v8 = vadd.f32 %v4282_v61, %v4104_v51  ;;  %v5178_v12 = vpop.f32.mrb[61].mxu1 }
0x2aac   :  { %v4300_v56 = vpop.xlane.xlu0 %4299 }
0x2aad   :  { %v4297_v53 = vadd.f32 %v4542_v19, %v4291_v8  ;;  %v4304_v10 = vmul.f32 0.03125, %v4300_v56 }
0x2aaf   :  { %v4306_v11 = vsub.f32 %v4296_v31, %v4304_v10  ;;  %v4301_v32 = vsel %vm181_vm4, %v4297_v53, 0.0 }
0x2ab0   :  { %4302 = vadd.xlane.f32.xlu1 %v4301_v32 }
0x2ab1   :  { %v4308_v13 = vmul.f32 %v4306_v11, %v4306_v11 }
0x2ab3   :  { %v4310_v14 = vsel %vm181_vm4, %v4308_v13, 0.0 }
0x2ab4   :  { %4311 = vadd.xlane.f32.xlu1 %v4310_v14 }
0x2b3d   :  { %v4303_v16 = vpop.xlane.xlu1 %4302 }
0x2b3e   :  { %v4305_v50 = vmul.f32 0.03125, %v4303_v16 }
0x2b40   :  { %v4307_v43 = vsub.f32 %v4297_v53, %v4305_v50 }
0x2b41   :  { %v4312_v40 = vpop.xlane.xlu1 %4311 }
0x2b42   :  { %v4316_v1 = vmul.f32 0.03125, %v4312_v40  ;;  %v4309_v28 = vmul.f32 %v4307_v43, %v4307_v43 }
0x2b43   :  { %v4287_v23 = vpop.f32.mrb[62].mxu1 }
0x2b44   :  { %v4318_v2 = vadd.f32 1e-05, %v4316_v1  ;;  %v5181_v17 = vpop.f32.mrb[63].mxu1  ;;  %v4313_v21 = vsel %vm181_vm4, %v4309_v28, 0.0 }
0x2b45   :  { %4314 = vadd.xlane.f32.xlu1 %v4313_v21 }
0x2b46   :  { %5690 = vrsqrt.f32 %v4318_v2 }
0x2b50   :  { %v5691_v20 = vpop.eup %5690 }
0x2b51   :  { %v4322_v49 = vmul.f32 %v5691_v20, %v4306_v11 }
0x2b53   :  { %v4328_v6 = vmul.f32 %v4543_v18, %v4322_v49 }
0x2b55   :  { %v4334_v54 = vadd.f32 %v4544_v30, %v4328_v6 }
0x2b57   :  { %v4338_v9 = vsel %vm181_vm4, %v4334_v54, 0.0 }
0x2b58   :  { %4339 = vadd.xlane.f32.xlu1 %v4338_v9 }
0x2bd2   :  { %v4315_v24 = vpop.xlane.xlu1 %4314 }
0x2bd3   :  { %v4317_v25 = vmul.f32 0.03125, %v4315_v24 }
0x2bd5   :  { %v4319_v4 = vadd.f32 1e-05, %v4317_v25 }
0x2bd7   :  { %5692 = vrsqrt.f32 %v4319_v4 }
0x2be1   :  { %v5693_v46 = vpop.eup %5692 }
0x2be2   :  { %v4323_v3 = vmul.f32 %v5693_v46, %v4307_v43 }
0x2be4   :  { %v4329_v22 = vmul.f32 %v4543_v18, %v4323_v3 }
0x2be5   :  { %v4340_v7 = vpop.xlane.xlu1 %4339 }
0x2be6   :  { %v4344_v26 = vmul.f32 0.03125, %v4340_v7  ;;  %v4335_v0 = vadd.f32 %v4544_v30, %v4329_v22 }
0x2be8   :  { %v4346_v27 = vsub.f32 %v4334_v54, %v4344_v26  ;;  %v4341_v51 = vsel %vm181_vm4, %v4335_v0, 0.0 }
0x2be9   :  { %4342 = vadd.xlane.f32.xlu1 %v4341_v51 }
0x2bea   :  { %v4348_v58 = vmul.f32 %v4346_v27, %v4346_v27 }
0x2bec   :  { %v4350_v62 = vsel %vm181_vm4, %v4348_v58, 0.0 }
0x2bed   :  { %4351 = vadd.xlane.f32.xlu1 %v4350_v62 }
0x2c76   :  { %v4343_v33 = vpop.xlane.xlu1 %4342 }
0x2c77   :  { %v4345_v47 = vmul.f32 0.03125, %v4343_v33 }
0x2c79   :  { %v4347_v36 = vsub.f32 %v4335_v0, %v4345_v47 }
0x2c7a   :  { %v4352_v45 = vpop.xlane.xlu1 %4351 }
0x2c7b   :  { %v4349_v63 = vmul.f32 %v4347_v36, %v4347_v36  ;;  %v4356_v37 = vmul.f32 0.03125, %v4352_v45 }
0x2c7d   :  { %v4353_v41 = vsel %vm181_vm4, %v4349_v63, 0.0  ;;  %v4358_v42 = vadd.f32 1e-05, %v4356_v37 }
0x2c7e   :  { %4354 = vadd.xlane.f32.xlu1 %v4353_v41 }
0x2c7f   :  { %5694 = vrsqrt.f32 %v4358_v42 }
0x2c89   :  { %v5695_v39 = vpop.eup %5694 }
0x2c8a   :  { %v4362_v38 = vmul.f32 %v5695_v39, %v4346_v27 }
0x2c8c   :  { %v4368_v55 = vmul.f32 %v4545_v52, %v4362_v38 }
0x2c8e   :  { %v4374_v57 = vadd.f32 %v4546_v35, %v4368_v55 }
0x2d0b   :  { %v4355_v44 = vpop.xlane.xlu1 %4354 }
0x2d0c   :  { %v4357_v29 = vmul.f32 0.03125, %v4355_v44 }
0x2d0e   :  { %v4359_v48 = vadd.f32 1e-05, %v4357_v29 }
0x2d10   :  { %5696 = vrsqrt.f32 %v4359_v48 }
0x2d1a   :  { %v5697_v19 = vpop.eup %5696 }
0x2d1b   :  { %v4363_v5 = vmul.f32 %v5697_v19, %v4347_v36 }
0x2d1d   :  { %v4369_v31 = vmul.f32 %v4545_v52, %v4363_v5 }
0x2d1f   :  { %v4375_v15 = vadd.f32 %v4546_v35, %v4369_v31 }
0x2d21   :  { %v4376_v34 = vsel %vm134_vm3, %v4374_v57, %v4375_v15 }
0x2d22   :  { %4377 = vst.msk [vmem:[#allocation2] sm:$0xf] %vm1218_vm12, %v4376_v34 }
0x2d23   :  { %5712 = shalt.err (!%p5709_p4)
}
0x2d24   :  { %s5713_s4 = scalar_lea.hbm %s6883_s5, 64 }
0x2d25   :  { %p5714_p5 = scmp.ne.s32.totalorder %s6883_s5, %s5713_s4  ;;  %p5717_p6 = scmp.lt.u32.totalorder %s5713_s4, %s6883_s5 }
0x2d27   :  { %p5719_p7 = pnand %p5717_p6, %p5714_p5 }
0x2d29   :  { %5722 = shalt.err (!%p5719_p7)
}
0x2d2a   :  { %4387 = dma.vmem_to_hbm [thread:$0]  %s4385_s16, 64, %s6883_s5, [#allocation3]  }
0x2d2b   :  { %5723 = dma.done.wait [#allocation3], 64  }
0x2d2c   :  { %5724 = vsyncadd [#allocation3], 4294967232 }
0x2d2d   :  { %4391 = vsyncpa [#allocation3], 1 }

</bundles_post_ra>
